<compile_context>
chip_gen: v6e
topology: v6e:2x2x1
jax: 0.10.0
libtpu: 0.0.40
codegen_flags: <defaults>
</compile_context>

<pallas_src>
import numpy as np
import jax
import jax.numpy as jnp
from jax.experimental import pallas as pl
from jax.experimental.pallas import tpu as pltpu  # noqa: F401 (TPU backend)

# ---- model / problem sizes (small, consistent with the module) -------------
B, S, H = 2, 8, 32          # batch, seq, hidden
NH, KVH, DH = 4, 2, 8       # heads, kv heads, head_dim  (H = NH * DH)
GROUPS = NH // KVH          # GQA repeat factor
KVD = KVH * DH              # kv projection width (16)
QKVD = H + 2 * KVD          # fused q|k|v width (64)
ROPE_W = H + KVD            # rope applies to the q|k part only (48)
I = 64                      # MLP intermediate size
BS = B * S                  # fused batch*seq rows (16)
EPS = 1e-6                  # rms_norm_eps
BLOCK = 4                   # glide torch_mask block size
ROPE_THETA = 10000.0
NEG = -1e30                 # additive mask value (exp underflows to exactly 0)
PREC = jax.lax.Precision.HIGHEST

# row offsets inside the packed constants buffer (all multiples of 8 sublanes)
R_LN1, R_LN2, R_LN3, R_BQKV, R_BQ2 = 0, 8, 16, 24, 32
R_COS = 40
R_SIN = R_COS + BS          # 56
R_ROT = R_SIN + BS          # 72
CONST_ROWS = R_ROT + QKVD   # 136


def _dot(a, b):
    return jnp.dot(a, b, preferred_element_type=jnp.float32, precision=PREC)


# ---------------------------- Pallas kernel ---------------------------------
def glide_layer_kernel(x_ref, kvb_ref, c_ref,
                       wqkv_ref, wo_ref, wq2_ref, wo2_ref, wgu_ref, wd_ref,
                       out_ref):
    x = x_ref[...]                       # (BS, H)   batch folded into rows

    # packed llm-KV + mask buffer (all 16-lane wide)
    kct = kvb_ref[0:BS, :]               # (KVD, BS)  llm K cache, pre-transposed
    vc = kvb_ref[BS:2 * BS, :]           # (BS, KVD)  llm V cache
    bias = kvb_ref[2 * BS:3 * BS, :]     # (BS, BS)   additive glide mask

    # packed constants buffer
    ln1 = c_ref[R_LN1:R_LN1 + 1, :H]     # (1, H) rmsnorm gammas
    ln2 = c_ref[R_LN2:R_LN2 + 1, :H]
    ln3 = c_ref[R_LN3:R_LN3 + 1, :H]
    bqkv = c_ref[R_BQKV:R_BQKV + 1, :]   # (1, QKVD) fused q|k|v bias
    bq2 = c_ref[R_BQ2:R_BQ2 + 1, :H]     # (1, H)    cross-attn q bias
    cos = c_ref[R_COS:R_COS + BS, :]     # (BS, QKVD) rope cos (1.0 on v cols)
    sin = c_ref[R_SIN:R_SIN + BS, :]     # (BS, QKVD) rope sin (0.0 on v cols)
    rot = c_ref[R_ROT:R_ROT + QKVD, :]   # (QKVD, QKVD) block-diag rotate_half

    scale = 1.0 / (DH ** 0.5)

    def rmsnorm(v, w):
        var = jnp.mean(v * v, axis=-1, keepdims=True)
        return (v * jax.lax.rsqrt(var + EPS)) * w

    def attention(q, k_t, v, wo):
        # q: (BS, NH*DH), k_t: (KVH*DH, BS), v: (BS, KVH*DH).
        # GQA via a static (unrolled) head loop; each head's output is folded
        # directly into the output projection (accumulate) -- no lane concat.
        acc = jnp.zeros((BS, H), jnp.float32)
        for h in range(NH):
            g = h // GROUPS                          # repeat_interleave mapping
            qh = q[:, h * DH:(h + 1) * DH]           # (BS, DH)
            kh_t = k_t[g * DH:(g + 1) * DH, :]       # (DH, BS) sublane slice
            vh = v[:, g * DH:(g + 1) * DH]           # (BS, DH)
            s = _dot(qh, kh_t) * scale + bias        # (BS, BS) masked scores
            m = jnp.max(s, axis=-1, keepdims=True)   # fp32 softmax
            e = jnp.exp(s - m)
            p = e * pl.reciprocal(jnp.sum(e, axis=-1, keepdims=True),
                                  approx=True)
            acc = acc + _dot(_dot(p, vh), wo[h * DH:(h + 1) * DH, :])
        return acc

    # ---- self attention block (sa_training) ----
    h1 = rmsnorm(x, ln1)
    qkv = _dot(h1, wqkv_ref[...]) + bqkv                      # fused q|k|v (BS,64)
    # RoPE on q|k in one shot: rotate_half(t) == t @ rot; the v columns pass
    # through untouched because cos==1 / sin==0 / rot==0 there.
    qkv = qkv * cos + _dot(qkv, rot) * sin
    q = qkv[:, :H]
    k_t = jnp.transpose(qkv[:, H:H + KVD])                    # (KVD, BS)
    v = qkv[:, H + KVD:]
    hid = x + attention(q, k_t, v, wo_ref[...])

    # ---- cross attention (ca_training; K/V from llm_kv cache, query-only rope) ----
    h2 = rmsnorm(hid, ln2)
    q2 = _dot(h2, wq2_ref[...]) + bq2
    q2 = q2 * cos[:, :H] + _dot(q2, rot[:H, :H]) * sin[:, :H]
    hid = hid + attention(q2, kct, vc, wo2_ref[...])

    # ---- MLP (Qwen2MLP: down(silu(gate(x)) * up(x))), fused gate|up ----
    h3 = rmsnorm(hid, ln3)
    gu = _dot(h3, wgu_ref[...])                               # (BS, 2*I)=(16,128)
    gate = gu[:, :I]
    up = gu[:, I:]
    silu = gate * (1.0 / (1.0 + jnp.exp(-gate)))
    out_ref[...] = hid + _dot(silu * up, wd_ref[...])


# ------------------------------ wrapper --------------------------------------
def glide_decoder_layer(x, cos, sin, kc, vc, params):
    # Host/trace-time preprocessing: fold batch into rows, fuse weights, build
    # packed constants (rope tables + rotate_half matrix + rmsnorm/bias rows)
    # and the packed llm-KV + additive-mask buffer.
    x2 = x.reshape(BS, H)
    kct = kc.reshape(BS, KVD).T                    # (KVD, BS) pre-transposed K
    vc2 = vc.reshape(BS, KVD)

    wqkv = jnp.concatenate([params["wq"], params["wk"], params["wv"]], axis=1)
    bqkv = jnp.concatenate([params["bq"], params["bk"], params["bv"]], axis=1)
    wgu = jnp.concatenate([params["wg"], params["wu"]], axis=1)   # (H, 2I)

    # rope tables: cos/sin are shared across the batch in this training path
    # (positions 0..S-1 per batch element), tiled per q|k head column block.
    cos_qk = jnp.tile(cos[0], (B, ROPE_W // DH))               # (BS, 48)
    sin_qk = jnp.tile(sin[0], (B, ROPE_W // DH))
    cos_full = jnp.concatenate(
        [cos_qk, jnp.ones((BS, KVD), jnp.float32)], axis=1)    # (BS, 64)
    sin_full = jnp.concatenate(
        [sin_qk, jnp.zeros((BS, KVD), jnp.float32)], axis=1)

    # block-diagonal rotate_half matrix: per-DH block [[0, I], [-I, 0]];
    # zero over the v columns (rope is identity there).
    r_blk = np.zeros((DH, DH), np.float32)
    r_blk[:DH // 2, DH // 2:] = np.eye(DH // 2)
    r_blk[DH // 2:, :DH // 2] = -np.eye(DH // 2)
    rot_np = np.zeros((QKVD, QKVD), np.float32)
    for i in range(ROPE_W // DH):
        rot_np[i * DH:(i + 1) * DH, i * DH:(i + 1) * DH] = r_blk
    rot = jnp.asarray(rot_np)

    # glide torch_mask extended to the fused-batch (BS, BS) layout as an
    # additive bias (0 where allowed, NEG where masked / cross-batch).
    qi = np.arange(S)[:, None]
    ki = np.arange(S)[None, :]
    glide = (qi // BLOCK > ki // BLOCK) | ((qi < BLOCK) & (ki < BLOCK))
    rows = np.arange(BS)
    same_batch = (rows[:, None] // S) == (rows[None, :] // S)
    allowed = same_batch & glide[rows[:, None] % S, rows[None, :] % S]
    bias = jnp.asarray(np.where(allowed, 0.0, NEG).astype(np.float32))

    # pack row-vectors / rope / rot into one constants buffer (136, 64);
    # every section starts on a multiple-of-8 sublane offset.
    def pad_lane(a, w=QKVD):
        return jnp.pad(a, ((0, 0), (0, w - a.shape[1])))

    def pad_sub(a, r=8):
        return jnp.pad(a, ((0, r - a.shape[0]), (0, 0)))

    consts = jnp.concatenate([
        pad_sub(pad_lane(params["ln1"])),
        pad_sub(pad_lane(params["ln2"])),
        pad_sub(pad_lane(params["ln3"])),
        pad_sub(bqkv),
        pad_sub(pad_lane(params["bq2"])),
        cos_full,
        sin_full,
        rot,
    ], axis=0)                                      # (CONST_ROWS, QKVD)

    kvb = jnp.concatenate([kct, vc2, bias], axis=0)  # (3*BS, 16)

    out = pl.pallas_call(
        glide_layer_kernel,
        out_shape=jax.ShapeDtypeStruct((BS, H), jnp.float32),
    )(x2, kvb, consts,
      wqkv, params["wo"], params["wq2"], params["wo2"], wgu, params["wd"])
    return out.reshape(B, S, H)


# --------------------------- pure-JAX reference ------------------------------
def reference(x, cos, sin, kc, vc, p):
    qi = np.arange(S)[:, None]
    ki = np.arange(S)[None, :]
    mask = jnp.asarray((qi // BLOCK > ki // BLOCK) |
                       ((qi < BLOCK) & (ki < BLOCK)))

    def rmsnorm(v, w):
        var = jnp.mean(v * v, axis=-1, keepdims=True)
        return (v * jax.lax.rsqrt(var + EPS)) * w

    def split_heads(t, n):
        return t.reshape(B, S, n, DH).transpose(0, 2, 1, 3)

    def rope(t):  # t: (B, n, S, DH)
        c, s_ = cos[:, None], sin[:, None]
        t1, t2 = t[..., : DH // 2], t[..., DH // 2:]
        return t * c + jnp.concatenate([-t2, t1], -1) * s_

    def attn(q, k, v):
        k = jnp.repeat(k, GROUPS, axis=1)
        v = jnp.repeat(v, GROUPS, axis=1)
        s = jnp.einsum('bhqd,bhkd->bhqk', q, k, precision=PREC) / (DH ** 0.5)
        s = jnp.where(mask[None, None], s, -jnp.inf)
        pw = jax.nn.softmax(s, axis=-1)
        o = jnp.einsum('bhqk,bhkd->bhqd', pw, v, precision=PREC)
        return o.transpose(0, 2, 1, 3).reshape(B, S, H)

    def lin(t, w, b=None):
        y = jnp.einsum('bsh,hd->bsd', t, w, precision=PREC)
        return y if b is None else y + b

    h1 = rmsnorm(x, p["ln1"][0])
    q = rope(split_heads(lin(h1, p["wq"], p["bq"]), NH))
    k = rope(split_heads(lin(h1, p["wk"], p["bk"]), KVH))
    v = split_heads(lin(h1, p["wv"], p["bv"]), KVH)
    hid = x + lin(attn(q, k, v), p["wo"])

    h2 = rmsnorm(hid, p["ln2"][0])
    q2 = rope(split_heads(lin(h2, p["wq2"], p["bq2"]), NH))
    hid = hid + lin(attn(q2, split_heads(kc, KVH), split_heads(vc, KVH)),
                    p["wo2"])

    h3 = rmsnorm(hid, p["ln3"][0])
    mlp = lin(jax.nn.silu(lin(h3, p["wg"])) * lin(h3, p["wu"]), p["wd"])
    return hid + mlp


# --------------------------------- main ---------------------------------------
if __name__ == "__main__":
    # TODO(synk): only the 'training' exec path is implemented; the stateful
    # KV-cache prefill / decoding / tree-decoding paths mutate module state and
    # are out of scope for this forward kernel.
    key = jax.random.PRNGKey(0)
    ks = jax.random.split(key, 20)
    std = 0.05

    def nrm(k, shape, scale=std):
        return scale * jax.random.normal(k, shape, dtype=jnp.float32)

    params = {
        "ln1": 1.0 + 0.01 * jax.random.normal(ks[0], (1, H), dtype=jnp.float32),
        "wq": nrm(ks[1], (H, H)), "bq": nrm(ks[2], (1, H)),
        "wk": nrm(ks[3], (H, KVD)), "bk": nrm(ks[4], (1, KVD)),
        "wv": nrm(ks[5], (H, KVD)), "bv": nrm(ks[6], (1, KVD)),
        "wo": nrm(ks[7], (H, H)),
        "ln2": 1.0 + 0.01 * jax.random.normal(ks[8], (1, H), dtype=jnp.float32),
        "wq2": nrm(ks[9], (H, H)), "bq2": nrm(ks[10], (1, H)),
        "wo2": nrm(ks[11], (H, H)),
        "ln3": 1.0 + 0.01 * jax.random.normal(ks[12], (1, H), dtype=jnp.float32),
        "wg": nrm(ks[13], (H, I)), "wu": nrm(ks[14], (H, I)),
        "wd": nrm(ks[15], (I, H)),
    }

    x = jax.random.normal(ks[16], (B, S, H), dtype=jnp.float32)
    kc = jax.random.normal(ks[17], (B, S, KVD), dtype=jnp.float32)   # llm_kv[0]
    vc = jax.random.normal(ks[18], (B, S, KVD), dtype=jnp.float32)   # llm_kv[1]

    # Qwen2RotaryEmbedding position embeddings (cos, sin)
    inv_freq = 1.0 / (ROPE_THETA ** (jnp.arange(0, DH, 2, dtype=jnp.float32) / DH))
    pos = jnp.arange(S, dtype=jnp.float32)
    freqs = pos[:, None] * inv_freq[None, :]
    emb = jnp.concatenate([freqs, freqs], axis=-1)            # (S, DH)
    cos = jnp.broadcast_to(jnp.cos(emb)[None], (B, S, DH)).astype(jnp.float32)
    sin = jnp.broadcast_to(jnp.sin(emb)[None], (B, S, DH)).astype(jnp.float32)

    out = jax.jit(glide_decoder_layer)(x, cos, sin, kc, vc, params)
    out = jax.block_until_ready(out)

    ref = reference(x, cos, sin, kc, vc, params)
    np.testing.assert_allclose(np.asarray(out), np.asarray(ref),
                               rtol=5e-3, atol=5e-3)
    print("KERNEL_OK")
</pallas_src>

<mosaic_0001>
module attributes {stable_mosaic.version = 11 : i64} {
  func.func @glide_layer_kernel(%arg0: memref<16x32xf32, #tpu.memory_space<vmem>>, %arg1: memref<48x16xf32, #tpu.memory_space<vmem>>, %arg2: memref<136x64xf32, #tpu.memory_space<vmem>>, %arg3: memref<32x64xf32, #tpu.memory_space<vmem>>, %arg4: memref<32x32xf32, #tpu.memory_space<vmem>>, %arg5: memref<32x32xf32, #tpu.memory_space<vmem>>, %arg6: memref<32x32xf32, #tpu.memory_space<vmem>>, %arg7: memref<32x128xf32, #tpu.memory_space<vmem>>, %arg8: memref<64x32xf32, #tpu.memory_space<vmem>>, %arg9: memref<16x32xf32, #tpu.memory_space<vmem>>) attributes {dimension_semantics = [], scalar_prefetch = 0 : i64, scratch_operands = 0 : i64, tpu.core_type = #tpu.core_type<tc>} {
    %c0 = arith.constant 0 : index
    %c0_0 = arith.constant 0 : index
    %0 = vector.load %arg0[%c0, %c0_0] : memref<16x32xf32, #tpu.memory_space<vmem>>, vector<16x32xf32>
    %c0_1 = arith.constant 0 : index
    %c0_2 = arith.constant 0 : index
    %1 = vector.load %arg1[%c0_1, %c0_2] : memref<48x16xf32, #tpu.memory_space<vmem>>, vector<16x16xf32>
    %c16 = arith.constant 16 : index
    %c0_3 = arith.constant 0 : index
    %2 = vector.load %arg1[%c16, %c0_3] : memref<48x16xf32, #tpu.memory_space<vmem>>, vector<16x16xf32>
    %c32 = arith.constant 32 : index
    %c0_4 = arith.constant 0 : index
    %3 = vector.load %arg1[%c32, %c0_4] : memref<48x16xf32, #tpu.memory_space<vmem>>, vector<16x16xf32>
    %c0_5 = arith.constant 0 : index
    %c0_6 = arith.constant 0 : index
    %4 = vector.load %arg2[%c0_5, %c0_6] : memref<136x64xf32, #tpu.memory_space<vmem>>, vector<1x32xf32>
    %c8 = arith.constant 8 : index
    %c0_7 = arith.constant 0 : index
    %5 = vector.load %arg2[%c8, %c0_7] : memref<136x64xf32, #tpu.memory_space<vmem>>, vector<1x32xf32>
    %c16_8 = arith.constant 16 : index
    %c0_9 = arith.constant 0 : index
    %6 = vector.load %arg2[%c16_8, %c0_9] : memref<136x64xf32, #tpu.memory_space<vmem>>, vector<1x32xf32>
    %c24 = arith.constant 24 : index
    %c0_10 = arith.constant 0 : index
    %7 = vector.load %arg2[%c24, %c0_10] : memref<136x64xf32, #tpu.memory_space<vmem>>, vector<1x64xf32>
    %c32_11 = arith.constant 32 : index
    %c0_12 = arith.constant 0 : index
    %8 = vector.load %arg2[%c32_11, %c0_12] : memref<136x64xf32, #tpu.memory_space<vmem>>, vector<1x32xf32>
    %c40 = arith.constant 40 : index
    %c0_13 = arith.constant 0 : index
    %9 = vector.load %arg2[%c40, %c0_13] : memref<136x64xf32, #tpu.memory_space<vmem>>, vector<16x64xf32>
    %c56 = arith.constant 56 : index
    %c0_14 = arith.constant 0 : index
    %10 = vector.load %arg2[%c56, %c0_14] : memref<136x64xf32, #tpu.memory_space<vmem>>, vector<16x64xf32>
    %c72 = arith.constant 72 : index
    %c0_15 = arith.constant 0 : index
    %11 = vector.load %arg2[%c72, %c0_15] : memref<136x64xf32, #tpu.memory_space<vmem>>, vector<64x64xf32>
    %12 = arith.mulf %0, %0 : vector<16x32xf32>
    %cst = arith.constant dense<0.000000e+00> : vector<16xf32>
    %13 = vector.multi_reduction <add>, %12, %cst [1] : vector<16x32xf32> to vector<16xf32>
    %14 = vector.shape_cast %13 : vector<16xf32> to vector<16x1xf32>
    %cst_16 = arith.constant 3.200000e+01 : f32
    %15 = vector.broadcast %cst_16 : f32 to vector<16x1xf32>
    %16 = arith.divf %14, %15 : vector<16x1xf32>
    %cst_17 = arith.constant 9.99999997E-7 : f32
    %17 = vector.broadcast %cst_17 : f32 to vector<16x1xf32>
    %18 = arith.addf %16, %17 : vector<16x1xf32>
    %19 = math.rsqrt %18 : vector<16x1xf32>
    %20 = vector.broadcast %19 : vector<16x1xf32> to vector<16x32xf32>
    %21 = arith.mulf %0, %20 : vector<16x32xf32>
    %22 = vector.broadcast %4 : vector<1x32xf32> to vector<16x32xf32>
    %23 = arith.mulf %21, %22 : vector<16x32xf32>
    %c0_18 = arith.constant 0 : index
    %c0_19 = arith.constant 0 : index
    %24 = vector.load %arg3[%c0_18, %c0_19] : memref<32x64xf32, #tpu.memory_space<vmem>>, vector<32x64xf32>
    %cst_20 = arith.constant dense<0.000000e+00> : vector<16x64xf32>
    %25 = tpu.matmul %23, %24, %cst_20 {dimension_numbers = #tpu.dot_dimension_numbers<[1], [0], [0], [1], [0, 0, 1, 1], [], []>, precision = #tpu.contract_precision<fp32>} : vector<16x32xf32>, vector<32x64xf32>, vector<16x64xf32> -> vector<16x64xf32>
    %26 = vector.broadcast %7 : vector<1x64xf32> to vector<16x64xf32>
    %27 = arith.addf %25, %26 : vector<16x64xf32>
    %28 = arith.mulf %27, %9 : vector<16x64xf32>
    %cst_21 = arith.constant dense<0.000000e+00> : vector<16x64xf32>
    %29 = tpu.matmul %27, %11, %cst_21 {dimension_numbers = #tpu.dot_dimension_numbers<[1], [0], [0], [1], [0, 0, 1, 1], [], []>, precision = #tpu.contract_precision<fp32>} : vector<16x64xf32>, vector<64x64xf32>, vector<16x64xf32> -> vector<16x64xf32>
    %30 = arith.mulf %29, %10 : vector<16x64xf32>
    %31 = arith.addf %28, %30 : vector<16x64xf32>
    %32 = vector.extract_strided_slice %31 {offsets = [0, 0], sizes = [16, 32], strides = [1, 1]} : vector<16x64xf32> to vector<16x32xf32>
    %33 = vector.extract_strided_slice %31 {offsets = [0, 32], sizes = [16, 16], strides = [1, 1]} : vector<16x64xf32> to vector<16x16xf32>
    %34 = tpu.transpose %33, [1, 0] : vector<16x16xf32> -> vector<16x16xf32>
    %35 = vector.extract_strided_slice %31 {offsets = [0, 48], sizes = [16, 16], strides = [1, 1]} : vector<16x64xf32> to vector<16x16xf32>
    %c0_22 = arith.constant 0 : index
    %c0_23 = arith.constant 0 : index
    %36 = vector.load %arg4[%c0_22, %c0_23] : memref<32x32xf32, #tpu.memory_space<vmem>>, vector<32x32xf32>
    %cst_24 = arith.constant 0.000000e+00 : f32
    %37 = vector.broadcast %cst_24 : f32 to vector<16x32xf32>
    %38 = vector.extract_strided_slice %32 {offsets = [0, 0], sizes = [16, 8], strides = [1, 1]} : vector<16x32xf32> to vector<16x8xf32>
    %39 = vector.extract_strided_slice %34 {offsets = [0, 0], sizes = [8, 16], strides = [1, 1]} : vector<16x16xf32> to vector<8x16xf32>
    %40 = vector.extract_strided_slice %35 {offsets = [0, 0], sizes = [16, 8], strides = [1, 1]} : vector<16x16xf32> to vector<16x8xf32>
    %cst_25 = arith.constant dense<0.000000e+00> : vector<16x16xf32>
    %41 = tpu.matmul %38, %39, %cst_25 {dimension_numbers = #tpu.dot_dimension_numbers<[1], [0], [0], [1], [0, 0, 1, 1], [], []>, precision = #tpu.contract_precision<fp32>} : vector<16x8xf32>, vector<8x16xf32>, vector<16x16xf32> -> vector<16x16xf32>
    %cst_26 = arith.constant 0.353553385 : f32
    %42 = vector.broadcast %cst_26 : f32 to vector<16x16xf32>
    %43 = arith.mulf %41, %42 : vector<16x16xf32>
    %44 = arith.addf %43, %3 : vector<16x16xf32>
    %cst_27 = arith.constant dense<0xFF800000> : vector<16xf32>
    %45 = vector.multi_reduction <maximumf>, %44, %cst_27 [1] : vector<16x16xf32> to vector<16xf32>
    %46 = vector.shape_cast %45 : vector<16xf32> to vector<16x1xf32>
    %47 = vector.broadcast %46 : vector<16x1xf32> to vector<16x16xf32>
    %48 = arith.subf %44, %47 : vector<16x16xf32>
    %49 = math.exp %48 : vector<16x16xf32>
    %cst_28 = arith.constant dense<0.000000e+00> : vector<16xf32>
    %50 = vector.multi_reduction <add>, %49, %cst_28 [1] : vector<16x16xf32> to vector<16xf32>
    %51 = vector.shape_cast %50 : vector<16xf32> to vector<16x1xf32>
    %52 = tpu.reciprocal %51 {approx = true} : vector<16x1xf32> -> vector<16x1xf32>
    %53 = vector.broadcast %52 : vector<16x1xf32> to vector<16x16xf32>
    %54 = arith.mulf %49, %53 : vector<16x16xf32>
    %cst_29 = arith.constant dense<0.000000e+00> : vector<16x8xf32>
    %55 = tpu.matmul %54, %40, %cst_29 {dimension_numbers = #tpu.dot_dimension_numbers<[1], [0], [0], [1], [0, 0, 1, 1], [], []>, precision = #tpu.contract_precision<fp32>} : vector<16x16xf32>, vector<16x8xf32>, vector<16x8xf32> -> vector<16x8xf32>
    %56 = vector.extract_strided_slice %36 {offsets = [0, 0], sizes = [8, 32], strides = [1, 1]} : vector<32x32xf32> to vector<8x32xf32>
    %cst_30 = arith.constant dense<0.000000e+00> : vector<16x32xf32>
    %57 = tpu.matmul %55, %56, %cst_30 {dimension_numbers = #tpu.dot_dimension_numbers<[1], [0], [0], [1], [0, 0, 1, 1], [], []>, precision = #tpu.contract_precision<fp32>} : vector<16x8xf32>, vector<8x32xf32>, vector<16x32xf32> -> vector<16x32xf32>
    %58 = arith.addf %37, %57 : vector<16x32xf32>
    %59 = vector.extract_strided_slice %32 {offsets = [0, 8], sizes = [16, 8], strides = [1, 1]} : vector<16x32xf32> to vector<16x8xf32>
    %60 = vector.extract_strided_slice %34 {offsets = [0, 0], sizes = [8, 16], strides = [1, 1]} : vector<16x16xf32> to vector<8x16xf32>
    %61 = vector.extract_strided_slice %35 {offsets = [0, 0], sizes = [16, 8], strides = [1, 1]} : vector<16x16xf32> to vector<16x8xf32>
    %cst_31 = arith.constant dense<0.000000e+00> : vector<16x16xf32>
    %62 = tpu.matmul %59, %60, %cst_31 {dimension_numbers = #tpu.dot_dimension_numbers<[1], [0], [0], [1], [0, 0, 1, 1], [], []>, precision = #tpu.contract_precision<fp32>} : vector<16x8xf32>, vector<8x16xf32>, vector<16x16xf32> -> vector<16x16xf32>
    %cst_32 = arith.constant 0.353553385 : f32
    %63 = vector.broadcast %cst_32 : f32 to vector<16x16xf32>
    %64 = arith.mulf %62, %63 : vector<16x16xf32>
    %65 = arith.addf %64, %3 : vector<16x16xf32>
    %cst_33 = arith.constant dense<0xFF800000> : vector<16xf32>
    %66 = vector.multi_reduction <maximumf>, %65, %cst_33 [1] : vector<16x16xf32> to vector<16xf32>
    %67 = vector.shape_cast %66 : vector<16xf32> to vector<16x1xf32>
    %68 = vector.broadcast %67 : vector<16x1xf32> to vector<16x16xf32>
    %69 = arith.subf %65, %68 : vector<16x16xf32>
    %70 = math.exp %69 : vector<16x16xf32>
    %cst_34 = arith.constant dense<0.000000e+00> : vector<16xf32>
    %71 = vector.multi_reduction <add>, %70, %cst_34 [1] : vector<16x16xf32> to vector<16xf32>
    %72 = vector.shape_cast %71 : vector<16xf32> to vector<16x1xf32>
    %73 = tpu.reciprocal %72 {approx = true} : vector<16x1xf32> -> vector<16x1xf32>
    %74 = vector.broadcast %73 : vector<16x1xf32> to vector<16x16xf32>
    %75 = arith.mulf %70, %74 : vector<16x16xf32>
    %cst_35 = arith.constant dense<0.000000e+00> : vector<16x8xf32>
    %76 = tpu.matmul %75, %61, %cst_35 {dimension_numbers = #tpu.dot_dimension_numbers<[1], [0], [0], [1], [0, 0, 1, 1], [], []>, precision = #tpu.contract_precision<fp32>} : vector<16x16xf32>, vector<16x8xf32>, vector<16x8xf32> -> vector<16x8xf32>
    %77 = vector.extract_strided_slice %36 {offsets = [8, 0], sizes = [8, 32], strides = [1, 1]} : vector<32x32xf32> to vector<8x32xf32>
    %cst_36 = arith.constant dense<0.000000e+00> : vector<16x32xf32>
    %78 = tpu.matmul %76, %77, %cst_36 {dimension_numbers = #tpu.dot_dimension_numbers<[1], [0], [0], [1], [0, 0, 1, 1], [], []>, precision = #tpu.contract_precision<fp32>} : vector<16x8xf32>, vector<8x32xf32>, vector<16x32xf32> -> vector<16x32xf32>
    %79 = arith.addf %58, %78 : vector<16x32xf32>
    %80 = vector.extract_strided_slice %32 {offsets = [0, 16], sizes = [16, 8], strides = [1, 1]} : vector<16x32xf32> to vector<16x8xf32>
    %81 = vector.extract_strided_slice %34 {offsets = [8, 0], sizes = [8, 16], strides = [1, 1]} : vector<16x16xf32> to vector<8x16xf32>
    %82 = vector.extract_strided_slice %35 {offsets = [0, 8], sizes = [16, 8], strides = [1, 1]} : vector<16x16xf32> to vector<16x8xf32>
    %cst_37 = arith.constant dense<0.000000e+00> : vector<16x16xf32>
    %83 = tpu.matmul %80, %81, %cst_37 {dimension_numbers = #tpu.dot_dimension_numbers<[1], [0], [0], [1], [0, 0, 1, 1], [], []>, precision = #tpu.contract_precision<fp32>} : vector<16x8xf32>, vector<8x16xf32>, vector<16x16xf32> -> vector<16x16xf32>
    %cst_38 = arith.constant 0.353553385 : f32
    %84 = vector.broadcast %cst_38 : f32 to vector<16x16xf32>
    %85 = arith.mulf %83, %84 : vector<16x16xf32>
    %86 = arith.addf %85, %3 : vector<16x16xf32>
    %cst_39 = arith.constant dense<0xFF800000> : vector<16xf32>
    %87 = vector.multi_reduction <maximumf>, %86, %cst_39 [1] : vector<16x16xf32> to vector<16xf32>
    %88 = vector.shape_cast %87 : vector<16xf32> to vector<16x1xf32>
    %89 = vector.broadcast %88 : vector<16x1xf32> to vector<16x16xf32>
    %90 = arith.subf %86, %89 : vector<16x16xf32>
    %91 = math.exp %90 : vector<16x16xf32>
    %cst_40 = arith.constant dense<0.000000e+00> : vector<16xf32>
    %92 = vector.multi_reduction <add>, %91, %cst_40 [1] : vector<16x16xf32> to vector<16xf32>
    %93 = vector.shape_cast %92 : vector<16xf32> to vector<16x1xf32>
    %94 = tpu.reciprocal %93 {approx = true} : vector<16x1xf32> -> vector<16x1xf32>
    %95 = vector.broadcast %94 : vector<16x1xf32> to vector<16x16xf32>
    %96 = arith.mulf %91, %95 : vector<16x16xf32>
    %cst_41 = arith.constant dense<0.000000e+00> : vector<16x8xf32>
    %97 = tpu.matmul %96, %82, %cst_41 {dimension_numbers = #tpu.dot_dimension_numbers<[1], [0], [0], [1], [0, 0, 1, 1], [], []>, precision = #tpu.contract_precision<fp32>} : vector<16x16xf32>, vector<16x8xf32>, vector<16x8xf32> -> vector<16x8xf32>
    %98 = vector.extract_strided_slice %36 {offsets = [16, 0], sizes = [8, 32], strides = [1, 1]} : vector<32x32xf32> to vector<8x32xf32>
    %cst_42 = arith.constant dense<0.000000e+00> : vector<16x32xf32>
    %99 = tpu.matmul %97, %98, %cst_42 {dimension_numbers = #tpu.dot_dimension_numbers<[1], [0], [0], [1], [0, 0, 1, 1], [], []>, precision = #tpu.contract_precision<fp32>} : vector<16x8xf32>, vector<8x32xf32>, vector<16x32xf32> -> vector<16x32xf32>
    %100 = arith.addf %79, %99 : vector<16x32xf32>
    %101 = vector.extract_strided_slice %32 {offsets = [0, 24], sizes = [16, 8], strides = [1, 1]} : vector<16x32xf32> to vector<16x8xf32>
    %102 = vector.extract_strided_slice %34 {offsets = [8, 0], sizes = [8, 16], strides = [1, 1]} : vector<16x16xf32> to vector<8x16xf32>
    %103 = vector.extract_strided_slice %35 {offsets = [0, 8], sizes = [16, 8], strides = [1, 1]} : vector<16x16xf32> to vector<16x8xf32>
    %cst_43 = arith.constant dense<0.000000e+00> : vector<16x16xf32>
    %104 = tpu.matmul %101, %102, %cst_43 {dimension_numbers = #tpu.dot_dimension_numbers<[1], [0], [0], [1], [0, 0, 1, 1], [], []>, precision = #tpu.contract_precision<fp32>} : vector<16x8xf32>, vector<8x16xf32>, vector<16x16xf32> -> vector<16x16xf32>
    %cst_44 = arith.constant 0.353553385 : f32
    %105 = vector.broadcast %cst_44 : f32 to vector<16x16xf32>
    %106 = arith.mulf %104, %105 : vector<16x16xf32>
    %107 = arith.addf %106, %3 : vector<16x16xf32>
    %cst_45 = arith.constant dense<0xFF800000> : vector<16xf32>
    %108 = vector.multi_reduction <maximumf>, %107, %cst_45 [1] : vector<16x16xf32> to vector<16xf32>
    %109 = vector.shape_cast %108 : vector<16xf32> to vector<16x1xf32>
    %110 = vector.broadcast %109 : vector<16x1xf32> to vector<16x16xf32>
    %111 = arith.subf %107, %110 : vector<16x16xf32>
    %112 = math.exp %111 : vector<16x16xf32>
    %cst_46 = arith.constant dense<0.000000e+00> : vector<16xf32>
    %113 = vector.multi_reduction <add>, %112, %cst_46 [1] : vector<16x16xf32> to vector<16xf32>
    %114 = vector.shape_cast %113 : vector<16xf32> to vector<16x1xf32>
    %115 = tpu.reciprocal %114 {approx = true} : vector<16x1xf32> -> vector<16x1xf32>
    %116 = vector.broadcast %115 : vector<16x1xf32> to vector<16x16xf32>
    %117 = arith.mulf %112, %116 : vector<16x16xf32>
    %cst_47 = arith.constant dense<0.000000e+00> : vector<16x8xf32>
    %118 = tpu.matmul %117, %103, %cst_47 {dimension_numbers = #tpu.dot_dimension_numbers<[1], [0], [0], [1], [0, 0, 1, 1], [], []>, precision = #tpu.contract_precision<fp32>} : vector<16x16xf32>, vector<16x8xf32>, vector<16x8xf32> -> vector<16x8xf32>
    %119 = vector.extract_strided_slice %36 {offsets = [24, 0], sizes = [8, 32], strides = [1, 1]} : vector<32x32xf32> to vector<8x32xf32>
    %cst_48 = arith.constant dense<0.000000e+00> : vector<16x32xf32>
    %120 = tpu.matmul %118, %119, %cst_48 {dimension_numbers = #tpu.dot_dimension_numbers<[1], [0], [0], [1], [0, 0, 1, 1], [], []>, precision = #tpu.contract_precision<fp32>} : vector<16x8xf32>, vector<8x32xf32>, vector<16x32xf32> -> vector<16x32xf32>
    %121 = arith.addf %100, %120 : vector<16x32xf32>
    %122 = arith.addf %0, %121 : vector<16x32xf32>
    %123 = arith.mulf %122, %122 : vector<16x32xf32>
    %cst_49 = arith.constant dense<0.000000e+00> : vector<16xf32>
    %124 = vector.multi_reduction <add>, %123, %cst_49 [1] : vector<16x32xf32> to vector<16xf32>
    %125 = vector.shape_cast %124 : vector<16xf32> to vector<16x1xf32>
    %cst_50 = arith.constant 3.200000e+01 : f32
    %126 = vector.broadcast %cst_50 : f32 to vector<16x1xf32>
    %127 = arith.divf %125, %126 : vector<16x1xf32>
    %cst_51 = arith.constant 9.99999997E-7 : f32
    %128 = vector.broadcast %cst_51 : f32 to vector<16x1xf32>
    %129 = arith.addf %127, %128 : vector<16x1xf32>
    %130 = math.rsqrt %129 : vector<16x1xf32>
    %131 = vector.broadcast %130 : vector<16x1xf32> to vector<16x32xf32>
    %132 = arith.mulf %122, %131 : vector<16x32xf32>
    %133 = vector.broadcast %5 : vector<1x32xf32> to vector<16x32xf32>
    %134 = arith.mulf %132, %133 : vector<16x32xf32>
    %c0_52 = arith.constant 0 : index
    %c0_53 = arith.constant 0 : index
    %135 = vector.load %arg5[%c0_52, %c0_53] : memref<32x32xf32, #tpu.memory_space<vmem>>, vector<32x32xf32>
    %cst_54 = arith.constant dense<0.000000e+00> : vector<16x32xf32>
    %136 = tpu.matmul %134, %135, %cst_54 {dimension_numbers = #tpu.dot_dimension_numbers<[1], [0], [0], [1], [0, 0, 1, 1], [], []>, precision = #tpu.contract_precision<fp32>} : vector<16x32xf32>, vector<32x32xf32>, vector<16x32xf32> -> vector<16x32xf32>
    %137 = vector.broadcast %8 : vector<1x32xf32> to vector<16x32xf32>
    %138 = arith.addf %136, %137 : vector<16x32xf32>
    %139 = vector.extract_strided_slice %9 {offsets = [0, 0], sizes = [16, 32], strides = [1, 1]} : vector<16x64xf32> to vector<16x32xf32>
    %140 = arith.mulf %138, %139 : vector<16x32xf32>
    %141 = vector.extract_strided_slice %11 {offsets = [0, 0], sizes = [32, 32], strides = [1, 1]} : vector<64x64xf32> to vector<32x32xf32>
    %cst_55 = arith.constant dense<0.000000e+00> : vector<16x32xf32>
    %142 = tpu.matmul %138, %141, %cst_55 {dimension_numbers = #tpu.dot_dimension_numbers<[1], [0], [0], [1], [0, 0, 1, 1], [], []>, precision = #tpu.contract_precision<fp32>} : vector<16x32xf32>, vector<32x32xf32>, vector<16x32xf32> -> vector<16x32xf32>
    %143 = vector.extract_strided_slice %10 {offsets = [0, 0], sizes = [16, 32], strides = [1, 1]} : vector<16x64xf32> to vector<16x32xf32>
    %144 = arith.mulf %142, %143 : vector<16x32xf32>
    %145 = arith.addf %140, %144 : vector<16x32xf32>
    %c0_56 = arith.constant 0 : index
    %c0_57 = arith.constant 0 : index
    %146 = vector.load %arg6[%c0_56, %c0_57] : memref<32x32xf32, #tpu.memory_space<vmem>>, vector<32x32xf32>
    %cst_58 = arith.constant 0.000000e+00 : f32
    %147 = vector.broadcast %cst_58 : f32 to vector<16x32xf32>
    %148 = vector.extract_strided_slice %145 {offsets = [0, 0], sizes = [16, 8], strides = [1, 1]} : vector<16x32xf32> to vector<16x8xf32>
    %149 = vector.extract_strided_slice %1 {offsets = [0, 0], sizes = [8, 16], strides = [1, 1]} : vector<16x16xf32> to vector<8x16xf32>
    %150 = vector.extract_strided_slice %2 {offsets = [0, 0], sizes = [16, 8], strides = [1, 1]} : vector<16x16xf32> to vector<16x8xf32>
    %cst_59 = arith.constant dense<0.000000e+00> : vector<16x16xf32>
    %151 = tpu.matmul %148, %149, %cst_59 {dimension_numbers = #tpu.dot_dimension_numbers<[1], [0], [0], [1], [0, 0, 1, 1], [], []>, precision = #tpu.contract_precision<fp32>} : vector<16x8xf32>, vector<8x16xf32>, vector<16x16xf32> -> vector<16x16xf32>
    %cst_60 = arith.constant 0.353553385 : f32
    %152 = vector.broadcast %cst_60 : f32 to vector<16x16xf32>
    %153 = arith.mulf %151, %152 : vector<16x16xf32>
    %154 = arith.addf %153, %3 : vector<16x16xf32>
    %cst_61 = arith.constant dense<0xFF800000> : vector<16xf32>
    %155 = vector.multi_reduction <maximumf>, %154, %cst_61 [1] : vector<16x16xf32> to vector<16xf32>
    %156 = vector.shape_cast %155 : vector<16xf32> to vector<16x1xf32>
    %157 = vector.broadcast %156 : vector<16x1xf32> to vector<16x16xf32>
    %158 = arith.subf %154, %157 : vector<16x16xf32>
    %159 = math.exp %158 : vector<16x16xf32>
    %cst_62 = arith.constant dense<0.000000e+00> : vector<16xf32>
    %160 = vector.multi_reduction <add>, %159, %cst_62 [1] : vector<16x16xf32> to vector<16xf32>
    %161 = vector.shape_cast %160 : vector<16xf32> to vector<16x1xf32>
    %162 = tpu.reciprocal %161 {approx = true} : vector<16x1xf32> -> vector<16x1xf32>
    %163 = vector.broadcast %162 : vector<16x1xf32> to vector<16x16xf32>
    %164 = arith.mulf %159, %163 : vector<16x16xf32>
    %cst_63 = arith.constant dense<0.000000e+00> : vector<16x8xf32>
    %165 = tpu.matmul %164, %150, %cst_63 {dimension_numbers = #tpu.dot_dimension_numbers<[1], [0], [0], [1], [0, 0, 1, 1], [], []>, precision = #tpu.contract_precision<fp32>} : vector<16x16xf32>, vector<16x8xf32>, vector<16x8xf32> -> vector<16x8xf32>
    %166 = vector.extract_strided_slice %146 {offsets = [0, 0], sizes = [8, 32], strides = [1, 1]} : vector<32x32xf32> to vector<8x32xf32>
    %cst_64 = arith.constant dense<0.000000e+00> : vector<16x32xf32>
    %167 = tpu.matmul %165, %166, %cst_64 {dimension_numbers = #tpu.dot_dimension_numbers<[1], [0], [0], [1], [0, 0, 1, 1], [], []>, precision = #tpu.contract_precision<fp32>} : vector<16x8xf32>, vector<8x32xf32>, vector<16x32xf32> -> vector<16x32xf32>
    %168 = arith.addf %147, %167 : vector<16x32xf32>
    %169 = vector.extract_strided_slice %145 {offsets = [0, 8], sizes = [16, 8], strides = [1, 1]} : vector<16x32xf32> to vector<16x8xf32>
    %170 = vector.extract_strided_slice %1 {offsets = [0, 0], sizes = [8, 16], strides = [1, 1]} : vector<16x16xf32> to vector<8x16xf32>
    %171 = vector.extract_strided_slice %2 {offsets = [0, 0], sizes = [16, 8], strides = [1, 1]} : vector<16x16xf32> to vector<16x8xf32>
    %cst_65 = arith.constant dense<0.000000e+00> : vector<16x16xf32>
    %172 = tpu.matmul %169, %170, %cst_65 {dimension_numbers = #tpu.dot_dimension_numbers<[1], [0], [0], [1], [0, 0, 1, 1], [], []>, precision = #tpu.contract_precision<fp32>} : vector<16x8xf32>, vector<8x16xf32>, vector<16x16xf32> -> vector<16x16xf32>
    %cst_66 = arith.constant 0.353553385 : f32
    %173 = vector.broadcast %cst_66 : f32 to vector<16x16xf32>
    %174 = arith.mulf %172, %173 : vector<16x16xf32>
    %175 = arith.addf %174, %3 : vector<16x16xf32>
    %cst_67 = arith.constant dense<0xFF800000> : vector<16xf32>
    %176 = vector.multi_reduction <maximumf>, %175, %cst_67 [1] : vector<16x16xf32> to vector<16xf32>
    %177 = vector.shape_cast %176 : vector<16xf32> to vector<16x1xf32>
    %178 = vector.broadcast %177 : vector<16x1xf32> to vector<16x16xf32>
    %179 = arith.subf %175, %178 : vector<16x16xf32>
    %180 = math.exp %179 : vector<16x16xf32>
    %cst_68 = arith.constant dense<0.000000e+00> : vector<16xf32>
    %181 = vector.multi_reduction <add>, %180, %cst_68 [1] : vector<16x16xf32> to vector<16xf32>
    %182 = vector.shape_cast %181 : vector<16xf32> to vector<16x1xf32>
    %183 = tpu.reciprocal %182 {approx = true} : vector<16x1xf32> -> vector<16x1xf32>
    %184 = vector.broadcast %183 : vector<16x1xf32> to vector<16x16xf32>
    %185 = arith.mulf %180, %184 : vector<16x16xf32>
    %cst_69 = arith.constant dense<0.000000e+00> : vector<16x8xf32>
    %186 = tpu.matmul %185, %171, %cst_69 {dimension_numbers = #tpu.dot_dimension_numbers<[1], [0], [0], [1], [0, 0, 1, 1], [], []>, precision = #tpu.contract_precision<fp32>} : vector<16x16xf32>, vector<16x8xf32>, vector<16x8xf32> -> vector<16x8xf32>
    %187 = vector.extract_strided_slice %146 {offsets = [8, 0], sizes = [8, 32], strides = [1, 1]} : vector<32x32xf32> to vector<8x32xf32>
    %cst_70 = arith.constant dense<0.000000e+00> : vector<16x32xf32>
    %188 = tpu.matmul %186, %187, %cst_70 {dimension_numbers = #tpu.dot_dimension_numbers<[1], [0], [0], [1], [0, 0, 1, 1], [], []>, precision = #tpu.contract_precision<fp32>} : vector<16x8xf32>, vector<8x32xf32>, vector<16x32xf32> -> vector<16x32xf32>
    %189 = arith.addf %168, %188 : vector<16x32xf32>
    %190 = vector.extract_strided_slice %145 {offsets = [0, 16], sizes = [16, 8], strides = [1, 1]} : vector<16x32xf32> to vector<16x8xf32>
    %191 = vector.extract_strided_slice %1 {offsets = [8, 0], sizes = [8, 16], strides = [1, 1]} : vector<16x16xf32> to vector<8x16xf32>
    %192 = vector.extract_strided_slice %2 {offsets = [0, 8], sizes = [16, 8], strides = [1, 1]} : vector<16x16xf32> to vector<16x8xf32>
    %cst_71 = arith.constant dense<0.000000e+00> : vector<16x16xf32>
    %193 = tpu.matmul %190, %191, %cst_71 {dimension_numbers = #tpu.dot_dimension_numbers<[1], [0], [0], [1], [0, 0, 1, 1], [], []>, precision = #tpu.contract_precision<fp32>} : vector<16x8xf32>, vector<8x16xf32>, vector<16x16xf32> -> vector<16x16xf32>
    %cst_72 = arith.constant 0.353553385 : f32
    %194 = vector.broadcast %cst_72 : f32 to vector<16x16xf32>
    %195 = arith.mulf %193, %194 : vector<16x16xf32>
    %196 = arith.addf %195, %3 : vector<16x16xf32>
    %cst_73 = arith.constant dense<0xFF800000> : vector<16xf32>
    %197 = vector.multi_reduction <maximumf>, %196, %cst_73 [1] : vector<16x16xf32> to vector<16xf32>
    %198 = vector.shape_cast %197 : vector<16xf32> to vector<16x1xf32>
    %199 = vector.broadcast %198 : vector<16x1xf32> to vector<16x16xf32>
    %200 = arith.subf %196, %199 : vector<16x16xf32>
    %201 = math.exp %200 : vector<16x16xf32>
    %cst_74 = arith.constant dense<0.000000e+00> : vector<16xf32>
    %202 = vector.multi_reduction <add>, %201, %cst_74 [1] : vector<16x16xf32> to vector<16xf32>
    %203 = vector.shape_cast %202 : vector<16xf32> to vector<16x1xf32>
    %204 = tpu.reciprocal %203 {approx = true} : vector<16x1xf32> -> vector<16x1xf32>
    %205 = vector.broadcast %204 : vector<16x1xf32> to vector<16x16xf32>
    %206 = arith.mulf %201, %205 : vector<16x16xf32>
    %cst_75 = arith.constant dense<0.000000e+00> : vector<16x8xf32>
    %207 = tpu.matmul %206, %192, %cst_75 {dimension_numbers = #tpu.dot_dimension_numbers<[1], [0], [0], [1], [0, 0, 1, 1], [], []>, precision = #tpu.contract_precision<fp32>} : vector<16x16xf32>, vector<16x8xf32>, vector<16x8xf32> -> vector<16x8xf32>
    %208 = vector.extract_strided_slice %146 {offsets = [16, 0], sizes = [8, 32], strides = [1, 1]} : vector<32x32xf32> to vector<8x32xf32>
    %cst_76 = arith.constant dense<0.000000e+00> : vector<16x32xf32>
    %209 = tpu.matmul %207, %208, %cst_76 {dimension_numbers = #tpu.dot_dimension_numbers<[1], [0], [0], [1], [0, 0, 1, 1], [], []>, precision = #tpu.contract_precision<fp32>} : vector<16x8xf32>, vector<8x32xf32>, vector<16x32xf32> -> vector<16x32xf32>
    %210 = arith.addf %189, %209 : vector<16x32xf32>
    %211 = vector.extract_strided_slice %145 {offsets = [0, 24], sizes = [16, 8], strides = [1, 1]} : vector<16x32xf32> to vector<16x8xf32>
    %212 = vector.extract_strided_slice %1 {offsets = [8, 0], sizes = [8, 16], strides = [1, 1]} : vector<16x16xf32> to vector<8x16xf32>
    %213 = vector.extract_strided_slice %2 {offsets = [0, 8], sizes = [16, 8], strides = [1, 1]} : vector<16x16xf32> to vector<16x8xf32>
    %cst_77 = arith.constant dense<0.000000e+00> : vector<16x16xf32>
    %214 = tpu.matmul %211, %212, %cst_77 {dimension_numbers = #tpu.dot_dimension_numbers<[1], [0], [0], [1], [0, 0, 1, 1], [], []>, precision = #tpu.contract_precision<fp32>} : vector<16x8xf32>, vector<8x16xf32>, vector<16x16xf32> -> vector<16x16xf32>
    %cst_78 = arith.constant 0.353553385 : f32
    %215 = vector.broadcast %cst_78 : f32 to vector<16x16xf32>
    %216 = arith.mulf %214, %215 : vector<16x16xf32>
    %217 = arith.addf %216, %3 : vector<16x16xf32>
    %cst_79 = arith.constant dense<0xFF800000> : vector<16xf32>
    %218 = vector.multi_reduction <maximumf>, %217, %cst_79 [1] : vector<16x16xf32> to vector<16xf32>
    %219 = vector.shape_cast %218 : vector<16xf32> to vector<16x1xf32>
    %220 = vector.broadcast %219 : vector<16x1xf32> to vector<16x16xf32>
    %221 = arith.subf %217, %220 : vector<16x16xf32>
    %222 = math.exp %221 : vector<16x16xf32>
    %cst_80 = arith.constant dense<0.000000e+00> : vector<16xf32>
    %223 = vector.multi_reduction <add>, %222, %cst_80 [1] : vector<16x16xf32> to vector<16xf32>
    %224 = vector.shape_cast %223 : vector<16xf32> to vector<16x1xf32>
    %225 = tpu.reciprocal %224 {approx = true} : vector<16x1xf32> -> vector<16x1xf32>
    %226 = vector.broadcast %225 : vector<16x1xf32> to vector<16x16xf32>
    %227 = arith.mulf %222, %226 : vector<16x16xf32>
    %cst_81 = arith.constant dense<0.000000e+00> : vector<16x8xf32>
    %228 = tpu.matmul %227, %213, %cst_81 {dimension_numbers = #tpu.dot_dimension_numbers<[1], [0], [0], [1], [0, 0, 1, 1], [], []>, precision = #tpu.contract_precision<fp32>} : vector<16x16xf32>, vector<16x8xf32>, vector<16x8xf32> -> vector<16x8xf32>
    %229 = vector.extract_strided_slice %146 {offsets = [24, 0], sizes = [8, 32], strides = [1, 1]} : vector<32x32xf32> to vector<8x32xf32>
    %cst_82 = arith.constant dense<0.000000e+00> : vector<16x32xf32>
    %230 = tpu.matmul %228, %229, %cst_82 {dimension_numbers = #tpu.dot_dimension_numbers<[1], [0], [0], [1], [0, 0, 1, 1], [], []>, precision = #tpu.contract_precision<fp32>} : vector<16x8xf32>, vector<8x32xf32>, vector<16x32xf32> -> vector<16x32xf32>
    %231 = arith.addf %210, %230 : vector<16x32xf32>
    %232 = arith.addf %122, %231 : vector<16x32xf32>
    %233 = arith.mulf %232, %232 : vector<16x32xf32>
    %cst_83 = arith.constant dense<0.000000e+00> : vector<16xf32>
    %234 = vector.multi_reduction <add>, %233, %cst_83 [1] : vector<16x32xf32> to vector<16xf32>
    %235 = vector.shape_cast %234 : vector<16xf32> to vector<16x1xf32>
    %cst_84 = arith.constant 3.200000e+01 : f32
    %236 = vector.broadcast %cst_84 : f32 to vector<16x1xf32>
    %237 = arith.divf %235, %236 : vector<16x1xf32>
    %cst_85 = arith.constant 9.99999997E-7 : f32
    %238 = vector.broadcast %cst_85 : f32 to vector<16x1xf32>
    %239 = arith.addf %237, %238 : vector<16x1xf32>
    %240 = math.rsqrt %239 : vector<16x1xf32>
    %241 = vector.broadcast %240 : vector<16x1xf32> to vector<16x32xf32>
    %242 = arith.mulf %232, %241 : vector<16x32xf32>
    %243 = vector.broadcast %6 : vector<1x32xf32> to vector<16x32xf32>
    %244 = arith.mulf %242, %243 : vector<16x32xf32>
    %c0_86 = arith.constant 0 : index
    %c0_87 = arith.constant 0 : index
    %245 = vector.load %arg7[%c0_86, %c0_87] : memref<32x128xf32, #tpu.memory_space<vmem>>, vector<32x128xf32>
    %cst_88 = arith.constant dense<0.000000e+00> : vector<16x128xf32>
    %246 = tpu.matmul %244, %245, %cst_88 {dimension_numbers = #tpu.dot_dimension_numbers<[1], [0], [0], [1], [0, 0, 1, 1], [], []>, precision = #tpu.contract_precision<fp32>} : vector<16x32xf32>, vector<32x128xf32>, vector<16x128xf32> -> vector<16x128xf32>
    %247 = vector.extract_strided_slice %246 {offsets = [0, 0], sizes = [16, 64], strides = [1, 1]} : vector<16x128xf32> to vector<16x64xf32>
    %248 = vector.extract_strided_slice %246 {offsets = [0, 64], sizes = [16, 64], strides = [1, 1]} : vector<16x128xf32> to vector<16x64xf32>
    %cst_89 = arith.constant 0.000000e+00 : f32
    %249 = vector.broadcast %cst_89 : f32 to vector<16x64xf32>
    %250 = arith.subf %249, %247 : vector<16x64xf32>
    %251 = math.exp %250 : vector<16x64xf32>
    %cst_90 = arith.constant 1.000000e+00 : f32
    %252 = vector.broadcast %cst_90 : f32 to vector<16x64xf32>
    %253 = arith.addf %252, %251 : vector<16x64xf32>
    %cst_91 = arith.constant 1.000000e+00 : f32
    %254 = vector.broadcast %cst_91 : f32 to vector<16x64xf32>
    %255 = arith.divf %254, %253 : vector<16x64xf32>
    %256 = arith.mulf %247, %255 : vector<16x64xf32>
    %257 = arith.mulf %256, %248 : vector<16x64xf32>
    %c0_92 = arith.constant 0 : index
    %c0_93 = arith.constant 0 : index
    %258 = vector.load %arg8[%c0_92, %c0_93] : memref<64x32xf32, #tpu.memory_space<vmem>>, vector<64x32xf32>
    %cst_94 = arith.constant dense<0.000000e+00> : vector<16x32xf32>
    %259 = tpu.matmul %257, %258, %cst_94 {dimension_numbers = #tpu.dot_dimension_numbers<[1], [0], [0], [1], [0, 0, 1, 1], [], []>, precision = #tpu.contract_precision<fp32>} : vector<16x64xf32>, vector<64x32xf32>, vector<16x32xf32> -> vector<16x32xf32>
    %260 = arith.addf %232, %259 : vector<16x32xf32>
    %c0_95 = arith.constant 0 : index
    %c0_96 = arith.constant 0 : index
    %261 = vector.load %arg9[%c0_95, %c0_96] : memref<16x32xf32, #tpu.memory_space<vmem>>, vector<16x32xf32>
    tpu.vector_store %arg9[%c0_95, %c0_96], %260 {strides = array<i32>} : memref<16x32xf32, #tpu.memory_space<vmem>>, vector<16x32xf32>,
    return
  }
}

</mosaic_0001>

<bundles_post_ra>
// kernel: tile.10
= control target key start
LH: loop header
LB: loop body
LE: loop exit
PB: predicated region body
PF: predicated region fallthrough
CT: control target
= control target key end

     0   :  { %s154_s0 = inlined_call_operand.vmem [shape: f32[8,8], index: 0, kind: input, shape index: {}]   ;;  %s155_s1 = inlined_call_operand.vmem [shape: f32[2,8,6,8], index: 1, kind: output, shape index: {}]  }
   0x1   :  { %v4_v0 = vld [vmem:[%s154_s0] ss:$0 sm:$0xff]  ;;  %v51_v1 = vld [vmem:[%s154_s0 + $0x1] ss:$0 sm:$0xff]  ;;  %v54_v2 = vld [vmem:[%s154_s0 + $0x2] ss:$0 sm:$0xff] }
   0x2   :  { %5 = vst [vmem:[%s155_s1] sm:$0xff] %v4_v0  ;;  %50 = vst [vmem:[%s155_s1 + $0x40] sm:$0xff] %v4_v0  ;;  %v57_v3 = vld [vmem:[%s154_s0 + $0x3] ss:$0 sm:$0xff]  ;;  %v60_v4 = vld [vmem:[%s154_s0 + $0x4] ss:$0 sm:$0xff] }
   0x3   :  { %52 = vst [vmem:[%s155_s1 + $0x8] sm:$0xff] %v51_v1  ;;  %53 = vst [vmem:[%s155_s1 + $0x48] sm:$0xff] %v51_v1  ;;  %v63_v5 = vld [vmem:[%s154_s0 + $0x5] ss:$0 sm:$0xff]  ;;  %v66_v6 = vld [vmem:[%s154_s0 + $0x6] ss:$0 sm:$0xff] }
   0x4   :  { %55 = vst [vmem:[%s155_s1 + $0x10] sm:$0xff] %v54_v2  ;;  %56 = vst [vmem:[%s155_s1 + $0x50] sm:$0xff] %v54_v2  ;;  %v69_v7 = vld [vmem:[%s154_s0 + $0x7] ss:$0 sm:$0xff] }
   0x5   :  { %58 = vst [vmem:[%s155_s1 + $0x18] sm:$0xff] %v57_v3  ;;  %59 = vst [vmem:[%s155_s1 + $0x58] sm:$0xff] %v57_v3 }
   0x6   :  { %61 = vst [vmem:[%s155_s1 + $0x20] sm:$0xff] %v60_v4  ;;  %62 = vst [vmem:[%s155_s1 + $0x60] sm:$0xff] %v60_v4 }
   0x7   :  { %64 = vst [vmem:[%s155_s1 + $0x28] sm:$0xff] %v63_v5  ;;  %65 = vst [vmem:[%s155_s1 + $0x68] sm:$0xff] %v63_v5 }
   0x8   :  { %67 = vst [vmem:[%s155_s1 + $0x30] sm:$0xff] %v66_v6  ;;  %68 = vst [vmem:[%s155_s1 + $0x70] sm:$0xff] %v66_v6 }
   0x9   :  { %70 = vst [vmem:[%s155_s1 + $0x38] sm:$0xff] %v69_v7  ;;  %71 = vst [vmem:[%s155_s1 + $0x78] sm:$0xff] %v69_v7 }

// kernel: tile.11
= control target key start
LH: loop header
LB: loop body
LE: loop exit
PB: predicated region body
PF: predicated region fallthrough
CT: control target
= control target key end

     0   :  { %vm4_vm0 = vcmask 1047556   ;;  %s155_s14 = smov 32   ;;  %s156_s19 = smov 40   ;;  %vm6_vm1 = vcmask 64512   ;;  %vm25_vm2 = vcmask 392512   ;;  %vm46_vm3 = vcmask 326912   ;;  %s292_s0 = inlined_call_operand.vmem [shape: f32[2,8,6,8], index: 0, kind: input, shape index: {}]   ;;  %s293_s1 = inlined_call_operand.vmem [shape: f32[16,48], index: 1, kind: output, shape index: {}]  }
   0x1   :  { %v130_v0 = vld [vmem:[%s292_s0 + $0x4] ss:$8 sm:$0xf]   ;;  %v125_v3 = vld [vmem:[%s292_s0 + $0x5] ss:$8 sm:$0xf]  }
   0x2   :  { %v131_v1 = vld [vmem:[%s292_s0 + $0x4] ss:$8 sm:$0xf0]   ;;  %v126_v4 = vld [vmem:[%s292_s0 + $0x5] ss:$8 sm:$0xf0]  }
   0x3   :  { %v43_v2 = vsel %vm4_vm0, %v131_v1, %v130_v0  ;;  %v22_v5 = vsel %vm4_vm0, %v126_v4, %v125_v3  ;;  %v132_v6 = vld [vmem:[%s292_s0 + $0x44] ss:$8 sm:$0xf]   ;;  %v127_v9 = vld [vmem:[%s292_s0 + $0x45] ss:$8 sm:$0xf]  }
   0x4   :  { %44 = vrot.lane.b32.xlu1 %v43_v2, %s155_s14  ;;  %v133_v7 = vld [vmem:[%s292_s0 + $0x44] ss:$8 sm:$0xf0]   ;;  %23 = vrot.lane.b32.xlu0 %v22_v5, %s156_s19  ;;  %v128_v10 = vld [vmem:[%s292_s0 + $0x45] ss:$8 sm:$0xf0]  }
   0x5   :  { %v53_v8 = vsel %vm4_vm0, %v133_v7, %v132_v6  ;;  %v32_v11 = vsel %vm4_vm0, %v128_v10, %v127_v9  ;;  %v137_v12 = vld [vmem:[%s292_s0 + $0x43] ss:$8 sm:$0xf]   ;;  %v142_v18 = vld [vmem:[%s292_s0 + $0x42] ss:$8 sm:$0xf]  }
   0x6   :  { %v138_v13 = vld [vmem:[%s292_s0 + $0x43] ss:$8 sm:$0xf0]   ;;  %v143_v19 = vld [vmem:[%s292_s0 + $0x42] ss:$8 sm:$0xf0]  }
   0x7   :  { %v135_v14 = vld [vmem:[%s292_s0 + $0x3] ss:$8 sm:$0xf]   ;;  %v74_v16 = vsel %vm4_vm0, %v138_v13, %v137_v12  ;;  %v140_v20 = vld [vmem:[%s292_s0 + $0x2] ss:$8 sm:$0xf]   ;;  %v95_v24 = vsel %vm4_vm0, %v143_v19, %v142_v18 }
   0x8   :  { %54 = vrot.lane.b32.xlu1 %v53_v8, %s155_s14  ;;  %v136_v15 = vld [vmem:[%s292_s0 + $0x3] ss:$8 sm:$0xf0]   ;;  %33 = vrot.lane.b32.xlu0 %v32_v11, %s156_s19  ;;  %v141_v21 = vld [vmem:[%s292_s0 + $0x2] ss:$8 sm:$0xf0]  }
   0x9   :  { %v64_v17 = vsel %vm4_vm0, %v136_v15, %v135_v14  ;;  %s157_s11 = smov 24   ;;  %v147_v22 = vld [vmem:[%s292_s0 + $0x41] ss:$8 sm:$0xf]   ;;  %v85_v27 = vsel %vm4_vm0, %v141_v21, %v140_v20  ;;  %s158_s29 = smov 16   ;;  %vm67_vm4 = vcmask 261312  }
   0xa   :  { %v148_v23 = vld [vmem:[%s292_s0 + $0x41] ss:$8 sm:$0xf0]   ;;  %v2_v25 = vld [vmem:[%s292_s0] ss:$8 sm:$0xf]  }
   0xb   :  { %v3_v26 = vld [vmem:[%s292_s0] ss:$8 sm:$0xf0]   ;;  %v145_v31 = vld [vmem:[%s292_s0 + $0x1] ss:$8 sm:$0xf]   ;;  %v116_v34 = vsel %vm4_vm0, %v148_v23, %v147_v22 }
   0xc   :  { %75 = vrot.lane.b32.xlu1 %v74_v16, %s157_s11  ;;  %65 = vrot.lane.b32.xlu0 %v64_v17, %s157_s11  ;;  %v5_v28 = vsel %vm4_vm0, %v3_v26, %v2_v25  ;;  %v122_v29 = vld [vmem:[%s292_s0 + $0x40] ss:$8 sm:$0xf]   ;;  %v146_v32 = vld [vmem:[%s292_s0 + $0x1] ss:$8 sm:$0xf0]  }
   0xd   :  { %v123_v30 = vld [vmem:[%s292_s0 + $0x40] ss:$8 sm:$0xf0]   ;;  %7 = vst.msk [vmem:[%s293_s1] sm:$0xff] %vm6_vm1, %v5_v28   ;;  %v106_v35 = vsel %vm4_vm0, %v146_v32, %v145_v31  ;;  %s159_s3 = smov 8   ;;  %vm88_vm5 = vcmask 195712  }
   0xe   :  { %v13_v33 = vsel %vm4_vm0, %v123_v30, %v122_v29  ;;  %vm109_vm6 = vcmask 130112  }
   0xf   :  { %124 = vst.msk [vmem:[%s293_s1 + $0x8] sm:$0xff] %vm6_vm1, %v13_v33  }
  0x10   :  { %96 = vrot.lane.b32.xlu1 %v95_v24, %s158_s29  ;;  %86 = vrot.lane.b32.xlu0 %v85_v27, %s158_s29 }
  0x14   :  { %117 = vrot.lane.b32.xlu1 %v116_v34, %s159_s3  ;;  %107 = vrot.lane.b32.xlu0 %v106_v35, %s159_s3 }
  0x76   :  { %v45_v36 = vpop.permute.xlu1 %44   ;;  %v24_v37 = vpop.permute.xlu0 %23  }
  0x77   :  { %26 = vst.msk [vmem:[%s293_s1] sm:$0xff] %vm25_vm2, %v24_v37  }
  0x78   :  { %47 = vst.msk [vmem:[%s293_s1] sm:$0xff] %vm46_vm3, %v45_v36  }
  0x7a   :  { %v55_v38 = vpop.permute.xlu1 %54   ;;  %v34_v39 = vpop.permute.xlu0 %33  }
  0x7b   :  { %129 = vst.msk [vmem:[%s293_s1 + $0x8] sm:$0xff] %vm25_vm2, %v34_v39  }
  0x7c   :  { %134 = vst.msk [vmem:[%s293_s1 + $0x8] sm:$0xff] %vm46_vm3, %v55_v38  }
  0x7e   :  { %v76_v40 = vpop.permute.xlu1 %75   ;;  %v66_v41 = vpop.permute.xlu0 %65  }
  0x7f   :  { %139 = vst.msk [vmem:[%s293_s1 + $0x8] sm:$0xff] %vm67_vm4, %v76_v40   ;;  %68 = vst.msk [vmem:[%s293_s1] sm:$0xff] %vm67_vm4, %v66_v41  }
  0x82   :  { %v97_v42 = vpop.permute.xlu1 %96   ;;  %v87_v43 = vpop.permute.xlu0 %86  }
  0x83   :  { %144 = vst.msk [vmem:[%s293_s1 + $0x8] sm:$0xff] %vm88_vm5, %v97_v42   ;;  %89 = vst.msk [vmem:[%s293_s1] sm:$0xff] %vm88_vm5, %v87_v43  }
  0x86   :  { %v118_v44 = vpop.permute.xlu1 %117   ;;  %v108_v45 = vpop.permute.xlu0 %107  }
  0x87   :  { %149 = vst.msk [vmem:[%s293_s1 + $0x8] sm:$0xff] %vm109_vm6, %v118_v44   ;;  %110 = vst.msk [vmem:[%s293_s1] sm:$0xff] %vm109_vm6, %v108_v45  }

// kernel: glide_decoder_layer.1
= control target key start
LH: loop header
LB: loop body
LE: loop exit
PB: predicated region body
PF: predicated region fallthrough
CT: control target
= control target key end

     0   :  { %vm60_vm0 = vcmask 261120   ;;  %s19777_s0 = inlined_call_operand.vmem [shape: f32[16,32], index: 0, kind: input, shape index: {}]   ;;  %s19778_s1 = inlined_call_operand.vmem [shape: f32[48,16], index: 1, kind: input, shape index: {}]   ;;  %s19779_s2 = inlined_call_operand.vmem [shape: f32[136,64], index: 2, kind: input, shape index: {}]   ;;  %s19780_s3 = inlined_call_operand.vmem [shape: f32[32,64], index: 3, kind: input, shape index: {}]   ;;  %s19781_s4 = inlined_call_operand.vmem [shape: f32[32,32], index: 4, kind: input, shape index: {}]   ;;  %s19782_s5 = inlined_call_operand.vmem [shape: f32[32,32], index: 5, kind: input, shape index: {}]   ;;  %s19783_s6 = inlined_call_operand.vmem [shape: f32[32,32], index: 6, kind: input, shape index: {}]   ;;  %s19784_s7 = inlined_call_operand.vmem [shape: f32[32,128], index: 7, kind: input, shape index: {}]   ;;  %s19785_s8 = inlined_call_operand.vmem [shape: f32[64,32], index: 8, kind: input, shape index: {}]   ;;  %s19786_s9 = inlined_call_operand.hbm [shape: f32[16,32], index: 9, kind: output, shape index: {}]  }
   0x1   :  { %v33_v0 = vld [vmem:[%s19777_s0] sm:$0xff]  ;;  %v18055_v1 = vld [vmem:[%s19777_s0 + $0x8] sm:$0xff] }
   0x2   :  { %14 = vsyncpa [#allocation3], 0  ;;  %v58_v2 = vmul.f32 %v33_v0, %v33_v0  ;;  %v59_v3 = vmul.f32 %v18055_v1, %v18055_v1  ;;  %v85_v6 = vld [vmem:[%s19780_s3 + $0x18] sm:$0xff]  ;;  %v84_v7 = vld [vmem:[%s19780_s3 + $0x10] sm:$0xff]  ;;  %vm626_vm1 = vcmask 523264   ;;  %vm1261_vm2 = vcmask 64512  }
   0x3   :  { %v83_v8 = vld [vmem:[%s19780_s3 + $0x8] sm:$0xff]  ;;  %v18070_v9 = vand.u32 4294901760, %v85_v6  ;;  %v18072_v10 = vand.u32 4294901760, %v84_v7  ;;  %v82_v21 = vld [vmem:[%s19780_s3] sm:$0xff]  ;;  %v56_v57 = vld [vmem:[%s19779_s2 + $0x78] sm:$0xff]  ;;  %s17989_s26 = smov 96  }
   0x4   :  { %v61_v4 = vsel %vm60_vm0, %v58_v2, 0.0  ;;  %v64_v5 = vsel %vm60_vm0, %v59_v3, 0.0  ;;  %v18074_v11 = vand.u32 4294901760, %v83_v8  ;;  %v18108_v22 = vand.u32 4294901760, %v82_v21  ;;  %v15803_v37 = vld [vmem:[%s19779_s2] ss:$0 sm:$0xff] }
   0x5   :  { %62 = vadd.xlane.f32.xlu0 %v61_v4  ;;  %v18077_v12 = vsub.f32 %v85_v6, %v18070_v9  ;;  %v18080_v13 = vsub.f32 %v84_v7, %v18072_v10  ;;  %16552 = vmatprep.subr.mxu0 %v18070_v9  ;;  %v57_v55 = vld [vmem:[%s19779_s2 + $0x80] sm:$0xff]  ;;  %v18170_v59 = vand.u32 4294901760, %v56_v57  ;;  %v55_v60 = vld [vmem:[%s19779_s2 + $0x70] sm:$0xff]  ;;  %s17990_s27 = smov 80   ;;  %vm1759_vm3 = vcmask 130048   ;;  %s17991_s11 = smov 120  }
   0x6   :  { %v18083_v14 = vsub.f32 %v83_v8, %v18074_v11  ;;  %16553 = vmatpush3.msra.mxu0 %v18070_v9  ;;  %v18112_v25 = vsub.f32 %v82_v21, %v18108_v22  ;;  %v18162_v56 = vand.u32 4294901760, %v57_v55  ;;  %v18183_v63 = vand.u32 4294901760, %v55_v60  ;;  %s17992_s12 = smov 112   ;;  %s17993_s17 = smov 72  }
   0x7   :  { %v18088_v15 = vand.u32 4294901760, %v18077_v12  ;;  %v18091_v16 = vand.u32 4294901760, %v18080_v13  ;;  %16554 = vmatprep.subr.mxu0 %v18072_v10  ;;  %v18181_v62 = vsub.f32 %v56_v57, %v18170_v59  ;;  %s17994_s18 = smov 104   ;;  %s17996_s24 = smov [#allocation2]  }
   0x8   :  { %v18094_v17 = vand.u32 4294901760, %v18083_v14  ;;  %16555 = vmatpush3.msra.mxu0 %v18072_v10  ;;  %v18117_v27 = vand.u32 4294901760, %v18112_v25  ;;  %v18168_v58 = vsub.f32 %v57_v55, %v18162_v56  ;;  %v18196_v3 = vsub.f32 %v55_v60, %v18183_v63 }
   0x9   :  { %65 = vadd.xlane.f32.xlu0 %v64_v5  ;;  %v213_v18 = vsub.f32 %v18077_v12, %v18088_v15  ;;  %v220_v19 = vsub.f32 %v18080_v13, %v18091_v16  ;;  %16556 = vmatprep.subr.mxu0 %v18074_v11  ;;  %v18193_v2 = vand.u32 4294901760, %v18181_v62  ;;  %v53_v5 = vld [vmem:[%s19779_s2 + $0x60] sm:$0xff] }
   0xa   :  { %v227_v20 = vsub.f32 %v18083_v14, %v18094_v17  ;;  %16557 = vmatpush3.msra.mxu0 %v18074_v11  ;;  %v234_v28 = vsub.f32 %v18112_v25, %v18117_v27  ;;  %v18178_v61 = vand.u32 4294901760, %v18168_v58  ;;  %v18208_v8 = vand.u32 4294901760, %v18196_v3 }
   0xb   :  { %v214_v23 = vand.u32 4294901760, %v213_v18  ;;  %v221_v24 = vand.u32 4294901760, %v220_v19  ;;  %16558 = vmatprep.subr.mxu0 %v18108_v22  ;;  %v753_v7 = vsub.f32 %v18181_v62, %v18193_v2 }
   0xc   :  { %v228_v26 = vand.u32 4294901760, %v227_v20  ;;  %16559 = vmatpush3.msra.mxu0 %v18108_v22  ;;  %v235_v29 = vand.u32 4294901760, %v234_v28 }
   0xd   :  { %16563 = vmatprep.subr.mxu1 %v214_v23  ;;  %16574 = vmatprep.subr.mxu0 %v18077_v12 }
   0xe   :  { %16564 = vmatpush3.msra.mxu1 %v214_v23  ;;  %v50_v23 = vld [vmem:[%s19779_s2 + $0x48] sm:$0xff] }
   0xf   :  { %16565 = vmatprep.subr.mxu1 %v221_v24 }
  0x10   :  { %16566 = vmatpush3.msra.mxu1 %v221_v24 }
  0x11   :  { %16567 = vmatprep.subr.mxu1 %v228_v26 }
  0x12   :  { %16568 = vmatpush3.msra.mxu1 %v228_v26 }
  0x13   :  { %16569 = vmatprep.subr.mxu1 %v235_v29 }
  0x14   :  { %16570 = vmatpush3.msra.mxu1 %v235_v29 }
  0x15   :  { %16585 = vmatprep.subr.mxu1 %v18070_v9 }
  0x8e   :  { %v63_v30 = vpop.xlane.xlu0 %62 }
  0x8f   :  { %v68_v31 = vmul.f32 0.03125, %v63_v30 }
  0x91   :  { %v70_v32 = vadd.f32 1e-06, %v68_v31 }
  0x92   :  { %v66_v33 = vpop.xlane.xlu0 %65 }
  0x93   :  { %17871 = vrsqrt.f32 %v70_v32  ;;  %v69_v34 = vmul.f32 0.03125, %v66_v33 }
  0x95   :  { %v71_v35 = vadd.f32 1e-06, %v69_v34 }
  0x97   :  { %17873 = vrsqrt.f32 %v71_v35 }
  0xa0   :  { %v17872_v36 = vpop.eup %17871 }
  0xa1   :  { %v74_v38 = vmul.f32 %v17872_v36, %v33_v0  ;;  %v54_v0 = vld [vmem:[%s19779_s2 + $0x68] sm:$0xff] }
  0xa2   :  { %v18198_v4 = vand.u32 4294901760, %v54_v0 }
  0xa3   :  { %v80_v39 = vmul.f32 %v15803_v37, %v74_v38 }
  0xa4   :  { %v17874_v40 = vpop.eup %17873 }
  0xa5   :  { %v91_v41 = vsel %vm60_vm0, %v80_v39, 0  ;;  %v75_v42 = vmul.f32 %v17874_v40, %v18055_v1  ;;  %v746_v1 = vsub.f32 %v18168_v58, %v18178_v61  ;;  %v15804_v40 = vld [vmem:[%s19779_s2 + $0x18] ss:$0 sm:$0xff] }
  0xa6   :  { %v165_v43 = vand.u32 4294901760, %v91_v41 }
  0xa7   :  { %v81_v44 = vmul.f32 %v15803_v37, %v75_v42  ;;  %v747_v6 = vand.u32 4294901760, %v746_v1 }
  0xa8   :  { %16571 = vmatprep.mubr.f32.mxu1 %v165_v43  ;;  %v166_v45 = vsub.f32 %v91_v41, %v165_v43 }
  0xa9   :  { %v94_v46 = vsel %vm60_vm0, %v81_v44, 0 }
  0xaa   :  { %v175_v47 = vand.u32 4294901760, %v94_v46  ;;  %v167_v48 = vand.u32 4294901760, %v166_v45 }
  0xac   :  { %v176_v49 = vsub.f32 %v94_v46, %v175_v47  ;;  %16572 = vmatmul.mubr.f32.vlgmr.msra.gmra.mxu1 %v175_v47  ;;  %v168_v50 = vsub.f32 %v166_v45, %v167_v48 }
  0xad   :  { %16586 = vmatpush3.msra.mxu1 %v18070_v9  ;;  %16593 = vmatprep.mubr.f32.mxu1 %v167_v48 }
  0xae   :  { %16587 = vmatprep.subr.mxu1 %v18072_v10  ;;  %v169_v51 = vand.u32 4294901760, %v168_v50  ;;  %v177_v52 = vand.u32 4294901760, %v176_v49 }
  0xaf   :  { %16588 = vmatpush3.msra.mxu1 %v18072_v10 }
  0xb0   :  { %16589 = vmatprep.subr.mxu1 %v18074_v11  ;;  %16560 = vmatprep.mubr.f32.mxu0 %v169_v51  ;;  %v178_v53 = vsub.f32 %v176_v49, %v177_v52 }
  0xb1   :  { %16590 = vmatpush3.msra.mxu1 %v18074_v11 }
  0xb2   :  { %16591 = vmatprep.subr.mxu1 %v18108_v22  ;;  %v179_v54 = vand.u32 4294901760, %v178_v53 }
  0xb3   :  { %16592 = vmatpush3.msra.mxu1 %v18108_v22 }
  0xb4   :  { %16594 = vmatmul.mubr.f32.vlgmr.msra.gmra.mxu1 %v177_v52  ;;  %16607 = vmatprep.subr.mxu1 %v18070_v9 }
  0xb5   :  { %16561 = vmatmul.mubr.f32.vlgmr.msra.gmra.mxu0 %v179_v54  ;;  %16608 = vmatpush3.msra.mxu1 %v18070_v9  ;;  %v18211_v9 = vsub.f32 %v54_v0, %v18198_v4 }
  0xb6   :  { %16575 = vmatpush3.msra.mxu0 %v18077_v12  ;;  %16615 = vmatprep.mubr.f32.mxu1 %v165_v43  ;;  %v754_v12 = vand.u32 4294901760, %v753_v7 }
  0xb7   :  { %16576 = vmatprep.subr.mxu0 %v18080_v13  ;;  %16582 = vmatprep.mubr.f32.mxu0 %v166_v45 }
  0xb8   :  { %16609 = vmatprep.subr.mxu1 %v18072_v10  ;;  %16577 = vmatpush3.msra.mxu0 %v18080_v13  ;;  %v760_v13 = vsub.f32 %v18196_v3, %v18208_v8 }
  0xb9   :  { %16610 = vmatpush3.msra.mxu1 %v18072_v10  ;;  %16578 = vmatprep.subr.mxu0 %v18083_v14  ;;  %v18214_v10 = vand.u32 4294901760, %v53_v5 }
  0xba   :  { %16611 = vmatprep.subr.mxu1 %v18074_v11  ;;  %16579 = vmatpush3.msra.mxu0 %v18083_v14  ;;  %v18223_v14 = vand.u32 4294901760, %v18211_v9  ;;  %v761_v18 = vand.u32 4294901760, %v760_v13 }
  0xbb   :  { %16612 = vmatpush3.msra.mxu1 %v18074_v11  ;;  %16580 = vmatprep.subr.mxu0 %v18112_v25  ;;  %v52_v11 = vld [vmem:[%s19779_s2 + $0x58] sm:$0xff] }
  0xbc   :  { %16613 = vmatprep.subr.mxu1 %v18108_v22  ;;  %16581 = vmatpush3.msra.mxu0 %v18112_v25  ;;  %v767_v19 = vsub.f32 %v18211_v9, %v18223_v14 }
  0xbd   :  { %16614 = vmatpush3.msra.mxu1 %v18108_v22  ;;  %16583 = vmatmul.mubr.f32.vlgmr.msra.gmra.mxu0 %v176_v49 }
  0xbe   :  { %16596 = vmatprep.subr.mxu0 %v18088_v15  ;;  %16616 = vmatmul.mubr.f32.vlgmr.msra.gmra.mxu1 %v175_v47  ;;  %v768_v24 = vand.u32 4294901760, %v767_v19 }
  0xbf   :  { %16597 = vmatpush3.msra.mxu0 %v18088_v15  ;;  %16604 = vmatprep.mubr.f32.mxu0 %v165_v43  ;;  %v18225_v15 = vand.u32 4294901760, %v52_v11 }
  0xc0   :  { %16598 = vmatprep.subr.mxu0 %v18091_v16  ;;  %16637 = vmatprep.subr.mxu1 %v747_v6 }
  0xc1   :  { %16599 = vmatpush3.msra.mxu0 %v18091_v16  ;;  %16638 = vmatpush3.msra.mxu1 %v747_v6  ;;  %v18228_v16 = vsub.f32 %v53_v5, %v18214_v10  ;;  %v18237_v20 = vsub.f32 %v52_v11, %v18225_v15 }
  0xc2   :  { %16600 = vmatprep.subr.mxu0 %v18094_v17  ;;  %16639 = vmatprep.subr.mxu1 %v754_v12 }
  0xc3   :  { %16601 = vmatpush3.msra.mxu0 %v18094_v17  ;;  %v51_v17 = vld [vmem:[%s19779_s2 + $0x50] sm:$0xff]  ;;  %16640 = vmatpush3.msra.mxu1 %v754_v12  ;;  %v18243_v22 = vand.u32 4294901760, %v18228_v16  ;;  %v18250_v25 = vand.u32 4294901760, %v18237_v20 }
  0xc4   :  { %16602 = vmatprep.subr.mxu0 %v18117_v27  ;;  %v18239_v21 = vand.u32 4294901760, %v51_v17  ;;  %16641 = vmatprep.subr.mxu1 %v761_v18 }
  0xc5   :  { %16603 = vmatpush3.msra.mxu0 %v18117_v27  ;;  %19795 = vst [vmem:[#allocation5_spill] sm:$0xff] %v18243_v22  ;;  %19796 = vst [vmem:[#allocation6_spill] sm:$0xff] %v18250_v25  ;;  %v18255_v27 = vand.u32 4294901760, %v50_v23  ;;  %16642 = vmatpush3.msra.mxu1 %v761_v18  ;;  %v774_v28 = vsub.f32 %v18228_v16, %v18243_v22  ;;  %v781_v29 = vsub.f32 %v18237_v20, %v18250_v25 }
  0xc6   :  { %16605 = vmatmul.mubr.f32.vlgmr.msra.gmra.mxu0 %v175_v47  ;;  %16618 = vmatprep.subr.mxu0 %v18162_v56  ;;  %v18253_v26 = vsub.f32 %v51_v17, %v18239_v21 }
  0xc7   :  { %16619 = vmatpush3.msra.mxu0 %v18162_v56  ;;  %16643 = vmatprep.subr.mxu1 %v768_v24  ;;  %v18267_v31 = vsub.f32 %v50_v23, %v18255_v27  ;;  %v18270_v32 = vand.u32 4294901760, %v774_v28  ;;  %v18273_v33 = vand.u32 4294901760, %v781_v29 }
  0xc8   :  { %16620 = vmatprep.subr.mxu0 %v18170_v59  ;;  %v18264_v30 = vand.u32 4294901760, %v18253_v26  ;;  %16644 = vmatpush3.msra.mxu1 %v768_v24 }
  0xc9   :  { %16621 = vmatpush3.msra.mxu0 %v18170_v59  ;;  %v18278_v35 = vand.u32 4294901760, %v18267_v31  ;;  %16645 = vmatprep.subr.mxu1 %v18270_v32 }
  0xca   :  { %16622 = vmatprep.subr.mxu0 %v18183_v63  ;;  %19797 = vst [vmem:[#allocation7_spill] sm:$0xff] %v18264_v30  ;;  %v788_v34 = vsub.f32 %v18253_v26, %v18264_v30  ;;  %16646 = vmatpush3.msra.mxu1 %v18270_v32 }
  0xcb   :  { %16623 = vmatpush3.msra.mxu0 %v18183_v63  ;;  %19798 = vst [vmem:[#allocation8_spill] sm:$0xff] %v18278_v35  ;;  %v795_v37 = vsub.f32 %v18267_v31, %v18278_v35  ;;  %16647 = vmatprep.subr.mxu1 %v18273_v33 }
  0xcc   :  { %16624 = vmatprep.subr.mxu0 %v18198_v4  ;;  %v18284_v36 = vand.u32 4294901760, %v788_v34  ;;  %16648 = vmatpush3.msra.mxu1 %v18273_v33 }
  0xcd   :  { %16625 = vmatpush3.msra.mxu0 %v18198_v4  ;;  %v18290_v38 = vand.u32 4294901760, %v795_v37 }
  0xce   :  { %16626 = vmatprep.subr.mxu0 %v18214_v10  ;;  %16649 = vmatprep.subr.mxu1 %v18284_v36 }
  0xcf   :  { %16627 = vmatpush3.msra.mxu0 %v18214_v10  ;;  %16650 = vmatpush3.msra.mxu1 %v18284_v36 }
  0xd0   :  { %16628 = vmatprep.subr.mxu0 %v18225_v15  ;;  %16651 = vmatprep.subr.mxu1 %v18290_v38 }
  0xd1   :  { %16629 = vmatpush3.msra.mxu0 %v18225_v15  ;;  %16652 = vmatpush3.msra.mxu1 %v18290_v38 }
  0xd2   :  { %16630 = vmatprep.subr.mxu0 %v18239_v21  ;;  %16675 = vmatprep.subr.mxu1 %v18162_v56 }
  0xd3   :  { %16631 = vmatpush3.msra.mxu0 %v18239_v21 }
  0xd4   :  { %16632 = vmatprep.subr.mxu0 %v18255_v27 }
  0xd5   :  { %16633 = vmatpush3.msra.mxu0 %v18255_v27 }
  0xd6   :  { %16656 = vmatprep.subr.mxu0 %v18168_v58 }
 0x16c   :  { %v16573_v41 = vpop.f32.mrf.mxu1 }
 0x16e   :  { %v272_v46 = vpop.f32.mrf.mxu1 }
 0x174   :  { %v16595_v48 = vpop.f32.mrf.mxu1 }
 0x175   :  { %v16562_v39 = vpop.f32.mrf.mxu0 }
 0x176   :  { %v182_v43 = vadd.f32 %v16562_v39, %v15804_v40  ;;  %v442_v53 = vpop.f32.mrf.mxu1 }
 0x177   :  { %v171_v42 = vpop.f32.mrf.mxu0 }
 0x178   :  { %v172_v44 = vadd.f32 %v15804_v40, %v171_v42  ;;  %v279_v47 = vadd.f32 %v16573_v41, %v182_v43 }
 0x17a   :  { %v273_v51 = vadd.f32 %v272_v46, %v172_v44 }
 0x17d   :  { %v16584_v45 = vpop.f32.mrf.mxu0 }
 0x17e   :  { %v366_v50 = vadd.f32 %v16584_v45, %v279_v47  ;;  %v16617_v55 = vpop.f32.mrf.mxu1  ;;  %v46_v47 = vld [vmem:[%s19779_s2 + $0x28] sm:$0xff] }
 0x17f   :  { %v358_v49 = vpop.f32.mrf.mxu0 }
 0x180   :  { %v359_v52 = vadd.f32 %v358_v49, %v273_v51  ;;  %v451_v54 = vadd.f32 %v16595_v48, %v366_v50  ;;  %v614_v7 = vpop.f32.mrf.mxu1  ;;  %v48_v49 = vld [vmem:[%s19779_s2 + $0x38] sm:$0xff] }
 0x182   :  { %v443_v0 = vadd.f32 %v442_v53, %v359_v52  ;;  %v49_v52 = vld [vmem:[%s19779_s2 + $0x40] sm:$0xff] }
 0x186   :  { %v16606_v57 = vpop.f32.mrf.mxu0 }
 0x187   :  { %v540_v60 = vadd.f32 %v16606_v57, %v451_v54 }
 0x188   :  { %v533_v1 = vpop.f32.mrf.mxu0 }
 0x189   :  { %v18300_v5 = vadd.f32 %v16617_v55, %v540_v60  ;;  %v534_v6 = vadd.f32 %v533_v1, %v443_v0  ;;  %v47_v55 = vld [vmem:[%s19779_s2 + $0x30] sm:$0xff] }
 0x18b   :  { %v631_v11 = vsel %vm626_vm1, %v18300_v5, 0  ;;  %v18304_v12 = vadd.f32 %v614_v7, %v534_v6  ;;  %v625_v0 = vmul.f32 %v18300_v5, %v47_v55 }
 0x18c   :  { %v18306_v13 = vand.u32 4294901760, %v631_v11 }
 0x18d   :  { %v628_v17 = vsel %vm626_vm1, %v18304_v12, 0  ;;  %v624_v53 = vmul.f32 %v18304_v12, %v46_v47 }
 0x18e   :  { %v717_v18 = vsub.f32 %v631_v11, %v18306_v13  ;;  %v706_v19 = vand.u32 4294901760, %v628_v17 }
 0x190   :  { %v707_v23 = vsub.f32 %v628_v17, %v706_v19  ;;  %16653 = vmatprep.mubr.f32.mxu1 %v706_v19  ;;  %v718_v24 = vand.u32 4294901760, %v717_v18 }
 0x191   :  { %16654 = vmatmul.mubr.f32.vlgmr.msra.gmra.mxu1 %v18306_v13 }
 0x192   :  { %16676 = vmatpush3.msra.mxu1 %v18162_v56  ;;  %v708_v28 = vand.u32 4294901760, %v707_v23  ;;  %v719_v29 = vsub.f32 %v717_v18, %v718_v24 }
 0x193   :  { %16677 = vmatprep.subr.mxu1 %v18170_v59 }
 0x194   :  { %16678 = vmatpush3.msra.mxu1 %v18170_v59  ;;  %16691 = vmatprep.mubr.f32.mxu1 %v708_v28  ;;  %v709_v34 = vsub.f32 %v707_v23, %v708_v28  ;;  %v720_v39 = vand.u32 4294901760, %v719_v29 }
 0x195   :  { %16679 = vmatprep.subr.mxu1 %v18183_v63 }
 0x196   :  { %16680 = vmatpush3.msra.mxu1 %v18183_v63  ;;  %v710_v37 = vand.u32 4294901760, %v709_v34 }
 0x197   :  { %16681 = vmatprep.subr.mxu1 %v18198_v4 }
 0x198   :  { %16682 = vmatpush3.msra.mxu1 %v18198_v4  ;;  %16634 = vmatprep.mubr.f32.mxu0 %v710_v37 }
 0x199   :  { %16683 = vmatprep.subr.mxu1 %v18214_v10  ;;  %16635 = vmatmul.mubr.f32.vlgmr.msra.gmra.mxu0 %v720_v39 }
 0x19a   :  { %16657 = vmatpush3.msra.mxu0 %v18168_v58  ;;  %16684 = vmatpush3.msra.mxu1 %v18214_v10 }
 0x19b   :  { %16658 = vmatprep.subr.mxu0 %v18181_v62  ;;  %16672 = vmatprep.mubr.f32.mxu0 %v707_v23 }
 0x19c   :  { %16685 = vmatprep.subr.mxu1 %v18225_v15  ;;  %16659 = vmatpush3.msra.mxu0 %v18181_v62 }
 0x19d   :  { %16686 = vmatpush3.msra.mxu1 %v18225_v15  ;;  %16660 = vmatprep.subr.mxu0 %v18196_v3 }
 0x19e   :  { %16687 = vmatprep.subr.mxu1 %v18239_v21  ;;  %16661 = vmatpush3.msra.mxu0 %v18196_v3 }
 0x19f   :  { %16688 = vmatpush3.msra.mxu1 %v18239_v21  ;;  %16662 = vmatprep.subr.mxu0 %v18211_v9 }
 0x1a0   :  { %16689 = vmatprep.subr.mxu1 %v18255_v27  ;;  %16663 = vmatpush3.msra.mxu0 %v18211_v9 }
 0x1a1   :  { %16690 = vmatpush3.msra.mxu1 %v18255_v27  ;;  %16664 = vmatprep.subr.mxu0 %v18228_v16 }
 0x1a2   :  { %16692 = vmatmul.mubr.f32.vlgmr.msra.gmra.mxu1 %v718_v24  ;;  %16713 = vmatprep.subr.mxu1 %v18162_v56 }
 0x1a3   :  { %16665 = vmatpush3.msra.mxu0 %v18228_v16  ;;  %16714 = vmatpush3.msra.mxu1 %v18162_v56 }
 0x1a4   :  { %16729 = vmatprep.mubr.f32.mxu1 %v706_v19  ;;  %16666 = vmatprep.subr.mxu0 %v18237_v20 }
 0x1a5   :  { %16715 = vmatprep.subr.mxu1 %v18170_v59  ;;  %16667 = vmatpush3.msra.mxu0 %v18237_v20 }
 0x1a6   :  { %16716 = vmatpush3.msra.mxu1 %v18170_v59  ;;  %16668 = vmatprep.subr.mxu0 %v18253_v26 }
 0x1a7   :  { %16717 = vmatprep.subr.mxu1 %v18183_v63  ;;  %16669 = vmatpush3.msra.mxu0 %v18253_v26 }
 0x1a8   :  { %16718 = vmatpush3.msra.mxu1 %v18183_v63  ;;  %16670 = vmatprep.subr.mxu0 %v18267_v31 }
 0x1a9   :  { %16719 = vmatprep.subr.mxu1 %v18198_v4  ;;  %16671 = vmatpush3.msra.mxu0 %v18267_v31 }
 0x1aa   :  { %16720 = vmatpush3.msra.mxu1 %v18198_v4  ;;  %16673 = vmatmul.mubr.f32.vlgmr.msra.gmra.mxu0 %v717_v18 }
 0x1ab   :  { %16694 = vmatprep.subr.mxu0 %v18178_v61  ;;  %16721 = vmatprep.subr.mxu1 %v18214_v10 }
 0x1ac   :  { %16695 = vmatpush3.msra.mxu0 %v18178_v61  ;;  %16710 = vmatprep.mubr.f32.mxu0 %v706_v19 }
 0x1ad   :  { %16722 = vmatpush3.msra.mxu1 %v18214_v10  ;;  %16696 = vmatprep.subr.mxu0 %v18193_v2 }
 0x1ae   :  { %16723 = vmatprep.subr.mxu1 %v18225_v15  ;;  %16697 = vmatpush3.msra.mxu0 %v18193_v2 }
 0x1af   :  { %16724 = vmatpush3.msra.mxu1 %v18225_v15  ;;  %16698 = vmatprep.subr.mxu0 %v18208_v8 }
 0x1b0   :  { %16725 = vmatprep.subr.mxu1 %v18239_v21  ;;  %16699 = vmatpush3.msra.mxu0 %v18208_v8 }
 0x1b1   :  { %16726 = vmatpush3.msra.mxu1 %v18239_v21  ;;  %16700 = vmatprep.subr.mxu0 %v18223_v14 }
 0x1b2   :  { %16727 = vmatprep.subr.mxu1 %v18255_v27  ;;  %16701 = vmatpush3.msra.mxu0 %v18223_v14 }
 0x1b3   :  { %16728 = vmatpush3.msra.mxu1 %v18255_v27  ;;  %16702 = vmatprep.subr.mxu0 %v18243_v22 }
 0x1b4   :  { %16730 = vmatmul.mubr.f32.vlgmr.msra.gmra.mxu1 %v18306_v13  ;;  %16703 = vmatpush3.msra.mxu0 %v18243_v22 }
 0x1b5   :  { %16704 = vmatprep.subr.mxu0 %v18250_v25 }
 0x1b6   :  { %16705 = vmatpush3.msra.mxu0 %v18250_v25 }
 0x1b7   :  { %16706 = vmatprep.subr.mxu0 %v18264_v30 }
 0x1b8   :  { %16707 = vmatpush3.msra.mxu0 %v18264_v30 }
 0x1b9   :  { %16708 = vmatprep.subr.mxu0 %v18278_v35 }
 0x1ba   :  { %16709 = vmatpush3.msra.mxu0 %v18278_v35 }
 0x1bb   :  { %16711 = vmatmul.mubr.f32.vlgmr.msra.gmra.mxu0 %v18306_v13 }
 0x251   :  { %v16655_v58 = vpop.f32.mrf.mxu1 }
 0x253   :  { %v833_v62 = vpop.f32.mrf.mxu1 }
 0x259   :  { %v16636_v56 = vpop.f32.mrf.mxu0 }
 0x25a   :  { %v840_v63 = vadd.f32 %v16655_v58, %v16636_v56 }
 0x25b   :  { %v712_v59 = vpop.f32.mrf.mxu0 }
 0x25c   :  { %v834_v4 = vadd.f32 %v833_v62, %v712_v59 }
 0x262   :  { %v16693_v2 = vpop.f32.mrf.mxu1 }
 0x264   :  { %v1015_v14 = vpop.f32.mrf.mxu1 }
 0x26a   :  { %v16674_v61 = vpop.f32.mrf.mxu0 }
 0x26b   :  { %v935_v8 = vadd.f32 %v16674_v61, %v840_v63 }
 0x26c   :  { %v927_v3 = vpop.f32.mrf.mxu0 }
 0x26d   :  { %v928_v9 = vadd.f32 %v927_v3, %v834_v4  ;;  %v1024_v40 = vadd.f32 %v16693_v2, %v935_v8 }
 0x26f   :  { %v1016_v44 = vadd.f32 %v1015_v14, %v928_v9 }
 0x274   :  { %v16731_v41 = vpop.f32.mrf.mxu1 }
 0x276   :  { %v1203_v48 = vpop.f32.mrf.mxu1 }
 0x27b   :  { %v16712_v42 = vpop.f32.mrf.mxu0 }
 0x27c   :  { %v1125_v43 = vadd.f32 %v16712_v42, %v1024_v40 }
 0x27d   :  { %v1118_v45 = vpop.f32.mrf.mxu0 }
 0x27e   :  { %v1119_v46 = vadd.f32 %v1118_v45, %v1016_v44  ;;  %v1210_v50 = vadd.f32 %v16731_v41, %v1125_v43 }
 0x280   :  { %v1204_v51 = vadd.f32 %v1203_v48, %v1119_v46  ;;  %v1214_v57 = vmul.f32 %v1210_v50, %v49_v52 }
 0x282   :  { %v1213_v54 = vmul.f32 %v1204_v51, %v48_v49  ;;  %v18395_v7 = vadd.f32 %v1214_v57, %v625_v0  ;;  %v18434_v0 = vld [vmem:[%s19778_s1 + $0x28] sm:$0xff] }
 0x284   :  { %v18389_v60 = vadd.f32 %v1213_v54, %v624_v53  ;;  %v1264_v19 = vsel %vm1261_vm2, %v18395_v7, 0  ;;  %v18429_v54 = vld [vmem:[%s19778_s1 + $0x20] sm:$0xff] }
 0x285   :  { %v1342_v23 = vand.u32 4294901760, %v1264_v19 }
 0x286   :  { %1219 = vrot.lane.b32.xlu1 %v18389_v60, %s17989_s26  ;;  %v1262_v1 = vsel %vm1261_vm2, %v18389_v60, 0 }
 0x287   :  { %v1332_v6 = vand.u32 4294901760, %v1262_v1  ;;  %v1343_v24 = vsub.f32 %v1264_v19, %v1342_v23 }
 0x289   :  { %16739 = vmatprep.mubr.f32.mxu1 %v1332_v6  ;;  %v1333_v11 = vsub.f32 %v1262_v1, %v1332_v6  ;;  %v1344_v28 = vand.u32 4294901760, %v1343_v24 }
 0x28a   :  { %1221 = vrot.lane.b32.xlu1 %v18395_v7, %s17989_s26 }
 0x28b   :  { %v1334_v12 = vand.u32 4294901760, %v1333_v11  ;;  %v1345_v29 = vsub.f32 %v1343_v24, %v1344_v28 }
 0x28d   :  { %v1335_v13 = vsub.f32 %v1333_v11, %v1334_v12  ;;  %v1346_v56 = vand.u32 4294901760, %v1345_v29 }
 0x28f   :  { %v1336_v17 = vand.u32 4294901760, %v1335_v13 }
 0x291   :  { %16734 = vmatprep.mubr.f32.mxu0 %v1336_v17 }
 0x2f8   :  { %v1220_v18 = vpop.permute.xlu1 %1219 }
 0x2f9   :  { %1225 = vxpose.xlu0.b32.start [1/2] (short) (narrow) %v1220_v18, 16 }
 0x2fc   :  { %v1222_v5 = vpop.permute.xlu1 %1221 }
 0x2fd   :  { %1226 = vxpose.xlu0.b32.end [2/2] (short) (narrow) %v1222_v5, 16 }
 0x326   :  { %1782 = vrot.lane.b32.xlu0 %v18389_v60, %s17990_s27 }
 0x375   :  { %v1241_v34 = vpop.trf.xlu0 }
 0x376   :  { %v18402_v37 = vand.u32 4294901760, %v1241_v34 }
 0x378   :  { %v18405_v39 = vsub.f32 %v1241_v34, %v18402_v37  ;;  %16732 = vmatprep.subr.mxu0 %v18402_v37 }
 0x379   :  { %16733 = vmatpush3.msra.mxu0 %v18402_v37 }
 0x37a   :  { %16735 = vmatmul.mubr.f32.vlgmr.msra.gmra.mxu0 %v1346_v56  ;;  %16742 = vmatprep.subr.mxu0 %v18405_v39  ;;  %v18411_v58 = vand.u32 4294901760, %v18405_v39  ;;  %v18448_v56 = vpop.trf.xlu0 }
 0x37b   :  { %16743 = vmatpush3.msra.mxu0 %v18405_v39  ;;  %16744 = vmatprep.mubr.f32.mxu0 %v1333_v11 }
 0x37c   :  { %16752 = vmatprep.subr.mxu0 %v18411_v58  ;;  %v1386_v59 = vsub.f32 %v18405_v39, %v18411_v58 }
 0x37e   :  { %16745 = vmatmul.mubr.f32.vlgmr.msra.gmra.mxu0 %v1343_v24  ;;  %v18417_v61 = vand.u32 4294901760, %v1386_v59 }
 0x37f   :  { %16753 = vmatpush3.msra.mxu0 %v18411_v58  ;;  %16754 = vmatprep.mubr.f32.mxu0 %v1332_v6 }
 0x380   :  { %16737 = vmatprep.subr.mxu1 %v18417_v61 }
 0x381   :  { %16738 = vmatpush3.msra.mxu1 %v18417_v61 }
 0x382   :  { %16740 = vmatmul.mubr.f32.vlgmr.msra.gmra.mxu1 %v1342_v23  ;;  %16747 = vmatprep.subr.mxu1 %v18402_v37 }
 0x383   :  { %16755 = vmatmul.mubr.f32.vlgmr.msra.gmra.mxu0 %v1342_v23  ;;  %16748 = vmatpush3.msra.mxu1 %v18402_v37 }
 0x384   :  { %16749 = vmatprep.mubr.f32.mxu1 %v1334_v12  ;;  %16757 = vmatprep.subr.mxu1 %v18402_v37 }
 0x386   :  { %16750 = vmatmul.mubr.f32.vlgmr.msra.gmra.mxu1 %v1344_v28 }
 0x387   :  { %16758 = vmatpush3.msra.mxu1 %v18402_v37  ;;  %16759 = vmatprep.mubr.f32.mxu1 %v1332_v6 }
 0x38a   :  { %16760 = vmatmul.mubr.f32.vlgmr.msra.gmra.mxu1 %v1342_v23 }
 0x398   :  { %v1783_v59 = vpop.permute.xlu0 %1782 }
 0x43a   :  { %v16736_v62 = vpop.f32.mrf.mxu0 }
 0x43c   :  { %v1338_v63 = vpop.f32.mrf.mxu0 }
 0x43e   :  { %v16746_v2 = vpop.f32.mrf.mxu0 }
 0x440   :  { %v1504_v3 = vpop.f32.mrf.mxu0 }
 0x442   :  { %v16741_v4 = vpop.f32.mrf.mxu1 }
 0x443   :  { %v1431_v8 = vadd.f32 %v16741_v4, %v16736_v62  ;;  %v16756_v41 = vpop.f32.mrf.mxu0 }
 0x444   :  { %v1424_v9 = vpop.f32.mrf.mxu1 }
 0x445   :  { %v1425_v14 = vadd.f32 %v1424_v9, %v1338_v63  ;;  %v1512_v40 = vadd.f32 %v16746_v2, %v1431_v8  ;;  %v1667_v48 = vpop.f32.mrf.mxu0  ;;  %v18450_v63 = vand.u32 4294901760, %v1783_v59 }
 0x446   :  { %v16751_v42 = vpop.f32.mrf.mxu1 }
 0x447   :  { %v1594_v43 = vadd.f32 %v16751_v42, %v1512_v40  ;;  %v1505_v44 = vadd.f32 %v1504_v3, %v1425_v14  ;;  %v18453_v3 = vsub.f32 %v1783_v59, %v18450_v63 }
 0x448   :  { %v1585_v45 = vpop.f32.mrf.mxu1 }
 0x449   :  { %v1586_v46 = vadd.f32 %v1585_v45, %v1505_v44  ;;  %v1674_v47 = vadd.f32 %v16756_v41, %v1594_v43  ;;  %v18458_v9 = vand.u32 4294901760, %v18453_v3 }
 0x44a   :  { %v16761_v49 = vpop.f32.mrf.mxu1 }
 0x44b   :  { %v1752_v50 = vadd.f32 %v16761_v49, %v1674_v47  ;;  %v1668_v51 = vadd.f32 %v1667_v48, %v1586_v46  ;;  %v1920_v43 = vsub.f32 %v18453_v3, %v18458_v9 }
 0x44c   :  { %v1745_v52 = vpop.f32.mrf.mxu1 }
 0x44d   :  { %v1746_v53 = vadd.f32 %v1745_v52, %v1668_v51  ;;  %v1756_v55 = vmul.f32 0.35355338, %v1752_v50  ;;  %v18479_v50 = vand.u32 4294901760, %v1920_v43 }
 0x44f   :  { %v1755_v57 = vmul.f32 0.35355338, %v1746_v53  ;;  %v1758_v11 = vadd.f32 %v1756_v55, %v18434_v0 }
 0x451   :  { %v1757_v1 = vadd.f32 %v1755_v57, %v18429_v54  ;;  %v1763_v12 = vsel %vm1759_vm3, %v1758_v11, -inf }
 0x453   :  { %v1760_v6 = vsel %vm1759_vm3, %v1757_v1, -inf }
 0x454   :  { %1761 = vmax.xlane.f32.xlu1 %v1760_v6 }
 0x458   :  { %1764 = vmax.xlane.f32.xlu1 %v1763_v12 }
 0x4dd   :  { %v1762_v13 = vpop.xlane.xlu1 %1761 }
 0x4de   :  { %v1766_v17 = vsub.f32 %v1757_v1, %v1762_v13 }
 0x4e0   :  { %v1768_v19 = vmul.f32 1.442695, %v1766_v17 }
 0x4e1   :  { %v1765_v18 = vpop.xlane.xlu1 %1764 }
 0x4e2   :  { %v1767_v5 = vsub.f32 %v1758_v11, %v1765_v18 }
 0x4e4   :  { %v1770_v23 = vmul.f32 1.442695, %v1767_v5 }
 0x4e6   :  { %17875 = vpow2.f32 %v1770_v23 }
 0x4e7   :  { %17877 = vpow2.f32 %v1768_v19 }
 0x4f3   :  { %v17876_v24 = vpop.eup %17875 }
 0x4f4   :  { %v1775_v28 = vsel %vm1759_vm3, %v17876_v24, 0.0  ;;  %v17878_v29 = vpop.eup %17877 }
 0x4f5   :  { %1776 = vadd.xlane.f32.xlu1 %v1775_v28  ;;  %v1772_v34 = vsel %vm1759_vm3, %v17878_v29, 0.0 }
 0x4f9   :  { %1773 = vadd.xlane.f32.xlu1 %v1772_v34 }
 0x50a   :  { %1784 = vrot.lane.b32.xlu1 %v18395_v7, %s17990_s27 }
 0x50e   :  { %2296 = vrot.lane.b32.xlu1 %v18389_v60, %s17991_s11 }
 0x512   :  { %2298 = vrot.lane.b32.xlu1 %v18395_v7, %s17991_s11 }
 0x57e   :  { %v1777_v62 = vpop.xlane.xlu1 %1776 }
 0x57f   :  { %17879 = vrcp.f32 %v1777_v62 }
 0x582   :  { %v1774_v2 = vpop.xlane.xlu1 %1773 }
 0x583   :  { %17881 = vrcp.f32 %v1774_v2 }
 0x586   :  { %v1785_v4 = vpop.permute.xlu1 %1784 }
 0x587   :  { %v18455_v8 = vand.u32 4294901760, %v1785_v4 }
 0x589   :  { %v18461_v14 = vsub.f32 %v1785_v4, %v18455_v8  ;;  %16762 = vmatprep.subr.mxu0 %v18455_v8 }
 0x58a   :  { %16763 = vmatpush3.msra.mxu0 %v18455_v8  ;;  %v2297_v45 = vpop.permute.xlu1 %2296 }
 0x58b   :  { %v18466_v40 = vand.u32 4294901760, %v18461_v14  ;;  %16764 = vmatprep.subr.mxu0 %v18450_v63  ;;  %v2300_v6 = vsel %vm1261_vm2, %v2297_v45, 0 }
 0x58c   :  { %v17880_v41 = vpop.eup %17879  ;;  %16765 = vmatpush3.msra.mxu0 %v18450_v63  ;;  %v18489_v17 = vand.u32 4294901760, %v2300_v6 }
 0x58d   :  { %16776 = vmatprep.subr.mxu0 %v18461_v14  ;;  %v1913_v42 = vsub.f32 %v18461_v14, %v18466_v40  ;;  %v1781_v44 = vmul.f32 %v17880_v41, %v17876_v24 }
 0x58e   :  { %v2299_v57 = vpop.permute.xlu1 %2298  ;;  %v2371_v24 = vsub.f32 %v2300_v6, %v18489_v17 }
 0x58f   :  { %v18475_v46 = vand.u32 4294901760, %v1913_v42  ;;  %v1792_v47 = vsel %vm1759_vm3, %v1781_v44, 0  ;;  %v2302_v12 = vsel %vm1261_vm2, %v2299_v57, 0 }
 0x590   :  { %v17882_v48 = vpop.eup %17881  ;;  %v1871_v49 = vand.u32 4294901760, %v1792_v47  ;;  %v2380_v19 = vand.u32 4294901760, %v2302_v12  ;;  %v2372_v34 = vand.u32 4294901760, %v2371_v24 }
 0x591   :  { %16769 = vmatprep.subr.mxu1 %v18475_v46  ;;  %v1780_v51 = vmul.f32 %v17882_v48, %v17878_v29 }
 0x592   :  { %16770 = vmatpush3.msra.mxu1 %v18475_v46  ;;  %v1872_v52 = vsub.f32 %v1792_v47, %v1871_v49  ;;  %v2381_v29 = vsub.f32 %v2302_v12, %v2380_v19  ;;  %v2373_v62 = vsub.f32 %v2371_v24, %v2372_v34 }
 0x593   :  { %16771 = vmatprep.subr.mxu1 %v18479_v50  ;;  %v1789_v53 = vsel %vm1759_vm3, %v1780_v51, 0 }
 0x594   :  { %16772 = vmatpush3.msra.mxu1 %v18479_v50  ;;  %v1861_v55 = vand.u32 4294901760, %v1789_v53  ;;  %v1873_v1 = vand.u32 4294901760, %v1872_v52  ;;  %v2382_v59 = vand.u32 4294901760, %v2381_v29  ;;  %v2374_v2 = vand.u32 4294901760, %v2373_v62 }
 0x595   :  { %16783 = vmatprep.subr.mxu1 %v18455_v8 }
 0x596   :  { %16773 = vmatprep.mubr.f32.mxu1 %v1861_v55  ;;  %v1862_v11 = vsub.f32 %v1789_v53, %v1861_v55  ;;  %v1874_v18 = vsub.f32 %v1872_v52, %v1873_v1 }
 0x597   :  { %16774 = vmatmul.mubr.f32.vlgmr.msra.gmra.mxu1 %v1871_v49 }
 0x598   :  { %16784 = vmatpush3.msra.mxu1 %v18455_v8  ;;  %v1863_v13 = vand.u32 4294901760, %v1862_v11  ;;  %v1875_v28 = vand.u32 4294901760, %v1874_v18 }
 0x599   :  { %16785 = vmatprep.subr.mxu1 %v18450_v63 }
 0x59a   :  { %16786 = vmatpush3.msra.mxu1 %v18450_v63  ;;  %16787 = vmatprep.mubr.f32.mxu1 %v1863_v13  ;;  %v1864_v5 = vsub.f32 %v1862_v11, %v1863_v13 }
 0x59b   :  { %16797 = vmatprep.subr.mxu1 %v18455_v8  ;;  %16788 = vmatmul.mubr.f32.vlgmr.msra.gmra.mxu1 %v1873_v1 }
 0x59c   :  { %16798 = vmatpush3.msra.mxu1 %v18455_v8  ;;  %16801 = vmatprep.mubr.f32.mxu1 %v1861_v55  ;;  %v1865_v23 = vand.u32 4294901760, %v1864_v5 }
 0x59d   :  { %16799 = vmatprep.subr.mxu1 %v18450_v63 }
 0x59e   :  { %16800 = vmatpush3.msra.mxu1 %v18450_v63  ;;  %16766 = vmatprep.mubr.f32.mxu0 %v1865_v23 }
 0x59f   :  { %16809 = vmatprep.subr.mxu1 %v18417_v61  ;;  %16767 = vmatmul.mubr.f32.vlgmr.msra.gmra.mxu0 %v1875_v28 }
 0x5a0   :  { %16777 = vmatpush3.msra.mxu0 %v18461_v14  ;;  %16802 = vmatmul.mubr.f32.vlgmr.msra.gmra.mxu1 %v1871_v49 }
 0x5a1   :  { %16810 = vmatpush3.msra.mxu1 %v18417_v61  ;;  %16778 = vmatprep.subr.mxu0 %v18453_v3  ;;  %v2383_v61 = vsub.f32 %v2381_v29, %v2382_v59 }
 0x5a2   :  { %16780 = vmatprep.mubr.f32.mxu0 %v1862_v11  ;;  %16811 = vmatprep.mubr.f32.mxu1 %v18489_v17 }
 0x5a3   :  { %16819 = vmatprep.subr.mxu1 %v18402_v37  ;;  %16779 = vmatpush3.msra.mxu0 %v18453_v3  ;;  %v2384_v4 = vand.u32 4294901760, %v2383_v61 }
 0x5a4   :  { %16790 = vmatprep.subr.mxu0 %v18466_v40  ;;  %16781 = vmatmul.mubr.f32.vlgmr.msra.gmra.mxu0 %v1872_v52 }
 0x5a5   :  { %16791 = vmatpush3.msra.mxu0 %v18466_v40  ;;  %16812 = vmatmul.mubr.f32.vlgmr.msra.gmra.mxu1 %v2380_v19 }
 0x5a6   :  { %16820 = vmatpush3.msra.mxu1 %v18402_v37  ;;  %16792 = vmatprep.subr.mxu0 %v18458_v9 }
 0x5a7   :  { %16794 = vmatprep.mubr.f32.mxu0 %v1861_v55  ;;  %16821 = vmatprep.mubr.f32.mxu1 %v2372_v34 }
 0x5a8   :  { %16829 = vmatprep.subr.mxu1 %v18402_v37  ;;  %16793 = vmatpush3.msra.mxu0 %v18458_v9 }
 0x5a9   :  { %16804 = vmatprep.subr.mxu0 %v18402_v37  ;;  %16795 = vmatmul.mubr.f32.vlgmr.msra.gmra.mxu0 %v1871_v49 }
 0x5aa   :  { %16805 = vmatpush3.msra.mxu0 %v18402_v37  ;;  %16822 = vmatmul.mubr.f32.vlgmr.msra.gmra.mxu1 %v2382_v59 }
 0x5ab   :  { %16830 = vmatpush3.msra.mxu1 %v18402_v37  ;;  %16806 = vmatprep.mubr.f32.mxu0 %v2374_v2 }
 0x5ac   :  { %16814 = vmatprep.subr.mxu0 %v18405_v39  ;;  %16831 = vmatprep.mubr.f32.mxu1 %v18489_v17 }
 0x5ad   :  { %16841 = vmatprep.subr.mxu1 %v18475_v46  ;;  %16807 = vmatmul.mubr.f32.vlgmr.msra.gmra.mxu0 %v2384_v4 }
 0x5ae   :  { %16815 = vmatpush3.msra.mxu0 %v18405_v39  ;;  %16832 = vmatmul.mubr.f32.vlgmr.msra.gmra.mxu1 %v2380_v19 }
 0x5af   :  { %16842 = vmatpush3.msra.mxu1 %v18475_v46  ;;  %16816 = vmatprep.mubr.f32.mxu0 %v2371_v24 }
 0x5b0   :  { %16824 = vmatprep.subr.mxu0 %v18411_v58  ;;  %16843 = vmatprep.subr.mxu1 %v18479_v50 }
 0x5b1   :  { %16844 = vmatpush3.msra.mxu1 %v18479_v50  ;;  %16817 = vmatmul.mubr.f32.vlgmr.msra.gmra.mxu0 %v2381_v29 }
 0x5b2   :  { %16855 = vmatprep.subr.mxu1 %v18455_v8  ;;  %16825 = vmatpush3.msra.mxu0 %v18411_v58 }
 0x5b3   :  { %16826 = vmatprep.mubr.f32.mxu0 %v18489_v17  ;;  %16834 = vmatprep.subr.mxu0 %v18455_v8 }
 0x5b5   :  { %16827 = vmatmul.mubr.f32.vlgmr.msra.gmra.mxu0 %v2380_v19 }
 0x5b6   :  { %16835 = vmatpush3.msra.mxu0 %v18455_v8 }
 0x5b7   :  { %16836 = vmatprep.subr.mxu0 %v18450_v63 }
 0x5b8   :  { %16837 = vmatpush3.msra.mxu0 %v18450_v63 }
 0x5b9   :  { %16848 = vmatprep.subr.mxu0 %v18461_v14 }
 0x657   :  { %v16775_v37 = vpop.f32.mrf.mxu1 }
 0x659   :  { %v18530_v39 = vpop.f32.mrf.mxu1 }
 0x65b   :  { %v16789_v41 = vpop.f32.mrf.mxu1 }
 0x65d   :  { %v18532_v42 = vpop.f32.mrf.mxu1 }
 0x65f   :  { %v16768_v58 = vpop.f32.mrf.mxu0 }
 0x660   :  { %v1965_v43 = vadd.f32 %v16775_v37, %v16768_v58  ;;  %v16803_v44 = vpop.f32.mrf.mxu1 }
 0x661   :  { %v18534_v45 = vpop.f32.mrf.mxu0 }
 0x662   :  { %v18536_v46 = vpop.f32.mrf.mxu1 }
 0x664   :  { %v16782_v47 = vpop.f32.mrf.mxu0 }
 0x665   :  { %v2048_v48 = vadd.f32 %v16782_v47, %v1965_v43  ;;  %v16813_v49 = vpop.f32.mrf.mxu1 }
 0x666   :  { %v18538_v50 = vpop.f32.mrf.mxu0 }
 0x667   :  { %v2131_v51 = vadd.f32 %v16789_v41, %v2048_v48  ;;  %v2462_v52 = vpop.f32.mrf.mxu1 }
 0x669   :  { %v16796_v53 = vpop.f32.mrf.mxu0 }
 0x66a   :  { %v2214_v55 = vadd.f32 %v16796_v53, %v2131_v51  ;;  %v16823_v6 = vpop.f32.mrf.mxu1 }
 0x66b   :  { %v18540_v57 = vpop.f32.mrf.mxu0 }
 0x66c   :  { %v18542_v1 = vadd.f32 %v16803_v44, %v2214_v55  ;;  %v2623_v17 = vpop.f32.mrf.mxu1 }
 0x66d   :  { %v16808_v11 = vpop.f32.mrf.mxu0 }
 0x66e   :  { %v2469_v13 = vadd.f32 %v16813_v49, %v16808_v11  ;;  %v16833_v29 = vpop.f32.mrf.mxu1 }
 0x66f   :  { %v2376_v12 = vpop.f32.mrf.mxu0 }
 0x670   :  { %v2463_v5 = vadd.f32 %v2462_v52, %v2376_v12  ;;  %v2783_v37 = vpop.f32.mrf.mxu1 }
 0x671   :  { %v16818_v18 = vpop.f32.mrf.mxu0 }
 0x672   :  { %v2550_v19 = vadd.f32 %v16818_v18, %v2469_v13 }
 0x673   :  { %v2542_v23 = vpop.f32.mrf.mxu0 }
 0x674   :  { %v2543_v24 = vadd.f32 %v2542_v23, %v2463_v5  ;;  %v2632_v28 = vadd.f32 %v16823_v6, %v2550_v19 }
 0x675   :  { %v16828_v34 = vpop.f32.mrf.mxu0 }
 0x676   :  { %v2712_v59 = vadd.f32 %v16828_v34, %v2632_v28  ;;  %v2624_v62 = vadd.f32 %v2623_v17, %v2543_v24 }
 0x677   :  { %v2705_v61 = vpop.f32.mrf.mxu0 }
 0x678   :  { %v2790_v2 = vadd.f32 %v16833_v29, %v2712_v59  ;;  %v2706_v4 = vadd.f32 %v2705_v61, %v2624_v62 }
 0x67a   :  { %v2794_v41 = vmul.f32 0.35355338, %v2790_v2  ;;  %v2784_v58 = vadd.f32 %v2783_v37, %v2706_v4 }
 0x67c   :  { %v2793_v43 = vmul.f32 0.35355338, %v2784_v58  ;;  %v2796_v44 = vadd.f32 %v2794_v41, %v18434_v0 }
 0x67e   :  { %v2800_v47 = vsel %vm1759_vm3, %v2796_v44, -inf  ;;  %v2795_v48 = vadd.f32 %v2793_v43, %v18429_v54 }
 0x67f   :  { %2801 = vmax.xlane.f32.xlu0 %v2800_v47 }
 0x680   :  { %v2797_v49 = vsel %vm1759_vm3, %v2795_v48, -inf }
 0x681   :  { %2798 = vmax.xlane.f32.xlu1 %v2797_v49 }
 0x695   :  { %4319 = vrot.lane.b32.xlu0 %v18395_v7, %s17992_s12 }
 0x708   :  { %v2802_v51 = vpop.xlane.xlu0 %2801 }
 0x709   :  { %v2804_v52 = vsub.f32 %v2796_v44, %v2802_v51  ;;  %v1959_v51 = vadd.f32 %v18530_v39, %v18534_v45 }
 0x70a   :  { %v2799_v53 = vpop.xlane.xlu1 %2798 }
 0x70b   :  { %v2803_v55 = vsub.f32 %v2795_v48, %v2799_v53  ;;  %v2807_v6 = vmul.f32 1.442695, %v2804_v52  ;;  %v2041_v52 = vadd.f32 %v18538_v50, %v1959_v51 }
 0x70d   :  { %v2805_v11 = vmul.f32 1.442695, %v2803_v55 }
 0x70f   :  { %17883 = vpow2.f32 %v2805_v11  ;;  %v1257_v11 = vld [vmem:[%s19781_s4] sm:$0xff] }
 0x710   :  { %17885 = vpow2.f32 %v2807_v6 }
 0x71c   :  { %v17884_v12 = vpop.eup %17883 }
 0x71d   :  { %v2809_v13 = vsel %vm1759_vm3, %v17884_v12, 0.0  ;;  %v17886_v17 = vpop.eup %17885 }
 0x71e   :  { %2810 = vadd.xlane.f32.xlu1 %v2809_v13  ;;  %v2812_v18 = vsel %vm1759_vm3, %v17886_v17, 0.0 }
 0x722   :  { %2813 = vadd.xlane.f32.xlu1 %v2812_v18 }
 0x733   :  { %4317 = vrot.lane.b32.xlu1 %v18389_v60, %s17992_s12 }
 0x7a7   :  { %v2811_v5 = vpop.xlane.xlu1 %2810 }
 0x7a8   :  { %17887 = vrcp.f32 %v2811_v5 }
 0x7ab   :  { %v2814_v19 = vpop.xlane.xlu1 %2813 }
 0x7ac   :  { %17889 = vrcp.f32 %v2814_v19 }
 0x7b5   :  { %v17888_v23 = vpop.eup %17887 }
 0x7b6   :  { %v2817_v24 = vmul.f32 %v17888_v23, %v17884_v12  ;;  %v2123_v12 = vadd.f32 %v18532_v42, %v2041_v52  ;;  %v18594_v23 = vand.u32 4294901760, %v1257_v11  ;;  %v18614_v52 = vand.u32 4294901760, %v18448_v56 }
 0x7b8   :  { %v2820_v28 = vsel %vm1759_vm3, %v2817_v24, 0  ;;  %v2208_v39 = vadd.f32 %v18540_v57, %v2123_v12 }
 0x7b9   :  { %v17890_v29 = vpop.eup %17889  ;;  %v2892_v34 = vand.u32 4294901760, %v2820_v28 }
 0x7ba   :  { %v2818_v59 = vmul.f32 %v17890_v29, %v17886_v17 }
 0x7bb   :  { %16845 = vmatprep.mubr.f32.mxu1 %v2892_v34  ;;  %v2893_v62 = vsub.f32 %v2820_v28, %v2892_v34 }
 0x7bc   :  { %v2823_v61 = vsel %vm1759_vm3, %v2818_v59, 0 }
 0x7bd   :  { %v2902_v2 = vand.u32 4294901760, %v2823_v61  ;;  %v2894_v4 = vand.u32 4294901760, %v2893_v62 }
 0x7bf   :  { %v2903_v37 = vsub.f32 %v2823_v61, %v2902_v2  ;;  %16846 = vmatmul.mubr.f32.vlgmr.msra.gmra.mxu1 %v2902_v2  ;;  %v2895_v41 = vsub.f32 %v2893_v62, %v2894_v4  ;;  %v2287_v61 = vadd.f32 %v18536_v46, %v2208_v39  ;;  %v3826_v46 = vsel %vm1261_vm2, %v18542_v1, 0 }
 0x7c0   :  { %16856 = vmatpush3.msra.mxu1 %v18455_v8  ;;  %16859 = vmatprep.mubr.f32.mxu1 %v2894_v4 }
 0x7c1   :  { %16857 = vmatprep.subr.mxu1 %v18450_v63  ;;  %v2896_v58 = vand.u32 4294901760, %v2895_v41  ;;  %v2904_v43 = vand.u32 4294901760, %v2903_v37 }
 0x7c2   :  { %16858 = vmatpush3.msra.mxu1 %v18450_v63 }
 0x7c3   :  { %16869 = vmatprep.subr.mxu1 %v18455_v8  ;;  %16838 = vmatprep.mubr.f32.mxu0 %v2896_v58  ;;  %v2905_v44 = vsub.f32 %v2903_v37, %v2904_v43 }
 0x7c4   :  { %16860 = vmatmul.mubr.f32.vlgmr.msra.gmra.mxu1 %v2904_v43 }
 0x7c5   :  { %16870 = vmatpush3.msra.mxu1 %v18455_v8  ;;  %16873 = vmatprep.mubr.f32.mxu1 %v2892_v34  ;;  %v2906_v47 = vand.u32 4294901760, %v2905_v44  ;;  %v3823_v44 = vsel %vm1261_vm2, %v2287_v61, 0 }
 0x7c6   :  { %16871 = vmatprep.subr.mxu1 %v18450_v63 }
 0x7c7   :  { %16872 = vmatpush3.msra.mxu1 %v18450_v63  ;;  %16839 = vmatmul.mubr.f32.vlgmr.msra.gmra.mxu0 %v2906_v47  ;;  %v1258_v63 = vld [vmem:[%s19781_s4 + $0x8] sm:$0xff] }
 0x7c8   :  { %16849 = vmatpush3.msra.mxu0 %v18461_v14  ;;  %16874 = vmatmul.mubr.f32.vlgmr.msra.gmra.mxu1 %v2902_v2  ;;  %v18573_v8 = vand.u32 4294901760, %v1258_v63 }
 0x7c9   :  { %16850 = vmatprep.subr.mxu0 %v18453_v3  ;;  %16852 = vmatprep.mubr.f32.mxu0 %v2893_v62  ;;  %v18598_v62 = vsub.f32 %v1257_v11, %v18594_v23 }
 0x7ca   :  { %16851 = vmatpush3.msra.mxu0 %v18453_v3  ;;  %v18576_v14 = vsub.f32 %v1258_v63, %v18573_v8 }
 0x7cb   :  { %16862 = vmatprep.subr.mxu0 %v18466_v40  ;;  %16853 = vmatmul.mubr.f32.vlgmr.msra.gmra.mxu0 %v2903_v37  ;;  %v18603_v57 = vand.u32 4294901760, %v18598_v62 }
 0x7cc   :  { %16863 = vmatpush3.msra.mxu0 %v18466_v40  ;;  %16866 = vmatprep.mubr.f32.mxu0 %v2892_v34  ;;  %v18581_v3 = vand.u32 4294901760, %v18576_v14 }
 0x7cd   :  { %16864 = vmatprep.subr.mxu0 %v18458_v9 }
 0x7ce   :  { %16865 = vmatpush3.msra.mxu0 %v18458_v9  ;;  %v3453_v9 = vsub.f32 %v18576_v14, %v18581_v3 }
 0x7cf   :  { %16867 = vmatmul.mubr.f32.vlgmr.msra.gmra.mxu0 %v2902_v2  ;;  %16876 = vmatprep.subr.mxu0 %v18573_v8 }
 0x7d0   :  { %16877 = vmatpush3.msra.mxu0 %v18573_v8  ;;  %v3454_v40 = vand.u32 4294901760, %v3453_v9 }
 0x7d1   :  { %16886 = vmatprep.subr.mxu0 %v18576_v14 }
 0x7d2   :  { %16881 = vmatprep.subr.mxu1 %v3454_v40 }
 0x7d3   :  { %16882 = vmatpush3.msra.mxu1 %v3454_v40  ;;  %v3948_v40 = vsub.f32 %v18598_v62, %v18603_v57 }
 0x7d4   :  { %16891 = vmatprep.subr.mxu1 %v18573_v8 }
 0x7d5   :  { %v3949_v11 = vand.u32 4294901760, %v3948_v40 }
 0x87f   :  { %v16847_v48 = vpop.f32.mrf.mxu1 }
 0x881   :  { %v2989_v49 = vpop.f32.mrf.mxu1 }
 0x884   :  { %v16861_v53 = vpop.f32.mrf.mxu1 }
 0x886   :  { %v3153_v17 = vpop.f32.mrf.mxu1 }
 0x887   :  { %v16840_v55 = vpop.f32.mrf.mxu0 }
 0x888   :  { %v2996_v13 = vadd.f32 %v16847_v48, %v16840_v55  ;;  %v16875_v28 = vpop.f32.mrf.mxu1  ;;  %v18611_v48 = vand.u32 4294901760, %v3823_v44  ;;  %v18617_v55 = vand.u32 4294901760, %v3826_v46 }
 0x889   :  { %v2898_v6 = vpop.f32.mrf.mxu0 }
 0x88a   :  { %v2990_v5 = vadd.f32 %v2989_v49, %v2898_v6  ;;  %v3317_v37 = vpop.f32.mrf.mxu1  ;;  %v3895_v1 = vsub.f32 %v3823_v44, %v18611_v48 }
 0x88b   :  { %v16854_v18 = vpop.f32.mrf.mxu0 }
 0x88c   :  { %v3079_v19 = vadd.f32 %v16854_v18, %v2996_v13  ;;  %v18623_v13 = vsub.f32 %v18448_v56, %v18614_v52  ;;  %v3905_v18 = vsub.f32 %v3826_v46, %v18617_v55 }
 0x88d   :  { %v3071_v24 = vpop.f32.mrf.mxu0 }
 0x88e   :  { %v3072_v45 = vadd.f32 %v3071_v24, %v2990_v5  ;;  %v3162_v50 = vadd.f32 %v16861_v53, %v3079_v19  ;;  %v4318_v5 = vpop.permute.xlu1 %4317  ;;  %v3896_v24 = vand.u32 4294901760, %v3895_v1  ;;  %v18628_v39 = vand.u32 4294901760, %v18623_v13 }
 0x88f   :  { %v16868_v29 = vpop.f32.mrf.mxu0  ;;  %v4321_v56 = vsel %vm1261_vm2, %v4318_v5, 0 }
 0x890   :  { %v3245_v34 = vadd.f32 %v16868_v29, %v3162_v50  ;;  %v3154_v59 = vadd.f32 %v3153_v17, %v3072_v45  ;;  %v4320_v45 = vpop.permute.xlu0 %4319  ;;  %v4391_v29 = vand.u32 4294901760, %v4321_v56 }
 0x891   :  { %v3238_v42 = vpop.f32.mrf.mxu0  ;;  %v4323_v50 = vsel %vm1261_vm2, %v4320_v45, 0 }
 0x892   :  { %v3324_v2 = vadd.f32 %v16875_v28, %v3245_v34  ;;  %v3239_v4 = vadd.f32 %v3238_v42, %v3154_v59  ;;  %v3897_v28 = vsub.f32 %v3895_v1, %v3896_v24  ;;  %v4445_v34 = vsub.f32 %v18623_v13, %v18628_v39 }
 0x893   :  { %v4401_v59 = vand.u32 4294901760, %v4323_v50  ;;  %v4392_v61 = vsub.f32 %v4321_v56, %v4391_v29 }
 0x894   :  { %v3331_v41 = vsel %vm1261_vm2, %v3324_v2, 0  ;;  %v3318_v58 = vadd.f32 %v3317_v37, %v3239_v4  ;;  %v3898_v42 = vand.u32 4294901760, %v3897_v28  ;;  %v18643_v2 = vand.u32 4294901760, %v4445_v34 }
 0x895   :  { %v3409_v43 = vand.u32 4294901760, %v3331_v41  ;;  %v4402_v4 = vsub.f32 %v4323_v50, %v4401_v59  ;;  %v4393_v37 = vand.u32 4294901760, %v4392_v61 }
 0x896   :  { %v3328_v47 = vsel %vm1261_vm2, %v3318_v58, 0 }
 0x897   :  { %v3410_v63 = vsub.f32 %v3331_v41, %v3409_v43  ;;  %v3399_v9 = vand.u32 4294901760, %v3328_v47  ;;  %v4403_v41 = vand.u32 4294901760, %v4402_v4  ;;  %v4394_v58 = vsub.f32 %v4392_v61, %v4393_v37 }
 0x899   :  { %v3400_v49 = vsub.f32 %v3328_v47, %v3399_v9  ;;  %16883 = vmatprep.mubr.f32.mxu1 %v3399_v9  ;;  %v3411_v51 = vand.u32 4294901760, %v3410_v63 }
 0x89a   :  { %16884 = vmatmul.mubr.f32.vlgmr.msra.gmra.mxu1 %v3409_v43 }
 0x89b   :  { %16892 = vmatpush3.msra.mxu1 %v18573_v8  ;;  %v3401_v53 = vand.u32 4294901760, %v3400_v49  ;;  %v3412_v6 = vsub.f32 %v3410_v63, %v3411_v51 }
 0x89c   :  { %16901 = vmatprep.subr.mxu1 %v18573_v8 }
 0x89d   :  { %16893 = vmatprep.mubr.f32.mxu1 %v3401_v53  ;;  %v3402_v12 = vsub.f32 %v3400_v49, %v3401_v53  ;;  %v3413_v19 = vand.u32 4294901760, %v3412_v6 }
 0x89e   :  { %16894 = vmatmul.mubr.f32.vlgmr.msra.gmra.mxu1 %v3411_v51 }
 0x89f   :  { %16903 = vmatprep.mubr.f32.mxu1 %v3399_v9  ;;  %v3403_v17 = vand.u32 4294901760, %v3402_v12  ;;  %16902 = vmatpush3.msra.mxu1 %v18573_v8  ;;  %v3906_v8 = vand.u32 4294901760, %v3905_v18 }
 0x8a0   :  { %16911 = vmatprep.subr.mxu1 %v3949_v11 }
 0x8a1   :  { %16878 = vmatprep.mubr.f32.mxu0 %v3403_v17 }
 0x8a2   :  { %16879 = vmatmul.mubr.f32.vlgmr.msra.gmra.mxu0 %v3413_v19  ;;  %16904 = vmatmul.mubr.f32.vlgmr.msra.gmra.mxu1 %v3409_v43 }
 0x8a3   :  { %16888 = vmatprep.mubr.f32.mxu0 %v3400_v49  ;;  %16913 = vmatprep.mubr.f32.mxu1 %v18611_v48 }
 0x8a4   :  { %16887 = vmatpush3.msra.mxu0 %v18576_v14  ;;  %16912 = vmatpush3.msra.mxu1 %v3949_v11  ;;  %v3907_v14 = vsub.f32 %v3905_v18, %v3906_v8 }
 0x8a5   :  { %16921 = vmatprep.subr.mxu1 %v18594_v23  ;;  %16896 = vmatprep.subr.mxu0 %v18581_v3 }
 0x8a6   :  { %16889 = vmatmul.mubr.f32.vlgmr.msra.gmra.mxu0 %v3410_v63  ;;  %16914 = vmatmul.mubr.f32.vlgmr.msra.gmra.mxu1 %v18617_v55 }
 0x8a7   :  { %16898 = vmatprep.mubr.f32.mxu0 %v3399_v9  ;;  %16923 = vmatprep.mubr.f32.mxu1 %v3896_v24 }
 0x8a8   :  { %16922 = vmatpush3.msra.mxu1 %v18594_v23  ;;  %16897 = vmatpush3.msra.mxu0 %v18581_v3  ;;  %v3908_v3 = vand.u32 4294901760, %v3907_v14 }
 0x8a9   :  { %16931 = vmatprep.subr.mxu1 %v18594_v23  ;;  %16906 = vmatprep.subr.mxu0 %v18594_v23 }
 0x8aa   :  { %16899 = vmatmul.mubr.f32.vlgmr.msra.gmra.mxu0 %v3409_v43  ;;  %16924 = vmatmul.mubr.f32.vlgmr.msra.gmra.mxu1 %v3906_v8 }
 0x8ab   :  { %16932 = vmatpush3.msra.mxu1 %v18594_v23  ;;  %16908 = vmatprep.mubr.f32.mxu0 %v3898_v42 }
 0x8ac   :  { %16933 = vmatprep.mubr.f32.mxu1 %v18611_v48  ;;  %16941 = vmatprep.subr.mxu1 %v18643_v2 }
 0x8ad   :  { %16907 = vmatpush3.msra.mxu0 %v18594_v23  ;;  %v4404_v23 = vsub.f32 %v4402_v4, %v4403_v41 }
 0x8ae   :  { %16909 = vmatmul.mubr.f32.vlgmr.msra.gmra.mxu0 %v3908_v3  ;;  %16934 = vmatmul.mubr.f32.vlgmr.msra.gmra.mxu1 %v18617_v55 }
 0x8af   :  { %16942 = vmatpush3.msra.mxu1 %v18643_v2  ;;  %16916 = vmatprep.subr.mxu0 %v18598_v62  ;;  %v4405_v43 = vand.u32 4294901760, %v4404_v23 }
 0x8b0   :  { %16918 = vmatprep.mubr.f32.mxu0 %v3895_v1  ;;  %16943 = vmatprep.mubr.f32.mxu1 %v4391_v29 }
 0x8b1   :  { %16951 = vmatprep.subr.mxu1 %v18614_v52  ;;  %16917 = vmatpush3.msra.mxu0 %v18598_v62  ;;  %v4395_v62 = vand.u32 4294901760, %v4394_v58 }
 0x8b2   :  { %16926 = vmatprep.subr.mxu0 %v18603_v57  ;;  %16919 = vmatmul.mubr.f32.vlgmr.msra.gmra.mxu0 %v3905_v18 }
 0x8b3   :  { %16927 = vmatpush3.msra.mxu0 %v18603_v57  ;;  %16944 = vmatmul.mubr.f32.vlgmr.msra.gmra.mxu1 %v4401_v59 }
 0x8b4   :  { %16952 = vmatpush3.msra.mxu1 %v18614_v52  ;;  %16928 = vmatprep.mubr.f32.mxu0 %v18611_v48 }
 0x8b5   :  { %16936 = vmatprep.subr.mxu0 %v18614_v52  ;;  %16953 = vmatprep.mubr.f32.mxu1 %v4393_v37 }
 0x8b6   :  { %16961 = vmatprep.subr.mxu1 %v18614_v52  ;;  %16929 = vmatmul.mubr.f32.vlgmr.msra.gmra.mxu0 %v18617_v55 }
 0x8b7   :  { %16937 = vmatpush3.msra.mxu0 %v18614_v52  ;;  %16954 = vmatmul.mubr.f32.vlgmr.msra.gmra.mxu1 %v4403_v41 }
 0x8b8   :  { %16962 = vmatpush3.msra.mxu1 %v18614_v52  ;;  %16938 = vmatprep.mubr.f32.mxu0 %v4395_v62 }
 0x8b9   :  { %16946 = vmatprep.subr.mxu0 %v18623_v13  ;;  %16963 = vmatprep.mubr.f32.mxu1 %v4391_v29 }
 0x8ba   :  { %16939 = vmatmul.mubr.f32.vlgmr.msra.gmra.mxu0 %v4405_v43 }
 0x8bb   :  { %16947 = vmatpush3.msra.mxu0 %v18623_v13  ;;  %16964 = vmatmul.mubr.f32.vlgmr.msra.gmra.mxu1 %v4401_v59 }
 0x8bc   :  { %16948 = vmatprep.mubr.f32.mxu0 %v4392_v61  ;;  %16956 = vmatprep.subr.mxu0 %v18628_v39 }
 0x8be   :  { %16949 = vmatmul.mubr.f32.vlgmr.msra.gmra.mxu0 %v4402_v4 }
 0x8bf   :  { %16957 = vmatpush3.msra.mxu0 %v18628_v39  ;;  %16958 = vmatprep.mubr.f32.mxu0 %v4391_v29 }
 0x8c2   :  { %16959 = vmatmul.mubr.f32.vlgmr.msra.gmra.mxu0 %v4401_v59 }
 0x95a   :  { %v16885_v57 = vpop.f32.mrf.mxu1 }
 0x95c   :  { %v18667_v44 = vpop.f32.mrf.mxu1 }
 0x95e   :  { %v16895_v47 = vpop.f32.mrf.mxu1 }
 0x960   :  { %v18669_v63 = vpop.f32.mrf.mxu1 }
 0x962   :  { %v16880_v9 = vpop.f32.mrf.mxu0  ;;  %v16905_v40 = vpop.f32.mrf.mxu1 }
 0x963   :  { %v3498_v46 = vadd.f32 %v16885_v57, %v16880_v9 }
 0x964   :  { %v18671_v48 = vpop.f32.mrf.mxu0  ;;  %v18673_v49 = vpop.f32.mrf.mxu1 }
 0x966   :  { %v16890_v51 = vpop.f32.mrf.mxu0  ;;  %v16915_v53 = vpop.f32.mrf.mxu1 }
 0x967   :  { %v3579_v55 = vadd.f32 %v16890_v51, %v3498_v46 }
 0x968   :  { %v18675_v6 = vpop.f32.mrf.mxu0  ;;  %v18677_v11 = vpop.f32.mrf.mxu1 }
 0x969   :  { %v3661_v1 = vadd.f32 %v16895_v47, %v3579_v55 }
 0x96a   :  { %v16900_v12 = vpop.f32.mrf.mxu0  ;;  %v16925_v17 = vpop.f32.mrf.mxu1 }
 0x96b   :  { %v3741_v18 = vadd.f32 %v16900_v12, %v3661_v1 }
 0x96c   :  { %v18679_v5 = vpop.f32.mrf.mxu0  ;;  %v18681_v19 = vpop.f32.mrf.mxu1 }
 0x96d   :  { %v3819_v24 = vadd.f32 %v16905_v40, %v3741_v18 }
 0x96e   :  { %v16910_v45 = vpop.f32.mrf.mxu0  ;;  %v16935_v56 = vpop.f32.mrf.mxu1 }
 0x96f   :  { %v3911_v8 = vadd.f32 %v16910_v45, %v3819_v24 }
 0x970   :  { %v18683_v50 = vpop.f32.mrf.mxu0  ;;  %v18685_v28 = vpop.f32.mrf.mxu1 }
 0x971   :  { %v3993_v29 = vadd.f32 %v16915_v53, %v3911_v8 }
 0x972   :  { %v16920_v34 = vpop.f32.mrf.mxu0 }
 0x973   :  { %v4074_v59 = vadd.f32 %v16920_v34, %v3993_v29  ;;  %v16945_v14 = vpop.f32.mrf.mxu1 }
 0x974   :  { %v18687_v42 = vpop.f32.mrf.mxu0 }
 0x975   :  { %v4156_v61 = vadd.f32 %v16925_v17, %v4074_v59  ;;  %v4483_v4 = vpop.f32.mrf.mxu1 }
 0x976   :  { %v16930_v3 = vpop.f32.mrf.mxu0 }
 0x977   :  { %v4236_v37 = vadd.f32 %v16930_v3, %v4156_v61  ;;  %v16955_v23 = vpop.f32.mrf.mxu1 }
 0x978   :  { %v18689_v41 = vpop.f32.mrf.mxu0 }
 0x979   :  { %v18691_v58 = vadd.f32 %v16935_v56, %v4236_v37  ;;  %v4644_v47 = vpop.f32.mrf.mxu1 }
 0x97a   :  { %v16940_v62 = vpop.f32.mrf.mxu0 }
 0x97b   :  { %v4490_v57 = vadd.f32 %v16945_v14, %v16940_v62  ;;  %v16965_v1 = vpop.f32.mrf.mxu1 }
 0x97c   :  { %v4397_v43 = vpop.f32.mrf.mxu0 }
 0x97d   :  { %v4484_v40 = vadd.f32 %v4483_v4, %v4397_v43  ;;  %v4804_v56 = vpop.f32.mrf.mxu1 }
 0x97e   :  { %v16950_v9 = vpop.f32.mrf.mxu0 }
 0x97f   :  { %v4571_v46 = vadd.f32 %v16950_v9, %v4490_v57 }
 0x980   :  { %v4563_v51 = vpop.f32.mrf.mxu0 }
 0x981   :  { %v4564_v53 = vadd.f32 %v4563_v51, %v4484_v40  ;;  %v4653_v55 = vadd.f32 %v16955_v23, %v4571_v46 }
 0x982   :  { %v16960_v12 = vpop.f32.mrf.mxu0 }
 0x983   :  { %v4733_v17 = vadd.f32 %v16960_v12, %v4653_v55  ;;  %v4645_v18 = vadd.f32 %v4644_v47, %v4564_v53 }
 0x984   :  { %v4726_v24 = vpop.f32.mrf.mxu0 }
 0x985   :  { %v4811_v45 = vadd.f32 %v16965_v1, %v4733_v17  ;;  %v4727_v8 = vadd.f32 %v4726_v24, %v4645_v18 }
 0x987   :  { %v4815_v29 = vmul.f32 0.35355338, %v4811_v45  ;;  %v4805_v34 = vadd.f32 %v4804_v56, %v4727_v8 }
 0x989   :  { %v4814_v59 = vmul.f32 0.35355338, %v4805_v34  ;;  %v4817_v14 = vadd.f32 %v4815_v29, %v18434_v0 }
 0x98b   :  { %v4821_v61 = vsel %vm1759_vm3, %v4817_v14, -inf  ;;  %v4816_v4 = vadd.f32 %v4814_v59, %v18429_v54 }
 0x98c   :  { %4822 = vmax.xlane.f32.xlu0 %v4821_v61 }
 0x98d   :  { %v4818_v3 = vsel %vm1759_vm3, %v4816_v4, -inf }
 0x98e   :  { %4819 = vmax.xlane.f32.xlu1 %v4818_v3 }
 0xa15   :  { %v4823_v37 = vpop.xlane.xlu0 %4822 }
 0xa16   :  { %v4825_v23 = vsub.f32 %v4817_v14, %v4823_v37 }
 0xa17   :  { %v4820_v62 = vpop.xlane.xlu1 %4819 }
 0xa18   :  { %v4828_v43 = vmul.f32 1.442695, %v4825_v23  ;;  %v4824_v57 = vsub.f32 %v4816_v4, %v4820_v62 }
 0xa1a   :  { %17891 = vpow2.f32 %v4828_v43  ;;  %v4826_v47 = vmul.f32 1.442695, %v4824_v57 }
 0xa1c   :  { %17893 = vpow2.f32 %v4826_v47 }
 0xa27   :  { %v17892_v9 = vpop.eup %17891 }
 0xa28   :  { %v4833_v40 = vsel %vm1759_vm3, %v17892_v9, 0.0 }
 0xa29   :  { %v17894_v0 = vpop.eup %17893  ;;  %4834 = vadd.xlane.f32.xlu0 %v4833_v40 }
 0xa2a   :  { %v4830_v46 = vsel %vm1759_vm3, %v17894_v0, 0.0 }
 0xa2b   :  { %4831 = vadd.xlane.f32.xlu1 %v4830_v46  ;;  %v1259_v46 = vld [vmem:[%s19781_s4 + $0x10] sm:$0xff] }
 0xa3c   :  { %4842 = vrot.lane.b32.xlu1 %v18395_v7, %s17993_s17 }
 0xa3f   :  { %4840 = vrot.lane.b32.xlu0 %v18389_v60, %s17993_s17 }
 0xa40   :  { %5851 = vrot.lane.b32.xlu1 %v18389_v60, %s17994_s18 }
 0xa44   :  { %5853 = vrot.lane.b32.xlu1 %v18395_v7, %s17994_s18 }
 0xab2   :  { %v4835_v54 = vpop.xlane.xlu0 %4834 }
 0xab3   :  { %17895 = vrcp.f32 %v4835_v54  ;;  %v5391_v54 = vand.u32 4294901760, %v1259_v46 }
 0xab4   :  { %v4832_v51 = vpop.xlane.xlu1 %4831 }
 0xab5   :  { %17897 = vrcp.f32 %v4832_v51  ;;  %v18758_v51 = vsub.f32 %v1259_v46, %v5391_v54 }
 0xab6   :  { %v4841_v53 = vpop.permute.xlu0 %4840 }
 0xab7   :  { %v18705_v55 = vand.u32 4294901760, %v4841_v53 }
 0xab8   :  { %v4843_v1 = vpop.permute.xlu1 %4842 }
 0xab9   :  { %v18708_v12 = vsub.f32 %v4841_v53, %v18705_v55  ;;  %v18710_v17 = vand.u32 4294901760, %v4843_v1  ;;  %v18761_v53 = vand.u32 4294901760, %v18758_v51 }
 0xabb   :  { %v18713_v18 = vand.u32 4294901760, %v18708_v12  ;;  %v18716_v60 = vsub.f32 %v4843_v1, %v18710_v17  ;;  %16966 = vmatprep.subr.mxu0 %v18710_v17  ;;  %v5480_v1 = vsub.f32 %v18758_v51, %v18761_v53 }
 0xabc   :  { %16967 = vmatpush3.msra.mxu0 %v18710_v17 }
 0xabd   :  { %v18721_v7 = vand.u32 4294901760, %v18716_v60  ;;  %16968 = vmatprep.subr.mxu0 %v18705_v55  ;;  %v4978_v45 = vsub.f32 %v18708_v12, %v18713_v18 }
 0xabe   :  { %16969 = vmatpush3.msra.mxu0 %v18705_v55 }
 0xabf   :  { %16980 = vmatprep.subr.mxu0 %v18716_v60  ;;  %v4971_v24 = vsub.f32 %v18716_v60, %v18721_v7  ;;  %v18733_v59 = vand.u32 4294901760, %v4978_v45 }
 0xac0   :  { %v17896_v8 = vpop.eup %17895 }
 0xac1   :  { %v18730_v56 = vand.u32 4294901760, %v4971_v24  ;;  %v4839_v29 = vmul.f32 %v17896_v8, %v17892_v9  ;;  %v5481_v24 = vand.u32 4294901760, %v5480_v1 }
 0xac2   :  { %v17898_v34 = vpop.eup %17897 }
 0xac3   :  { %16973 = vmatprep.subr.mxu1 %v18730_v56  ;;  %v4838_v14 = vmul.f32 %v17898_v34, %v17894_v0  ;;  %v4850_v61 = vsel %vm1759_vm3, %v4839_v29, 0 }
 0xac4   :  { %16974 = vmatpush3.msra.mxu1 %v18730_v56  ;;  %v4929_v4 = vand.u32 4294901760, %v4850_v61 }
 0xac5   :  { %16975 = vmatprep.subr.mxu1 %v18733_v59  ;;  %v4847_v3 = vsel %vm1759_vm3, %v4838_v14, 0 }
 0xac6   :  { %16976 = vmatpush3.msra.mxu1 %v18733_v59  ;;  %v4919_v37 = vand.u32 4294901760, %v4847_v3  ;;  %v4930_v23 = vsub.f32 %v4850_v61, %v4929_v4 }
 0xac7   :  { %16987 = vmatprep.subr.mxu1 %v18710_v17 }
 0xac8   :  { %16977 = vmatprep.mubr.f32.mxu1 %v4919_v37  ;;  %v4920_v62 = vsub.f32 %v4847_v3, %v4919_v37  ;;  %v4931_v43 = vand.u32 4294901760, %v4930_v23 }
 0xac9   :  { %16978 = vmatmul.mubr.f32.vlgmr.msra.gmra.mxu1 %v4929_v4 }
 0xaca   :  { %16988 = vmatpush3.msra.mxu1 %v18710_v17  ;;  %v4921_v57 = vand.u32 4294901760, %v4920_v62  ;;  %v4932_v47 = vsub.f32 %v4930_v23, %v4931_v43 }
 0xacb   :  { %16989 = vmatprep.subr.mxu1 %v18705_v55 }
 0xacc   :  { %16990 = vmatpush3.msra.mxu1 %v18705_v55  ;;  %16991 = vmatprep.mubr.f32.mxu1 %v4921_v57  ;;  %v4922_v9 = vsub.f32 %v4920_v62, %v4921_v57  ;;  %v4933_v0 = vand.u32 4294901760, %v4932_v47 }
 0xacd   :  { %17001 = vmatprep.subr.mxu1 %v18710_v17  ;;  %16992 = vmatmul.mubr.f32.vlgmr.msra.gmra.mxu1 %v4931_v43 }
 0xace   :  { %17002 = vmatpush3.msra.mxu1 %v18710_v17  ;;  %17005 = vmatprep.mubr.f32.mxu1 %v4919_v37  ;;  %v4923_v40 = vand.u32 4294901760, %v4922_v9 }
 0xacf   :  { %17003 = vmatprep.subr.mxu1 %v18705_v55 }
 0xad0   :  { %17004 = vmatpush3.msra.mxu1 %v18705_v55  ;;  %16970 = vmatprep.mubr.f32.mxu0 %v4923_v40  ;;  %v5852_v40 = vpop.permute.xlu1 %5851 }
 0xad1   :  { %16971 = vmatmul.mubr.f32.vlgmr.msra.gmra.mxu0 %v4933_v0  ;;  %17006 = vmatmul.mubr.f32.vlgmr.msra.gmra.mxu1 %v4929_v4 }
 0xad2   :  { %16981 = vmatpush3.msra.mxu0 %v18716_v60  ;;  %16984 = vmatprep.mubr.f32.mxu0 %v4920_v62 }
 0xad3   :  { %16982 = vmatprep.subr.mxu0 %v18708_v12  ;;  %17013 = vmatprep.subr.mxu1 %v5481_v24 }
 0xad4   :  { %16983 = vmatpush3.msra.mxu0 %v18708_v12  ;;  %17014 = vmatpush3.msra.mxu1 %v5481_v24 }
 0xad5   :  { %16994 = vmatprep.subr.mxu0 %v18721_v7  ;;  %16985 = vmatmul.mubr.f32.vlgmr.msra.gmra.mxu0 %v4930_v23 }
 0xad6   :  { %16995 = vmatpush3.msra.mxu0 %v18721_v7  ;;  %16998 = vmatprep.mubr.f32.mxu0 %v4919_v37 }
 0xad7   :  { %16996 = vmatprep.subr.mxu0 %v18713_v18  ;;  %17023 = vmatprep.subr.mxu1 %v5391_v54 }
 0xad8   :  { %16997 = vmatpush3.msra.mxu0 %v18713_v18 }
 0xad9   :  { %16999 = vmatmul.mubr.f32.vlgmr.msra.gmra.mxu0 %v4929_v4  ;;  %17008 = vmatprep.subr.mxu0 %v5391_v54 }
 0xada   :  { %17009 = vmatpush3.msra.mxu0 %v5391_v54 }
 0xadb   :  { %17018 = vmatprep.subr.mxu0 %v18758_v51 }
 0xb89   :  { %v16979_v45 = vpop.f32.mrf.mxu1 }
 0xb8b   :  { %v5016_v8 = vpop.f32.mrf.mxu1 }
 0xb8d   :  { %v16993_v29 = vpop.f32.mrf.mxu1 }
 0xb8f   :  { %v5180_v4 = vpop.f32.mrf.mxu1 }
 0xb91   :  { %v16972_v34 = vpop.f32.mrf.mxu0  ;;  %v17007_v47 = vpop.f32.mrf.mxu1 }
 0xb92   :  { %v5023_v61 = vadd.f32 %v16979_v45, %v16972_v34  ;;  %v5854_v34 = vpop.permute.xlu1 %5853 }
 0xb93   :  { %v4925_v14 = vpop.f32.mrf.mxu0  ;;  %v5344_v30 = vpop.f32.mrf.mxu1 }
 0xb94   :  { %v5017_v37 = vadd.f32 %v5016_v8, %v4925_v14  ;;  %v5855_v14 = vsel %vm1261_vm2, %v5852_v40, 0 }
 0xb95   :  { %v16986_v3 = vpop.f32.mrf.mxu0 }
 0xb96   :  { %v5106_v23 = vadd.f32 %v16986_v3, %v5023_v61  ;;  %v5857_v3 = vsel %vm1261_vm2, %v5854_v34, 0 }
 0xb97   :  { %v5098_v62 = vpop.f32.mrf.mxu0 }
 0xb98   :  { %v5099_v43 = vadd.f32 %v5098_v62, %v5017_v37  ;;  %v5189_v57 = vadd.f32 %v16993_v29, %v5106_v23  ;;  %v5925_v23 = vand.u32 4294901760, %v5855_v14 }
 0xb99   :  { %v17000_v9 = vpop.f32.mrf.mxu0 }
 0xb9a   :  { %v5272_v0 = vadd.f32 %v17000_v9, %v5189_v57  ;;  %v5181_v46 = vadd.f32 %v5180_v4, %v5099_v43  ;;  %v5935_v43 = vand.u32 4294901760, %v5857_v3  ;;  %v5926_v57 = vsub.f32 %v5855_v14, %v5925_v23 }
 0xb9b   :  { %v5265_v1 = vpop.f32.mrf.mxu0 }
 0xb9c   :  { %v5351_v24 = vadd.f32 %v17007_v47, %v5272_v0  ;;  %v5266_v35 = vadd.f32 %v5265_v1, %v5181_v46  ;;  %v5927_v9 = vand.u32 4294901760, %v5926_v57 }
 0xb9e   :  { %v5358_v25 = vsel %vm1261_vm2, %v5351_v24, 0  ;;  %v5345_v22 = vadd.f32 %v5344_v30, %v5266_v35 }
 0xb9f   :  { %v5436_v45 = vand.u32 4294901760, %v5358_v25 }
 0xba0   :  { %v5355_v8 = vsel %vm1261_vm2, %v5345_v22, 0 }
 0xba1   :  { %v5437_v61 = vsub.f32 %v5358_v25, %v5436_v45  ;;  %v5426_v29 = vand.u32 4294901760, %v5355_v8  ;;  %v5936_v25 = vsub.f32 %v5857_v3, %v5935_v43 }
 0xba3   :  { %v5427_v37 = vsub.f32 %v5355_v8, %v5426_v29  ;;  %17015 = vmatprep.mubr.f32.mxu1 %v5426_v29  ;;  %v5438_v4 = vand.u32 4294901760, %v5437_v61  ;;  %v5937_v40 = vand.u32 4294901760, %v5936_v25 }
 0xba4   :  { %17016 = vmatmul.mubr.f32.vlgmr.msra.gmra.mxu1 %v5436_v45 }
 0xba5   :  { %17024 = vmatpush3.msra.mxu1 %v5391_v54  ;;  %v5428_v62 = vand.u32 4294901760, %v5427_v37  ;;  %v5439_v30 = vsub.f32 %v5437_v61, %v5438_v4  ;;  %v5938_v0 = vsub.f32 %v5936_v25, %v5937_v40 }
 0xba6   :  { %17033 = vmatprep.subr.mxu1 %v5391_v54 }
 0xba7   :  { %17025 = vmatprep.mubr.f32.mxu1 %v5428_v62  ;;  %v5429_v35 = vsub.f32 %v5427_v37, %v5428_v62  ;;  %v5440_v47 = vand.u32 4294901760, %v5439_v30 }
 0xba8   :  { %17026 = vmatmul.mubr.f32.vlgmr.msra.gmra.mxu1 %v5438_v4 }
 0xba9   :  { %17034 = vmatpush3.msra.mxu1 %v5391_v54  ;;  %17035 = vmatprep.mubr.f32.mxu1 %v5426_v29  ;;  %v5430_v22 = vand.u32 4294901760, %v5429_v35  ;;  %v5928_v54 = vsub.f32 %v5926_v57, %v5927_v9 }
 0xbaa   :  { %17043 = vmatprep.subr.mxu1 %v18643_v2 }
 0xbab   :  { %17010 = vmatprep.mubr.f32.mxu0 %v5430_v22 }
 0xbac   :  { %17011 = vmatmul.mubr.f32.vlgmr.msra.gmra.mxu0 %v5440_v47  ;;  %17036 = vmatmul.mubr.f32.vlgmr.msra.gmra.mxu1 %v5436_v45 }
 0xbad   :  { %17044 = vmatpush3.msra.mxu1 %v18643_v2  ;;  %17020 = vmatprep.mubr.f32.mxu0 %v5427_v37  ;;  %v5929_v2 = vand.u32 4294901760, %v5928_v54 }
 0xbae   :  { %17045 = vmatprep.mubr.f32.mxu1 %v5925_v23  ;;  %17053 = vmatprep.subr.mxu1 %v18614_v52 }
 0xbaf   :  { %17019 = vmatpush3.msra.mxu0 %v18758_v51  ;;  %v5939_v51 = vand.u32 4294901760, %v5938_v0 }
 0xbb0   :  { %17028 = vmatprep.subr.mxu0 %v18761_v53  ;;  %17021 = vmatmul.mubr.f32.vlgmr.msra.gmra.mxu0 %v5437_v61 }
 0xbb1   :  { %17029 = vmatpush3.msra.mxu0 %v18761_v53  ;;  %17046 = vmatmul.mubr.f32.vlgmr.msra.gmra.mxu1 %v5935_v43 }
 0xbb2   :  { %17054 = vmatpush3.msra.mxu1 %v18614_v52  ;;  %17030 = vmatprep.mubr.f32.mxu0 %v5426_v29 }
 0xbb3   :  { %17038 = vmatprep.subr.mxu0 %v18614_v52  ;;  %17055 = vmatprep.mubr.f32.mxu1 %v5927_v9 }
 0xbb4   :  { %17063 = vmatprep.subr.mxu1 %v18614_v52  ;;  %17031 = vmatmul.mubr.f32.vlgmr.msra.gmra.mxu0 %v5436_v45 }
 0xbb5   :  { %17039 = vmatpush3.msra.mxu0 %v18614_v52  ;;  %17056 = vmatmul.mubr.f32.vlgmr.msra.gmra.mxu1 %v5937_v40 }
 0xbb6   :  { %17064 = vmatpush3.msra.mxu1 %v18614_v52  ;;  %17040 = vmatprep.mubr.f32.mxu0 %v5929_v2 }
 0xbb7   :  { %17048 = vmatprep.subr.mxu0 %v18623_v13  ;;  %17065 = vmatprep.mubr.f32.mxu1 %v5925_v23 }
 0xbb8   :  { %17075 = vmatprep.subr.mxu1 %v18730_v56  ;;  %17041 = vmatmul.mubr.f32.vlgmr.msra.gmra.mxu0 %v5939_v51 }
 0xbb9   :  { %17049 = vmatpush3.msra.mxu0 %v18623_v13  ;;  %17066 = vmatmul.mubr.f32.vlgmr.msra.gmra.mxu1 %v5935_v43 }
 0xbba   :  { %17076 = vmatpush3.msra.mxu1 %v18730_v56  ;;  %17050 = vmatprep.mubr.f32.mxu0 %v5926_v57 }
 0xbbb   :  { %17058 = vmatprep.subr.mxu0 %v18628_v39  ;;  %17077 = vmatprep.subr.mxu1 %v18733_v59 }
 0xbbc   :  { %17078 = vmatpush3.msra.mxu1 %v18733_v59  ;;  %17051 = vmatmul.mubr.f32.vlgmr.msra.gmra.mxu0 %v5936_v25 }
 0xbbd   :  { %17089 = vmatprep.subr.mxu1 %v18710_v17  ;;  %17059 = vmatpush3.msra.mxu0 %v18628_v39 }
 0xbbe   :  { %17060 = vmatprep.mubr.f32.mxu0 %v5925_v23  ;;  %17068 = vmatprep.subr.mxu0 %v18710_v17 }
 0xbc0   :  { %17061 = vmatmul.mubr.f32.vlgmr.msra.gmra.mxu0 %v5935_v43 }
 0xbc1   :  { %17069 = vmatpush3.msra.mxu0 %v18710_v17 }
 0xbc2   :  { %17070 = vmatprep.subr.mxu0 %v18705_v55 }
 0xbc3   :  { %17071 = vmatpush3.msra.mxu0 %v18705_v55 }
 0xbc4   :  { %17082 = vmatprep.subr.mxu0 %v18716_v60 }
 0xc64   :  { %v17017_v52 = vpop.f32.mrf.mxu1 }
 0xc66   :  { %v18795_v13 = vpop.f32.mrf.mxu1 }
 0xc68   :  { %v17027_v56 = vpop.f32.mrf.mxu1 }
 0xc6a   :  { %v18797_v59 = vpop.f32.mrf.mxu1 }
 0xc6c   :  { %v17012_v53 = vpop.f32.mrf.mxu0  ;;  %v17037_v39 = vpop.f32.mrf.mxu1 }
 0xc6d   :  { %v5525_v46 = vadd.f32 %v17017_v52, %v17012_v53 }
 0xc6e   :  { %v18799_v1 = vpop.f32.mrf.mxu0  ;;  %v18801_v24 = vpop.f32.mrf.mxu1 }
 0xc70   :  { %v17022_v45 = vpop.f32.mrf.mxu0 }
 0xc71   :  { %v5606_v34 = vadd.f32 %v17022_v45, %v5525_v46  ;;  %v17047_v8 = vpop.f32.mrf.mxu1 }
 0xc72   :  { %v18803_v14 = vpop.f32.mrf.mxu0 }
 0xc73   :  { %v5688_v61 = vadd.f32 %v17027_v56, %v5606_v34  ;;  %v6017_v29 = vpop.f32.mrf.mxu1 }
 0xc74   :  { %v17032_v3 = vpop.f32.mrf.mxu0 }
 0xc75   :  { %v5768_v37 = vadd.f32 %v17032_v3, %v5688_v61  ;;  %v17057_v62 = vpop.f32.mrf.mxu1 }
 0xc76   :  { %v18805_v4 = vpop.f32.mrf.mxu0 }
 0xc77   :  { %v5846_v23 = vadd.f32 %v17037_v39, %v5768_v37  ;;  %v6178_v22 = vpop.f32.mrf.mxu1  ;;  %v18820_v37 = vld [vmem:[%s19778_s1 + $0x20] sm:$0xff] }
 0xc78   :  { %v17042_v43 = vpop.f32.mrf.mxu0 }
 0xc79   :  { %v18808_v30 = vadd.f32 %v5846_v23, %v18691_v58  ;;  %v6024_v57 = vadd.f32 %v17047_v8, %v17042_v43  ;;  %v17067_v2 = vpop.f32.mrf.mxu1  ;;  %v18813_v8 = vld [vmem:[%s19778_s1 + $0x28] sm:$0xff] }
 0xc7a   :  { %v5931_v35 = vpop.f32.mrf.mxu0 }
 0xc7b   :  { %v6018_v47 = vadd.f32 %v6017_v29, %v5931_v35  ;;  %v6338_v45 = vpop.f32.mrf.mxu1 }
 0xc7c   :  { %v17052_v25 = vpop.f32.mrf.mxu0 }
 0xc7d   :  { %v6105_v9 = vadd.f32 %v17052_v25, %v6024_v57 }
 0xc7e   :  { %v6097_v40 = vpop.f32.mrf.mxu0 }
 0xc7f   :  { %v6098_v54 = vadd.f32 %v6097_v40, %v6018_v47  ;;  %v6187_v0 = vadd.f32 %v17057_v62, %v6105_v9 }
 0xc80   :  { %v17062_v51 = vpop.f32.mrf.mxu0 }
 0xc81   :  { %v6267_v52 = vadd.f32 %v17062_v51, %v6187_v0  ;;  %v6179_v56 = vadd.f32 %v6178_v22, %v6098_v54 }
 0xc82   :  { %v6260_v53 = vpop.f32.mrf.mxu0 }
 0xc83   :  { %v6345_v39 = vadd.f32 %v17067_v2, %v6267_v52  ;;  %v6261_v46 = vadd.f32 %v6260_v53, %v6179_v56 }
 0xc85   :  { %v6349_v34 = vmul.f32 0.35355338, %v6345_v39  ;;  %v6339_v58 = vadd.f32 %v6338_v45, %v6261_v46 }
 0xc87   :  { %v6348_v61 = vmul.f32 0.35355338, %v6339_v58  ;;  %v6351_v29 = vadd.f32 %v18813_v8, %v6349_v34 }
 0xc89   :  { %v6355_v3 = vsel %vm1759_vm3, %v6351_v29, -inf  ;;  %v6350_v23 = vadd.f32 %v18820_v37, %v6348_v61 }
 0xc8a   :  { %6356 = vmax.xlane.f32.xlu0 %v6355_v3 }
 0xc8b   :  { %v6352_v62 = vsel %vm1759_vm3, %v6350_v23, -inf }
 0xc8c   :  { %6353 = vmax.xlane.f32.xlu1 %v6352_v62 }
 0xd13   :  { %v6357_v43 = vpop.xlane.xlu0 %6356 }
 0xd14   :  { %v6359_v35 = vsub.f32 %v6351_v29, %v6357_v43 }
 0xd15   :  { %v6354_v57 = vpop.xlane.xlu1 %6353 }
 0xd16   :  { %v6358_v22 = vsub.f32 %v6350_v23, %v6354_v57  ;;  %v6362_v25 = vmul.f32 1.442695, %v6359_v35 }
 0xd18   :  { %v6360_v47 = vmul.f32 1.442695, %v6358_v22 }
 0xd1a   :  { %17899 = vpow2.f32 %v6360_v47 }
 0xd1b   :  { %17901 = vpow2.f32 %v6362_v25 }
 0xd27   :  { %v17900_v9 = vpop.eup %17899 }
 0xd28   :  { %v6364_v40 = vsel %vm1759_vm3, %v17900_v9, 0.0  ;;  %v17902_v54 = vpop.eup %17901 }
 0xd29   :  { %6365 = vadd.xlane.f32.xlu0 %v6364_v40  ;;  %v6367_v0 = vsel %vm1759_vm3, %v17902_v54, 0.0 }
 0xd2d   :  { %6368 = vadd.xlane.f32.xlu0 %v6367_v0 }
 0xdb2   :  { %v6366_v2 = vpop.xlane.xlu0 %6365 }
 0xdb3   :  { %17903 = vrcp.f32 %v6366_v2 }
 0xdb6   :  { %v6369_v51 = vpop.xlane.xlu0 %6368 }
 0xdb7   :  { %17905 = vrcp.f32 %v6369_v51 }
 0xdc0   :  { %v17904_v52 = vpop.eup %17903 }
 0xdc1   :  { %v6372_v56 = vmul.f32 %v17904_v52, %v17900_v9 }
 0xdc3   :  { %v6375_v53 = vsel %vm1759_vm3, %v6372_v56, 0 }
 0xdc4   :  { %v17906_v39 = vpop.eup %17905  ;;  %v6447_v46 = vand.u32 4294901760, %v6375_v53 }
 0xdc5   :  { %v6373_v45 = vmul.f32 %v17906_v39, %v17902_v54 }
 0xdc6   :  { %17079 = vmatprep.mubr.f32.mxu1 %v6447_v46  ;;  %v6448_v34 = vsub.f32 %v6375_v53, %v6447_v46 }
 0xdc7   :  { %v6378_v58 = vsel %vm1759_vm3, %v6373_v45, 0 }
 0xdc8   :  { %v6457_v61 = vand.u32 4294901760, %v6378_v58  ;;  %v6449_v29 = vand.u32 4294901760, %v6448_v34 }
 0xdca   :  { %v6458_v3 = vsub.f32 %v6378_v58, %v6457_v61  ;;  %17080 = vmatmul.mubr.f32.vlgmr.msra.gmra.mxu1 %v6457_v61  ;;  %v6450_v23 = vsub.f32 %v6448_v34, %v6449_v29 }
 0xdcb   :  { %17090 = vmatpush3.msra.mxu1 %v18710_v17  ;;  %17093 = vmatprep.mubr.f32.mxu1 %v6449_v29 }
 0xdcc   :  { %17091 = vmatprep.subr.mxu1 %v18705_v55  ;;  %v6451_v62 = vand.u32 4294901760, %v6450_v23  ;;  %v6459_v43 = vand.u32 4294901760, %v6458_v3 }
 0xdcd   :  { %17092 = vmatpush3.msra.mxu1 %v18705_v55 }
 0xdce   :  { %17103 = vmatprep.subr.mxu1 %v18710_v17  ;;  %17072 = vmatprep.mubr.f32.mxu0 %v6451_v62  ;;  %v6460_v35 = vsub.f32 %v6458_v3, %v6459_v43 }
 0xdcf   :  { %17094 = vmatmul.mubr.f32.vlgmr.msra.gmra.mxu1 %v6459_v43 }
 0xdd0   :  { %17104 = vmatpush3.msra.mxu1 %v18710_v17  ;;  %17107 = vmatprep.mubr.f32.mxu1 %v6447_v46  ;;  %v6461_v57 = vand.u32 4294901760, %v6460_v35 }
 0xdd1   :  { %17105 = vmatprep.subr.mxu1 %v18705_v55 }
 0xdd2   :  { %17106 = vmatpush3.msra.mxu1 %v18705_v55  ;;  %17073 = vmatmul.mubr.f32.vlgmr.msra.gmra.mxu0 %v6461_v57  ;;  %v1260_v55 = vld [vmem:[%s19781_s4 + $0x18] sm:$0xff] }
 0xdd3   :  { %17083 = vmatpush3.msra.mxu0 %v18716_v60  ;;  %17108 = vmatmul.mubr.f32.vlgmr.msra.gmra.mxu1 %v6457_v61  ;;  %v6919_v17 = vand.u32 4294901760, %v1260_v55 }
 0xdd4   :  { %17084 = vmatprep.subr.mxu0 %v18708_v12  ;;  %17086 = vmatprep.mubr.f32.mxu0 %v6448_v34 }
 0xdd5   :  { %17085 = vmatpush3.msra.mxu0 %v18708_v12  ;;  %v7006_v60 = vsub.f32 %v1260_v55, %v6919_v17 }
 0xdd6   :  { %17096 = vmatprep.subr.mxu0 %v18721_v7  ;;  %17087 = vmatmul.mubr.f32.vlgmr.msra.gmra.mxu0 %v6458_v3 }
 0xdd7   :  { %17097 = vmatpush3.msra.mxu0 %v18721_v7  ;;  %17100 = vmatprep.mubr.f32.mxu0 %v6447_v46  ;;  %v7007_v12 = vand.u32 4294901760, %v7006_v60 }
 0xdd8   :  { %17098 = vmatprep.subr.mxu0 %v18713_v18 }
 0xdd9   :  { %17099 = vmatpush3.msra.mxu0 %v18713_v18  ;;  %v7008_v22 = vsub.f32 %v7006_v60, %v7007_v12 }
 0xdda   :  { %17101 = vmatmul.mubr.f32.vlgmr.msra.gmra.mxu0 %v6457_v61  ;;  %17110 = vmatprep.subr.mxu0 %v6919_v17 }
 0xddb   :  { %17111 = vmatpush3.msra.mxu0 %v6919_v17  ;;  %v7009_v25 = vand.u32 4294901760, %v7008_v22 }
 0xddc   :  { %17120 = vmatprep.subr.mxu0 %v7006_v60 }
 0xddd   :  { %17115 = vmatprep.subr.mxu1 %v7009_v25 }
 0xdde   :  { %17116 = vmatpush3.msra.mxu1 %v7009_v25 }
 0xddf   :  { %17125 = vmatprep.subr.mxu1 %v6919_v17 }
 0xe8a   :  { %v17081_v7 = vpop.f32.mrf.mxu1 }
 0xe8c   :  { %v6544_v47 = vpop.f32.mrf.mxu1 }
 0xe8f   :  { %v17095_v9 = vpop.f32.mrf.mxu1 }
 0xe91   :  { %v6708_v0 = vpop.f32.mrf.mxu1 }
 0xe92   :  { %v17074_v18 = vpop.f32.mrf.mxu0 }
 0xe93   :  { %v6551_v54 = vadd.f32 %v17081_v7, %v17074_v18  ;;  %v17109_v46 = vpop.f32.mrf.mxu1 }
 0xe94   :  { %v6453_v40 = vpop.f32.mrf.mxu0 }
 0xe95   :  { %v6545_v51 = vadd.f32 %v6544_v47, %v6453_v40  ;;  %v6872_v23 = vpop.f32.mrf.mxu1 }
 0xe96   :  { %v17088_v2 = vpop.f32.mrf.mxu0 }
 0xe97   :  { %v6634_v52 = vadd.f32 %v17088_v2, %v6551_v54 }
 0xe98   :  { %v6626_v56 = vpop.f32.mrf.mxu0 }
 0xe99   :  { %v6627_v53 = vadd.f32 %v6626_v56, %v6545_v51  ;;  %v6717_v39 = vadd.f32 %v17095_v9, %v6634_v52 }
 0xe9a   :  { %v17102_v45 = vpop.f32.mrf.mxu0 }
 0xe9b   :  { %v6800_v34 = vadd.f32 %v17102_v45, %v6717_v39  ;;  %v6709_v58 = vadd.f32 %v6708_v0, %v6627_v53  ;;  %v3492_v0 = vadd.f32 %v18667_v44, %v18671_v48 }
 0xe9c   :  { %v6793_v61 = vpop.f32.mrf.mxu0 }
 0xe9d   :  { %v6879_v29 = vadd.f32 %v17109_v46, %v6800_v34  ;;  %v6794_v3 = vadd.f32 %v6793_v61, %v6709_v58  ;;  %v3572_v2 = vadd.f32 %v18675_v6, %v3492_v0  ;;  %v7405_v0 = vld [vmem:[%s19782_s5 + $0x10] sm:$0xff] }
 0xe9f   :  { %v6886_v62 = vsel %vm1261_vm2, %v6879_v29, 0  ;;  %v6873_v43 = vadd.f32 %v6872_v23, %v6794_v3  ;;  %v3653_v51 = vadd.f32 %v18669_v63, %v3572_v2  ;;  %v7404_v2 = vld [vmem:[%s19782_s5 + $0x8] sm:$0xff] }
 0xea0   :  { %v6964_v35 = vand.u32 4294901760, %v6886_v62 }
 0xea1   :  { %v6883_v57 = vsel %vm1261_vm2, %v6873_v43, 0 }
 0xea2   :  { %v6965_v55 = vsub.f32 %v6886_v62, %v6964_v35  ;;  %v6954_v22 = vand.u32 4294901760, %v6883_v57 }
 0xea4   :  { %v6955_v25 = vsub.f32 %v6883_v57, %v6954_v22  ;;  %17117 = vmatprep.mubr.f32.mxu1 %v6954_v22  ;;  %v6966_v7 = vand.u32 4294901760, %v6965_v55 }
 0xea5   :  { %17118 = vmatmul.mubr.f32.vlgmr.msra.gmra.mxu1 %v6964_v35 }
 0xea6   :  { %17126 = vmatpush3.msra.mxu1 %v6919_v17  ;;  %v6956_v47 = vand.u32 4294901760, %v6955_v25  ;;  %v6967_v9 = vsub.f32 %v6965_v55, %v6966_v7 }
 0xea7   :  { %17135 = vmatprep.subr.mxu1 %v6919_v17 }
 0xea8   :  { %17127 = vmatprep.mubr.f32.mxu1 %v6956_v47  ;;  %v6957_v18 = vsub.f32 %v6955_v25, %v6956_v47  ;;  %v6968_v54 = vand.u32 4294901760, %v6967_v9 }
 0xea9   :  { %17128 = vmatmul.mubr.f32.vlgmr.msra.gmra.mxu1 %v6966_v7 }
 0xeaa   :  { %17137 = vmatprep.mubr.f32.mxu1 %v6954_v22  ;;  %v6958_v40 = vand.u32 4294901760, %v6957_v18  ;;  %17136 = vmatpush3.msra.mxu1 %v6919_v17  ;;  %v3735_v17 = vadd.f32 %v18679_v5, %v3653_v51 }
 0xeac   :  { %17112 = vmatprep.mubr.f32.mxu0 %v6958_v40  ;;  %v3813_v52 = vadd.f32 %v18673_v49, %v3735_v17  ;;  %v18893_v17 = vand.u32 4294901760, %v7405_v0 }
 0xead   :  { %17113 = vmatmul.mubr.f32.vlgmr.msra.gmra.mxu0 %v6968_v54  ;;  %17138 = vmatmul.mubr.f32.vlgmr.msra.gmra.mxu1 %v6964_v35  ;;  %v7406_v54 = vld [vmem:[%s19782_s5 + $0x18] sm:$0xff] }
 0xeae   :  { %17122 = vmatprep.mubr.f32.mxu0 %v6955_v25  ;;  %17121 = vmatpush3.msra.mxu0 %v7006_v60  ;;  %v3901_v56 = vadd.f32 %v18683_v50, %v3813_v52  ;;  %v18891_v51 = vand.u32 4294901760, %v7406_v54  ;;  %v18895_v52 = vand.u32 4294901760, %v7404_v2 }
 0xeaf   :  { %17130 = vmatprep.subr.mxu0 %v7007_v12 }
 0xeb0   :  { %v3987_v60 = vadd.f32 %v18677_v11, %v3901_v56  ;;  %v7403_v56 = vld [vmem:[%s19782_s5] sm:$0xff] }
 0xeb1   :  { %17123 = vmatmul.mubr.f32.vlgmr.msra.gmra.mxu0 %v6965_v55 }
 0xeb2   :  { %17132 = vmatprep.mubr.f32.mxu0 %v6954_v22  ;;  %17131 = vmatpush3.msra.mxu0 %v7007_v12  ;;  %v5519_v12 = vadd.f32 %v18795_v13, %v18799_v1  ;;  %v4067_v44 = vadd.f32 %v18687_v42, %v3987_v60  ;;  %v18903_v60 = vsub.f32 %v7406_v54, %v18891_v51 }
 0xeb3   :  { %17140 = vmatprep.subr.mxu0 %v18891_v51 }
 0xeb4   :  { %v5599_v46 = vadd.f32 %v18803_v14, %v5519_v12  ;;  %v4148_v49 = vadd.f32 %v18681_v19, %v4067_v44  ;;  %v18906_v12 = vsub.f32 %v7405_v0, %v18893_v17  ;;  %v18917_v44 = vand.u32 4294901760, %v18903_v60 }
 0xeb5   :  { %17133 = vmatmul.mubr.f32.vlgmr.msra.gmra.mxu0 %v6964_v35 }
 0xeb6   :  { %v5680_v63 = vadd.f32 %v18797_v59, %v5599_v46  ;;  %v4230_v1 = vadd.f32 %v18689_v41, %v4148_v49  ;;  %v17957_v41 = vld [vmem:[%s19777_s0 + $0x8] sm:$0xff]  ;;  %17141 = vmatpush3.msra.mxu0 %v18891_v51 }
 0xeb7   :  { %17142 = vmatprep.subr.mxu0 %v18893_v17 }
 0xeb8   :  { %v5762_v11 = vadd.f32 %v18805_v4, %v5680_v63  ;;  %v4308_v19 = vadd.f32 %v18685_v28, %v4230_v1  ;;  %17143 = vmatpush3.msra.mxu0 %v18893_v17 }
 0xeb9   :  { %17144 = vmatprep.subr.mxu0 %v18895_v52 }
 0xeba   :  { %v5840_v23 = vadd.f32 %v18801_v24, %v5762_v11  ;;  %v17958_v24 = vld [vmem:[%s19777_s0] sm:$0xff]  ;;  %17145 = vmatpush3.msra.mxu0 %v18895_v52 }
 0xebc   :  { %v5849_v4 = vadd.f32 %v5840_v23, %v4308_v19 }
 0xf65   :  { %v17119_v53 = vpop.f32.mrf.mxu1 }
 0xf67   :  { %v7046_v39 = vpop.f32.mrf.mxu1 }
 0xf69   :  { %v17129_v48 = vpop.f32.mrf.mxu1 }
 0xf6b   :  { %v7207_v50 = vpop.f32.mrf.mxu1 }
 0xf6d   :  { %v17114_v6 = vpop.f32.mrf.mxu0  ;;  %v17139_v42 = vpop.f32.mrf.mxu1 }
 0xf6e   :  { %v7053_v45 = vadd.f32 %v17119_v53, %v17114_v6  ;;  %v18900_v53 = vand.u32 4294901760, %v7403_v56 }
 0xf6f   :  { %v6960_v5 = vpop.f32.mrf.mxu0  ;;  %v7367_v55 = vpop.f32.mrf.mxu1 }
 0xf70   :  { %v7047_v58 = vadd.f32 %v7046_v39, %v6960_v5  ;;  %v18909_v39 = vsub.f32 %v7404_v2, %v18895_v52  ;;  %v18913_v46 = vsub.f32 %v7403_v56, %v18900_v53  ;;  %v7534_v5 = vsub.f32 %v18903_v60, %v18917_v44  ;;  %17146 = vmatprep.subr.mxu0 %v18900_v53 }
 0xf71   :  { %v17124_v34 = vpop.f32.mrf.mxu0  ;;  %17147 = vmatpush3.msra.mxu0 %v18900_v53 }
 0xf72   :  { %v7134_v61 = vadd.f32 %v17124_v34, %v7053_v45  ;;  %v18923_v6 = vand.u32 4294901760, %v18909_v39  ;;  %v18927_v63 = vand.u32 4294901760, %v18913_v46  ;;  %17162 = vmatprep.subr.mxu0 %v18903_v60 }
 0xf73   :  { %v7126_v13 = vpop.f32.mrf.mxu0 }
 0xf74   :  { %v7127_v14 = vadd.f32 %v7126_v13, %v7047_v58  ;;  %v7216_v29 = vadd.f32 %v17129_v48, %v7134_v61  ;;  %v18920_v48 = vand.u32 4294901760, %v18906_v12  ;;  %v7548_v45 = vsub.f32 %v18909_v39, %v18923_v6 }
 0xf75   :  { %v17134_v3 = vpop.f32.mrf.mxu0  ;;  %v7555_v11 = vsub.f32 %v18913_v46, %v18927_v63 }
 0xf76   :  { %v7296_v59 = vadd.f32 %v17134_v3, %v7216_v29  ;;  %v7208_v62 = vadd.f32 %v7207_v50, %v7127_v14  ;;  %v7541_v49 = vsub.f32 %v18906_v12, %v18920_v48  ;;  %v7535_v50 = vand.u32 4294901760, %v7534_v5 }
 0xf77   :  { %v7289_v43 = vpop.f32.mrf.mxu0  ;;  %v7549_v58 = vand.u32 4294901760, %v7548_v45  ;;  %v7556_v61 = vand.u32 4294901760, %v7555_v11 }
 0xf78   :  { %v7374_v35 = vadd.f32 %v17139_v42, %v7296_v59  ;;  %v7290_v57 = vadd.f32 %v7289_v43, %v7208_v62  ;;  %v7542_v34 = vand.u32 4294901760, %v7541_v49  ;;  %17151 = vmatprep.subr.mxu1 %v7535_v50  ;;  %v15805_v59 = vld [vmem:[%s19779_s2 + $0x8] ss:$0 sm:$0xff] }
 0xf79   :  { %17152 = vmatpush3.msra.mxu1 %v7535_v50 }
 0xf7a   :  { %v7378_v22 = vadd.f32 %v7374_v35, %v18808_v30  ;;  %v7368_v25 = vadd.f32 %v7367_v55, %v7290_v57  ;;  %17153 = vmatprep.subr.mxu1 %v7542_v34 }
 0xf7b   :  { %17154 = vmatpush3.msra.mxu1 %v7542_v34 }
 0xf7c   :  { %v18869_v7 = vadd.f32 %v17957_v41, %v7378_v22  ;;  %v7377_v47 = vadd.f32 %v7368_v25, %v5849_v4  ;;  %17155 = vmatprep.subr.mxu1 %v7549_v58 }
 0xf7d   :  { %17156 = vmatpush3.msra.mxu1 %v7549_v58 }
 0xf7e   :  { %v18874_v9 = vadd.f32 %v17958_v24, %v7377_v47  ;;  %v7382_v28 = vmul.f32 %v18869_v7, %v18869_v7  ;;  %17157 = vmatprep.subr.mxu1 %v7556_v61 }
 0xf7f   :  { %17158 = vmatpush3.msra.mxu1 %v7556_v61 }
 0xf80   :  { %v7386_v18 = vsel %vm60_vm0, %v7382_v28, 0.0  ;;  %v7381_v30 = vmul.f32 %v18874_v9, %v18874_v9  ;;  %17173 = vmatprep.subr.mxu1 %v18891_v51 }
 0xf81   :  { %7387 = vadd.xlane.f32.xlu0 %v7386_v18 }
 0xf82   :  { %v7383_v40 = vsel %vm60_vm0, %v7381_v30, 0.0 }
 0xf83   :  { %7384 = vadd.xlane.f32.xlu1 %v7383_v40 }
0x100a   :  { %v7388_v13 = vpop.xlane.xlu0 %7387 }
0x100b   :  { %v7390_v1 = vmul.f32 0.03125, %v7388_v13 }
0x100c   :  { %v7385_v14 = vpop.xlane.xlu1 %7384 }
0x100d   :  { %v7392_v29 = vadd.f32 1e-06, %v7390_v1  ;;  %v7389_v42 = vmul.f32 0.03125, %v7385_v14 }
0x100f   :  { %17907 = vrsqrt.f32 %v7392_v29  ;;  %v7391_v3 = vadd.f32 1e-06, %v7389_v42 }
0x1011   :  { %17909 = vrsqrt.f32 %v7391_v3 }
0x101c   :  { %v17908_v23 = vpop.eup %17907 }
0x101d   :  { %v7396_v62 = vmul.f32 %v17908_v23, %v18869_v7 }
0x101e   :  { %v17910_v43 = vpop.eup %17909 }
0x101f   :  { %v7395_v19 = vmul.f32 %v17910_v43, %v18874_v9  ;;  %v7402_v35 = vmul.f32 %v15805_v59, %v7396_v62 }
0x1021   :  { %v7401_v57 = vmul.f32 %v15805_v59, %v7395_v19  ;;  %v7415_v55 = vsel %vm60_vm0, %v7402_v35, 0 }
0x1022   :  { %v7496_v4 = vand.u32 4294901760, %v7415_v55 }
0x1023   :  { %v7412_v22 = vsel %vm60_vm0, %v7401_v57, 0 }
0x1024   :  { %v7486_v25 = vand.u32 4294901760, %v7412_v22  ;;  %v7497_v41 = vsub.f32 %v7415_v55, %v7496_v4 }
0x1026   :  { %17159 = vmatprep.mubr.f32.mxu1 %v7486_v25  ;;  %v7487_v47 = vsub.f32 %v7412_v22, %v7486_v25  ;;  %v7498_v24 = vand.u32 4294901760, %v7497_v41 }
0x1027   :  { %17160 = vmatmul.mubr.f32.vlgmr.msra.gmra.mxu1 %v7496_v4 }
0x1028   :  { %17174 = vmatpush3.msra.mxu1 %v18891_v51  ;;  %v7488_v28 = vand.u32 4294901760, %v7487_v47  ;;  %v7499_v30 = vsub.f32 %v7497_v41, %v7498_v24 }
0x1029   :  { %17175 = vmatprep.subr.mxu1 %v18893_v17 }
0x102a   :  { %17176 = vmatpush3.msra.mxu1 %v18893_v17  ;;  %17181 = vmatprep.mubr.f32.mxu1 %v7488_v28  ;;  %v7489_v18 = vsub.f32 %v7487_v47, %v7488_v28  ;;  %v7500_v54 = vand.u32 4294901760, %v7499_v30 }
0x102b   :  { %17177 = vmatprep.subr.mxu1 %v18895_v52 }
0x102c   :  { %17178 = vmatpush3.msra.mxu1 %v18895_v52  ;;  %v7490_v40 = vand.u32 4294901760, %v7489_v18 }
0x102d   :  { %17179 = vmatprep.subr.mxu1 %v18900_v53 }
0x102e   :  { %17180 = vmatpush3.msra.mxu1 %v18900_v53  ;;  %17148 = vmatprep.mubr.f32.mxu0 %v7490_v40 }
0x102f   :  { %17182 = vmatmul.mubr.f32.vlgmr.msra.gmra.mxu1 %v7498_v24  ;;  %17195 = vmatprep.subr.mxu1 %v18891_v51 }
0x1030   :  { %17149 = vmatmul.mubr.f32.vlgmr.msra.gmra.mxu0 %v7500_v54  ;;  %17196 = vmatpush3.msra.mxu1 %v18891_v51 }
0x1031   :  { %17163 = vmatpush3.msra.mxu0 %v18903_v60  ;;  %17203 = vmatprep.mubr.f32.mxu1 %v7486_v25 }
0x1032   :  { %17164 = vmatprep.subr.mxu0 %v18906_v12  ;;  %17170 = vmatprep.mubr.f32.mxu0 %v7487_v47 }
0x1033   :  { %17197 = vmatprep.subr.mxu1 %v18893_v17  ;;  %17165 = vmatpush3.msra.mxu0 %v18906_v12 }
0x1034   :  { %17198 = vmatpush3.msra.mxu1 %v18893_v17  ;;  %17166 = vmatprep.subr.mxu0 %v18909_v39 }
0x1035   :  { %17199 = vmatprep.subr.mxu1 %v18895_v52  ;;  %17167 = vmatpush3.msra.mxu0 %v18909_v39 }
0x1036   :  { %17200 = vmatpush3.msra.mxu1 %v18895_v52  ;;  %17168 = vmatprep.subr.mxu0 %v18913_v46 }
0x1037   :  { %17201 = vmatprep.subr.mxu1 %v18900_v53  ;;  %17169 = vmatpush3.msra.mxu0 %v18913_v46 }
0x1038   :  { %17202 = vmatpush3.msra.mxu1 %v18900_v53  ;;  %17171 = vmatmul.mubr.f32.vlgmr.msra.gmra.mxu0 %v7497_v41 }
0x1039   :  { %17184 = vmatprep.subr.mxu0 %v18917_v44  ;;  %17204 = vmatmul.mubr.f32.vlgmr.msra.gmra.mxu1 %v7496_v4 }
0x103a   :  { %17185 = vmatpush3.msra.mxu0 %v18917_v44  ;;  %17192 = vmatprep.mubr.f32.mxu0 %v7486_v25 }
0x103b   :  { %17186 = vmatprep.subr.mxu0 %v18920_v48  ;;  %17217 = vmatprep.subr.mxu1 %v18270_v32 }
0x103c   :  { %17187 = vmatpush3.msra.mxu0 %v18920_v48  ;;  %17218 = vmatpush3.msra.mxu1 %v18270_v32 }
0x103d   :  { %17188 = vmatprep.subr.mxu0 %v18923_v6  ;;  %17219 = vmatprep.subr.mxu1 %v18273_v33 }
0x103e   :  { %17189 = vmatpush3.msra.mxu0 %v18923_v6  ;;  %17220 = vmatpush3.msra.mxu1 %v18273_v33  ;;  %v15806_v33 = vld [vmem:[%s19779_s2 + $0x20] ss:$0 sm:$0xff] }
0x103f   :  { %17190 = vmatprep.subr.mxu0 %v18927_v63  ;;  %17221 = vmatprep.subr.mxu1 %v18284_v36 }
0x1040   :  { %17191 = vmatpush3.msra.mxu0 %v18927_v63  ;;  %17222 = vmatpush3.msra.mxu1 %v18284_v36 }
0x1041   :  { %17193 = vmatmul.mubr.f32.vlgmr.msra.gmra.mxu0 %v7496_v4  ;;  %17223 = vmatprep.subr.mxu1 %v18290_v38 }
0x1042   :  { %17224 = vmatpush3.msra.mxu1 %v18290_v38  ;;  %17206 = vmatprep.subr.mxu0 %v18214_v10 }
0x1043   :  { %17239 = vmatprep.subr.mxu1 %v18214_v10  ;;  %17207 = vmatpush3.msra.mxu0 %v18214_v10 }
0x1044   :  { %17208 = vmatprep.subr.mxu0 %v18225_v15 }
0x1045   :  { %17209 = vmatpush3.msra.mxu0 %v18225_v15 }
0x1046   :  { %17210 = vmatprep.subr.mxu0 %v18239_v21 }
0x1047   :  { %17211 = vmatpush3.msra.mxu0 %v18239_v21 }
0x1048   :  { %17212 = vmatprep.subr.mxu0 %v18255_v27 }
0x1049   :  { %17213 = vmatpush3.msra.mxu0 %v18255_v27 }
0x104a   :  { %17228 = vmatprep.subr.mxu0 %v18228_v16 }
0x10e7   :  { %v17161_v36 = vpop.f32.mrf.mxu1 }
0x10e9   :  { %v7593_v17 = vpop.f32.mrf.mxu1 }
0x10ef   :  { %v17183_v56 = vpop.f32.mrf.mxu1 }
0x10f0   :  { %v17150_v32 = vpop.f32.mrf.mxu0 }
0x10f1   :  { %v7503_v0 = vadd.f32 %v17150_v32, %v15806_v33  ;;  %v7763_v46 = vpop.f32.mrf.mxu1 }
0x10f2   :  { %v7492_v38 = vpop.f32.mrf.mxu0 }
0x10f3   :  { %v7493_v2 = vadd.f32 %v15806_v33, %v7492_v38  ;;  %v7600_v52 = vadd.f32 %v17161_v36, %v7503_v0 }
0x10f5   :  { %v7594_v12 = vadd.f32 %v7593_v17, %v7493_v2 }
0x10f8   :  { %v17172_v51 = vpop.f32.mrf.mxu0 }
0x10f9   :  { %v7687_v60 = vadd.f32 %v17172_v51, %v7600_v52  ;;  %v17205_v48 = vpop.f32.mrf.mxu1  ;;  %v17959_v52 = vld [vmem:[%s19779_s2 + $0x30] sm:$0xff] }
0x10fa   :  { %v7679_v53 = vpop.f32.mrf.mxu0 }
0x10fb   :  { %v7680_v39 = vadd.f32 %v7679_v53, %v7594_v12  ;;  %v7772_v44 = vadd.f32 %v17183_v56, %v7687_v60  ;;  %v7935_v34 = vpop.f32.mrf.mxu1  ;;  %v17960_v53 = vld [vmem:[%s19779_s2 + $0x40] sm:$0xff] }
0x10fd   :  { %v7764_v5 = vadd.f32 %v7763_v46, %v7680_v39  ;;  %v17961_v39 = vld [vmem:[%s19779_s2 + $0x28] sm:$0xff] }
0x1101   :  { %v17194_v6 = vpop.f32.mrf.mxu0 }
0x1102   :  { %v7861_v63 = vadd.f32 %v17194_v6, %v7772_v44 }
0x1103   :  { %v7854_v49 = vpop.f32.mrf.mxu0 }
0x1104   :  { %v19002_v45 = vadd.f32 %v17205_v48, %v7861_v63  ;;  %v7855_v50 = vadd.f32 %v7854_v49, %v7764_v5  ;;  %v17962_v48 = vld [vmem:[%s19779_s2 + $0x38] sm:$0xff] }
0x1106   :  { %v7951_v11 = vsel %vm60_vm0, %v19002_v45, 0  ;;  %v19006_v58 = vadd.f32 %v7935_v34, %v7855_v50  ;;  %v7946_v56 = vmul.f32 %v17959_v52, %v19002_v45 }
0x1107   :  { %v8032_v61 = vand.u32 4294901760, %v7951_v11 }
0x1108   :  { %v7948_v13 = vsel %vm60_vm0, %v19006_v58, 0  ;;  %v7945_v46 = vmul.f32 %v17961_v39, %v19006_v58  ;;  %v19108_v39 = vld [vmem:[%s19778_s1 + $0x10] sm:$0xff] }
0x1109   :  { %v8033_v1 = vsub.f32 %v7951_v11, %v8032_v61  ;;  %v8022_v14 = vand.u32 4294901760, %v7948_v13 }
0x110b   :  { %v8023_v29 = vsub.f32 %v7948_v13, %v8022_v14  ;;  %17225 = vmatprep.mubr.f32.mxu1 %v8022_v14  ;;  %v8034_v42 = vand.u32 4294901760, %v8033_v1 }
0x110c   :  { %17226 = vmatmul.mubr.f32.vlgmr.msra.gmra.mxu1 %v8032_v61 }
0x110d   :  { %17240 = vmatpush3.msra.mxu1 %v18214_v10  ;;  %v8024_v3 = vand.u32 4294901760, %v8023_v29  ;;  %v8035_v59 = vsub.f32 %v8033_v1, %v8034_v42 }
0x110e   :  { %17241 = vmatprep.subr.mxu1 %v18225_v15 }
0x110f   :  { %17242 = vmatpush3.msra.mxu1 %v18225_v15  ;;  %17247 = vmatprep.mubr.f32.mxu1 %v8024_v3  ;;  %v8025_v23 = vsub.f32 %v8023_v29, %v8024_v3  ;;  %v8036_v43 = vand.u32 4294901760, %v8035_v59 }
0x1110   :  { %17243 = vmatprep.subr.mxu1 %v18239_v21 }
0x1111   :  { %17244 = vmatpush3.msra.mxu1 %v18239_v21  ;;  %v8026_v62 = vand.u32 4294901760, %v8025_v23 }
0x1112   :  { %17245 = vmatprep.subr.mxu1 %v18255_v27 }
0x1113   :  { %17246 = vmatpush3.msra.mxu1 %v18255_v27  ;;  %17214 = vmatprep.mubr.f32.mxu0 %v8026_v62 }
0x1114   :  { %17248 = vmatmul.mubr.f32.vlgmr.msra.gmra.mxu1 %v8034_v42  ;;  %17261 = vmatprep.subr.mxu1 %v18214_v10 }
0x1115   :  { %17215 = vmatmul.mubr.f32.vlgmr.msra.gmra.mxu0 %v8036_v43  ;;  %17262 = vmatpush3.msra.mxu1 %v18214_v10  ;;  %v19799_v10 = vld [vmem:[#allocation5_spill] sm:$0xff] }
0x1116   :  { %17229 = vmatpush3.msra.mxu0 %v18228_v16  ;;  %17269 = vmatprep.mubr.f32.mxu1 %v8022_v14  ;;  %v19801_v16 = vld [vmem:[#allocation7_spill] sm:$0xff] }
0x1117   :  { %17230 = vmatprep.subr.mxu0 %v18237_v20  ;;  %17236 = vmatprep.mubr.f32.mxu0 %v8023_v29 }
0x1118   :  { %17263 = vmatprep.subr.mxu1 %v18225_v15  ;;  %17231 = vmatpush3.msra.mxu0 %v18237_v20  ;;  %v19802_v20 = vld [vmem:[#allocation8_spill] sm:$0xff] }
0x1119   :  { %17264 = vmatpush3.msra.mxu1 %v18225_v15  ;;  %17232 = vmatprep.subr.mxu0 %v18253_v26  ;;  %v19800_v15 = vld [vmem:[#allocation6_spill] sm:$0xff] }
0x111a   :  { %17265 = vmatprep.subr.mxu1 %v18239_v21  ;;  %17233 = vmatpush3.msra.mxu0 %v18253_v26 }
0x111b   :  { %17266 = vmatpush3.msra.mxu1 %v18239_v21  ;;  %17234 = vmatprep.subr.mxu0 %v18267_v31  ;;  %v35_v21 = vld [vmem:[%s19778_s1] sm:$0xff] }
0x111c   :  { %17267 = vmatprep.subr.mxu1 %v18255_v27  ;;  %17235 = vmatpush3.msra.mxu0 %v18267_v31  ;;  %v19043_v26 = vand.u32 4294901760, %v35_v21 }
0x111d   :  { %17268 = vmatpush3.msra.mxu1 %v18255_v27  ;;  %17237 = vmatmul.mubr.f32.vlgmr.msra.gmra.mxu0 %v8033_v1 }
0x111e   :  { %17250 = vmatprep.subr.mxu0 %v19799_v10  ;;  %17270 = vmatmul.mubr.f32.vlgmr.msra.gmra.mxu1 %v8032_v61  ;;  %v19046_v27 = vsub.f32 %v35_v21, %v19043_v26 }
0x111f   :  { %17251 = vmatpush3.msra.mxu0 %v19799_v10  ;;  %17258 = vmatprep.mubr.f32.mxu0 %v8022_v14 }
0x1120   :  { %17252 = vmatprep.subr.mxu0 %v19800_v15  ;;  %v19051_v31 = vand.u32 4294901760, %v19046_v27 }
0x1121   :  { %17253 = vmatpush3.msra.mxu0 %v19800_v15 }
0x1122   :  { %17254 = vmatprep.subr.mxu0 %v19801_v16  ;;  %v8615_v19 = vsub.f32 %v19046_v27, %v19051_v31 }
0x1123   :  { %17255 = vmatpush3.msra.mxu0 %v19801_v16 }
0x1124   :  { %17256 = vmatprep.subr.mxu0 %v19802_v20  ;;  %v19056_v35 = vand.u32 4294901760, %v8615_v19 }
0x1125   :  { %17257 = vmatpush3.msra.mxu0 %v19802_v20 }
0x1126   :  { %17259 = vmatmul.mubr.f32.vlgmr.msra.gmra.mxu0 %v8032_v61  ;;  %17272 = vmatprep.subr.mxu0 %v19043_v26 }
0x1127   :  { %17273 = vmatpush3.msra.mxu0 %v19043_v26  ;;  %17277 = vmatprep.subr.mxu1 %v19056_v35 }
0x1128   :  { %17282 = vmatprep.subr.mxu0 %v19046_v27  ;;  %17278 = vmatpush3.msra.mxu1 %v19056_v35 }
0x1129   :  { %17287 = vmatprep.subr.mxu1 %v19043_v26 }
0x11cc   :  { %v17227_v55 = vpop.f32.mrf.mxu1 }
0x11ce   :  { %v8129_v25 = vpop.f32.mrf.mxu1 }
0x11d4   :  { %v17249_v47 = vpop.f32.mrf.mxu1 }
0x11d5   :  { %v17216_v57 = vpop.f32.mrf.mxu0 }
0x11d6   :  { %v8136_v41 = vadd.f32 %v17227_v55, %v17216_v57  ;;  %v8299_v40 = vpop.f32.mrf.mxu1 }
0x11d7   :  { %v8028_v4 = vpop.f32.mrf.mxu0 }
0x11d8   :  { %v8130_v28 = vadd.f32 %v8129_v25, %v8028_v4 }
0x11dd   :  { %v17238_v22 = vpop.f32.mrf.mxu0 }
0x11de   :  { %v8223_v18 = vadd.f32 %v17238_v22, %v8136_v41  ;;  %v17271_v32 = vpop.f32.mrf.mxu1 }
0x11df   :  { %v8215_v24 = vpop.f32.mrf.mxu0 }
0x11e0   :  { %v8216_v30 = vadd.f32 %v8215_v24, %v8130_v28  ;;  %v8308_v54 = vadd.f32 %v17249_v47, %v8223_v18  ;;  %v8471_v17 = vpop.f32.mrf.mxu1 }
0x11e2   :  { %v8300_v38 = vadd.f32 %v8299_v40, %v8216_v30 }
0x11e6   :  { %v17260_v33 = vpop.f32.mrf.mxu0 }
0x11e7   :  { %v8397_v36 = vadd.f32 %v17260_v33, %v8308_v54 }
0x11e8   :  { %v8390_v0 = vpop.f32.mrf.mxu0 }
0x11e9   :  { %v8478_v2 = vadd.f32 %v17271_v32, %v8397_v36  ;;  %v8391_v51 = vadd.f32 %v8390_v0, %v8300_v38 }
0x11eb   :  { %v8482_v60 = vmul.f32 %v17960_v53, %v8478_v2  ;;  %v8472_v12 = vadd.f32 %v8471_v17, %v8391_v51 }
0x11ed   :  { %v19072_v44 = vadd.f32 %v8482_v60, %v7946_v56  ;;  %v8481_v6 = vmul.f32 %v17962_v48, %v8472_v12  ;;  %v19115_v48 = vand.u32 4294901760, %v19108_v39 }
0x11ef   :  { %v19077_v63 = vadd.f32 %v8481_v6, %v7945_v46  ;;  %v8493_v5 = vsel %vm1261_vm2, %v19072_v44, 0 }
0x11f0   :  { %v8571_v49 = vand.u32 4294901760, %v8493_v5 }
0x11f1   :  { %v8490_v45 = vsel %vm1261_vm2, %v19077_v63, 0 }
0x11f2   :  { %v8561_v50 = vand.u32 4294901760, %v8490_v45  ;;  %v8572_v34 = vsub.f32 %v8493_v5, %v8571_v49  ;;  %v19126_v5 = vsub.f32 %v19108_v39, %v19115_v48 }
0x11f4   :  { %17279 = vmatprep.mubr.f32.mxu1 %v8561_v50  ;;  %v8562_v11 = vsub.f32 %v8490_v45, %v8561_v50  ;;  %v8573_v58 = vand.u32 4294901760, %v8572_v34  ;;  %v19133_v45 = vand.u32 4294901760, %v19126_v5 }
0x11f5   :  { %17280 = vmatmul.mubr.f32.vlgmr.msra.gmra.mxu1 %v8571_v49 }
0x11f6   :  { %17288 = vmatpush3.msra.mxu1 %v19043_v26  ;;  %v8563_v61 = vand.u32 4294901760, %v8562_v11  ;;  %v8574_v13 = vsub.f32 %v8572_v34, %v8573_v58 }
0x11f7   :  { %17297 = vmatprep.subr.mxu1 %v19043_v26 }
0x11f8   :  { %17289 = vmatprep.mubr.f32.mxu1 %v8563_v61  ;;  %v8564_v1 = vsub.f32 %v8562_v11, %v8563_v61  ;;  %v8575_v29 = vand.u32 4294901760, %v8574_v13 }
0x11f9   :  { %17290 = vmatmul.mubr.f32.vlgmr.msra.gmra.mxu1 %v8573_v58 }
0x11fa   :  { %17299 = vmatprep.mubr.f32.mxu1 %v8561_v50  ;;  %v8565_v14 = vand.u32 4294901760, %v8564_v1  ;;  %17298 = vmatpush3.msra.mxu1 %v19043_v26 }
0x11fc   :  { %17274 = vmatprep.mubr.f32.mxu0 %v8565_v14 }
0x11fd   :  { %17275 = vmatmul.mubr.f32.vlgmr.msra.gmra.mxu0 %v8575_v29  ;;  %17300 = vmatmul.mubr.f32.vlgmr.msra.gmra.mxu1 %v8571_v49 }
0x11fe   :  { %17284 = vmatprep.mubr.f32.mxu0 %v8562_v11  ;;  %17283 = vmatpush3.msra.mxu0 %v19046_v27 }
0x11ff   :  { %17292 = vmatprep.subr.mxu0 %v19051_v31 }
0x1201   :  { %17285 = vmatmul.mubr.f32.vlgmr.msra.gmra.mxu0 %v8572_v34  ;;  %v9142_v34 = vsub.f32 %v19126_v5, %v19133_v45 }
0x1202   :  { %17294 = vmatprep.mubr.f32.mxu0 %v8561_v50  ;;  %17293 = vmatpush3.msra.mxu0 %v19051_v31 }
0x1203   :  { %v19141_v11 = vand.u32 4294901760, %v9142_v34 }
0x1205   :  { %17295 = vmatmul.mubr.f32.vlgmr.msra.gmra.mxu0 %v8571_v49 }
0x12b5   :  { %v17281_v42 = vpop.f32.mrf.mxu1 }
0x12b7   :  { %v8653_v3 = vpop.f32.mrf.mxu1 }
0x12b9   :  { %v17291_v23 = vpop.f32.mrf.mxu1 }
0x12bb   :  { %v8814_v10 = vpop.f32.mrf.mxu1 }
0x12bd   :  { %v17276_v59 = vpop.f32.mrf.mxu0  ;;  %v17301_v55 = vpop.f32.mrf.mxu1 }
0x12be   :  { %v8660_v43 = vadd.f32 %v17281_v42, %v17276_v59 }
0x12bf   :  { %v8567_v62 = vpop.f32.mrf.mxu0  ;;  %v8974_v28 = vpop.f32.mrf.mxu1 }
0x12c0   :  { %v8654_v16 = vadd.f32 %v8653_v3, %v8567_v62 }
0x12c1   :  { %v17286_v15 = vpop.f32.mrf.mxu0 }
0x12c2   :  { %v8741_v20 = vadd.f32 %v17286_v15, %v8660_v43 }
0x12c3   :  { %v8733_v21 = vpop.f32.mrf.mxu0 }
0x12c4   :  { %v8734_v19 = vadd.f32 %v8733_v21, %v8654_v16  ;;  %v8823_v57 = vadd.f32 %v17291_v23, %v8741_v20 }
0x12c5   :  { %v17296_v4 = vpop.f32.mrf.mxu0 }
0x12c6   :  { %v8903_v22 = vadd.f32 %v17296_v4, %v8823_v57  ;;  %v8815_v25 = vadd.f32 %v8814_v10, %v8734_v19 }
0x12c7   :  { %v8896_v41 = vpop.f32.mrf.mxu0 }
0x12c8   :  { %v8981_v47 = vadd.f32 %v17301_v55, %v8903_v22  ;;  %v8897_v24 = vadd.f32 %v8896_v41, %v8815_v25 }
0x12ca   :  { %v8985_v18 = vmul.f32 0.35355338, %v8981_v47  ;;  %v8975_v30 = vadd.f32 %v8974_v28, %v8897_v24 }
0x12cc   :  { %v8984_v40 = vmul.f32 0.35355338, %v8975_v30  ;;  %v8987_v54 = vadd.f32 %v18813_v8, %v8985_v18 }
0x12ce   :  { %v8991_v32 = vsel %vm1759_vm3, %v8987_v54, -inf  ;;  %v8986_v33 = vadd.f32 %v18820_v37, %v8984_v40  ;;  %v19098_v37 = vld [vmem:[%s19778_s1 + $0x18] sm:$0xff] }
0x12cf   :  { %8992 = vmax.xlane.f32.xlu0 %v8991_v32  ;;  %v19101_v12 = vand.u32 4294901760, %v19098_v37 }
0x12d0   :  { %v8988_v36 = vsel %vm1759_vm3, %v8986_v33, -inf }
0x12d1   :  { %8989 = vmax.xlane.f32.xlu1 %v8988_v36  ;;  %v19112_v46 = vsub.f32 %v19098_v37, %v19101_v12  ;;  %17302 = vmatprep.subr.mxu0 %v19101_v12 }
0x12d2   :  { %17303 = vmatpush3.msra.mxu0 %v19101_v12 }
0x12d3   :  { %v19122_v6 = vand.u32 4294901760, %v19112_v46  ;;  %17304 = vmatprep.subr.mxu0 %v19115_v48 }
0x12d4   :  { %17305 = vmatpush3.msra.mxu0 %v19115_v48 }
0x12d5   :  { %v9135_v49 = vsub.f32 %v19112_v46, %v19122_v6  ;;  %17316 = vmatprep.subr.mxu0 %v19112_v46 }
0x12d7   :  { %v19136_v50 = vand.u32 4294901760, %v9135_v49 }
0x12d9   :  { %17309 = vmatprep.subr.mxu1 %v19136_v50 }
0x12da   :  { %17310 = vmatpush3.msra.mxu1 %v19136_v50 }
0x12db   :  { %17311 = vmatprep.subr.mxu1 %v19141_v11 }
0x12dc   :  { %17312 = vmatpush3.msra.mxu1 %v19141_v11 }
0x12dd   :  { %17323 = vmatprep.subr.mxu1 %v19101_v12 }
0x1358   :  { %v8993_v38 = vpop.xlane.xlu0 %8992 }
0x1359   :  { %v8995_v0 = vsub.f32 %v8987_v54, %v8993_v38 }
0x135a   :  { %v8990_v2 = vpop.xlane.xlu1 %8989 }
0x135b   :  { %v8998_v51 = vmul.f32 1.442695, %v8995_v0  ;;  %v8994_v17 = vsub.f32 %v8986_v33, %v8990_v2 }
0x135d   :  { %17911 = vpow2.f32 %v8998_v51  ;;  %v8996_v52 = vmul.f32 1.442695, %v8994_v17 }
0x135f   :  { %17913 = vpow2.f32 %v8996_v52 }
0x136a   :  { %v17912_v56 = vpop.eup %17911 }
0x136b   :  { %v9003_v53 = vsel %vm1759_vm3, %v17912_v56, 0.0 }
0x136c   :  { %v17914_v8 = vpop.eup %17913  ;;  %9004 = vadd.xlane.f32.xlu0 %v9003_v53 }
0x136d   :  { %v9000_v60 = vsel %vm1759_vm3, %v17914_v8, 0.0 }
0x136e   :  { %9001 = vadd.xlane.f32.xlu1 %v9000_v60 }
0x137f   :  { %9518 = vrot.lane.b32.xlu1 %v19077_v63, %s17991_s11 }
0x1382   :  { %9520 = vrot.lane.b32.xlu0 %v19072_v44, %s17991_s11 }
0x13f5   :  { %v9005_v58 = vpop.xlane.xlu0 %9004 }
0x13f6   :  { %17915 = vrcp.f32 %v9005_v58 }
0x13f7   :  { %v9002_v61 = vpop.xlane.xlu1 %9001 }
0x13f8   :  { %17917 = vrcp.f32 %v9002_v61 }
0x13f9   :  { %v9521_v62 = vpop.permute.xlu0 %9520 }
0x13fa   :  { %v9524_v21 = vsel %vm1261_vm2, %v9521_v62, 0 }
0x13fb   :  { %v9519_v29 = vpop.permute.xlu1 %9518  ;;  %v9602_v4 = vand.u32 4294901760, %v9524_v21 }
0x13fc   :  { %v9522_v43 = vsel %vm1261_vm2, %v9519_v29, 0 }
0x13fd   :  { %v9592_v19 = vand.u32 4294901760, %v9522_v43  ;;  %v9603_v24 = vsub.f32 %v9524_v21, %v9602_v4 }
0x13ff   :  { %v9593_v25 = vsub.f32 %v9522_v43, %v9592_v19  ;;  %v9604_v18 = vand.u32 4294901760, %v9603_v24 }
0x1401   :  { %v9594_v28 = vand.u32 4294901760, %v9593_v25  ;;  %v9605_v40 = vsub.f32 %v9603_v24, %v9604_v18 }
0x1403   :  { %v17916_v13 = vpop.eup %17915  ;;  %v9595_v30 = vsub.f32 %v9593_v25, %v9594_v28 }
0x1404   :  { %v9009_v1 = vmul.f32 %v17916_v13, %v17912_v56 }
0x1405   :  { %v17918_v14 = vpop.eup %17917  ;;  %v9596_v54 = vand.u32 4294901760, %v9595_v30 }
0x1406   :  { %v9008_v42 = vmul.f32 %v17918_v14, %v17914_v8  ;;  %v9014_v3 = vsel %vm1759_vm3, %v9009_v1, 0 }
0x1407   :  { %v9093_v23 = vand.u32 4294901760, %v9014_v3 }
0x1408   :  { %v9011_v59 = vsel %vm1759_vm3, %v9008_v42, 0 }
0x1409   :  { %v9083_v10 = vand.u32 4294901760, %v9011_v59  ;;  %v9094_v15 = vsub.f32 %v9014_v3, %v9093_v23 }
0x140b   :  { %17313 = vmatprep.mubr.f32.mxu1 %v9083_v10  ;;  %v9084_v16 = vsub.f32 %v9011_v59, %v9083_v10  ;;  %v9095_v20 = vand.u32 4294901760, %v9094_v15 }
0x140c   :  { %17314 = vmatmul.mubr.f32.vlgmr.msra.gmra.mxu1 %v9093_v23 }
0x140d   :  { %17324 = vmatpush3.msra.mxu1 %v19101_v12  ;;  %v9085_v57 = vand.u32 4294901760, %v9084_v16  ;;  %v9096_v55 = vsub.f32 %v9094_v15, %v9095_v20 }
0x140e   :  { %17325 = vmatprep.subr.mxu1 %v19115_v48 }
0x140f   :  { %17326 = vmatpush3.msra.mxu1 %v19115_v48  ;;  %17327 = vmatprep.mubr.f32.mxu1 %v9085_v57  ;;  %v9086_v22 = vsub.f32 %v9084_v16, %v9085_v57  ;;  %v9097_v47 = vand.u32 4294901760, %v9096_v55 }
0x1410   :  { %17328 = vmatmul.mubr.f32.vlgmr.msra.gmra.mxu1 %v9095_v20  ;;  %17337 = vmatprep.subr.mxu1 %v19101_v12 }
0x1411   :  { %17338 = vmatpush3.msra.mxu1 %v19101_v12  ;;  %17341 = vmatprep.mubr.f32.mxu1 %v9083_v10  ;;  %v9087_v41 = vand.u32 4294901760, %v9086_v22 }
0x1412   :  { %17339 = vmatprep.subr.mxu1 %v19115_v48 }
0x1413   :  { %17306 = vmatprep.mubr.f32.mxu0 %v9087_v41  ;;  %17340 = vmatpush3.msra.mxu1 %v19115_v48 }
0x1414   :  { %17307 = vmatmul.mubr.f32.vlgmr.msra.gmra.mxu0 %v9097_v47  ;;  %17342 = vmatmul.mubr.f32.vlgmr.msra.gmra.mxu1 %v9093_v23 }
0x1415   :  { %17317 = vmatpush3.msra.mxu0 %v19112_v46  ;;  %17320 = vmatprep.mubr.f32.mxu0 %v9084_v16 }
0x1416   :  { %17351 = vmatprep.mubr.f32.mxu1 %v9592_v19  ;;  %17318 = vmatprep.subr.mxu0 %v19126_v5 }
0x1417   :  { %17349 = vmatprep.subr.mxu1 %v19056_v35  ;;  %17319 = vmatpush3.msra.mxu0 %v19126_v5 }
0x1418   :  { %17350 = vmatpush3.msra.mxu1 %v19056_v35  ;;  %17321 = vmatmul.mubr.f32.vlgmr.msra.gmra.mxu0 %v9094_v15  ;;  %v9606_v35 = vand.u32 4294901760, %v9605_v40  ;;  %v19201_v40 = vld [vmem:[%s19778_s1 + $0x20] sm:$0xff] }
0x1419   :  { %17330 = vmatprep.subr.mxu0 %v19122_v6  ;;  %17352 = vmatmul.mubr.f32.vlgmr.msra.gmra.mxu1 %v9602_v4 }
0x141a   :  { %17331 = vmatpush3.msra.mxu0 %v19122_v6  ;;  %17334 = vmatprep.mubr.f32.mxu0 %v9083_v10 }
0x141b   :  { %17361 = vmatprep.mubr.f32.mxu1 %v9594_v28  ;;  %17332 = vmatprep.subr.mxu0 %v19133_v45  ;;  %v19194_v28 = vld [vmem:[%s19778_s1 + $0x28] sm:$0xff] }
0x141c   :  { %17359 = vmatprep.subr.mxu1 %v19043_v26  ;;  %17333 = vmatpush3.msra.mxu0 %v19133_v45 }
0x141d   :  { %17360 = vmatpush3.msra.mxu1 %v19043_v26  ;;  %17335 = vmatmul.mubr.f32.vlgmr.msra.gmra.mxu0 %v9093_v23 }
0x141e   :  { %17362 = vmatmul.mubr.f32.vlgmr.msra.gmra.mxu1 %v9604_v18  ;;  %17346 = vmatprep.mubr.f32.mxu0 %v9596_v54 }
0x141f   :  { %17371 = vmatprep.mubr.f32.mxu1 %v9592_v19  ;;  %17344 = vmatprep.subr.mxu0 %v19043_v26 }
0x1420   :  { %17369 = vmatprep.subr.mxu1 %v19043_v26  ;;  %17345 = vmatpush3.msra.mxu0 %v19043_v26 }
0x1421   :  { %17370 = vmatpush3.msra.mxu1 %v19043_v26  ;;  %17347 = vmatmul.mubr.f32.vlgmr.msra.gmra.mxu0 %v9606_v35 }
0x1422   :  { %17372 = vmatmul.mubr.f32.vlgmr.msra.gmra.mxu1 %v9602_v4  ;;  %17356 = vmatprep.mubr.f32.mxu0 %v9593_v25 }
0x1423   :  { %17354 = vmatprep.subr.mxu0 %v19046_v27  ;;  %17381 = vmatprep.subr.mxu1 %v19136_v50 }
0x1424   :  { %17355 = vmatpush3.msra.mxu0 %v19046_v27  ;;  %17382 = vmatpush3.msra.mxu1 %v19136_v50 }
0x1425   :  { %17357 = vmatmul.mubr.f32.vlgmr.msra.gmra.mxu0 %v9603_v24  ;;  %17364 = vmatprep.subr.mxu0 %v19051_v31 }
0x1426   :  { %17366 = vmatprep.mubr.f32.mxu0 %v9592_v19  ;;  %17365 = vmatpush3.msra.mxu0 %v19051_v31 }
0x1427   :  { %17383 = vmatprep.subr.mxu1 %v19141_v11  ;;  %17374 = vmatprep.subr.mxu0 %v19101_v12 }
0x1428   :  { %17384 = vmatpush3.msra.mxu1 %v19141_v11 }
0x1429   :  { %17367 = vmatmul.mubr.f32.vlgmr.msra.gmra.mxu0 %v9602_v4  ;;  %17395 = vmatprep.subr.mxu1 %v19101_v12 }
0x142a   :  { %17375 = vmatpush3.msra.mxu0 %v19101_v12 }
0x142b   :  { %17376 = vmatprep.subr.mxu0 %v19115_v48 }
0x142c   :  { %17377 = vmatpush3.msra.mxu0 %v19115_v48 }
0x142d   :  { %17388 = vmatprep.subr.mxu0 %v19112_v46 }
0x14cc   :  { %v17315_v26 = vpop.f32.mrf.mxu1 }
0x14ce   :  { %v9180_v27 = vpop.f32.mrf.mxu1 }
0x14d0   :  { %v17329_v31 = vpop.f32.mrf.mxu1 }
0x14d2   :  { %v9344_v32 = vpop.f32.mrf.mxu1 }
0x14d4   :  { %v17308_v33 = vpop.f32.mrf.mxu0  ;;  %v17343_v36 = vpop.f32.mrf.mxu1 }
0x14d5   :  { %v9187_v38 = vadd.f32 %v17315_v26, %v17308_v33 }
0x14d6   :  { %v9089_v0 = vpop.f32.mrf.mxu0  ;;  %v9508_v2 = vpop.f32.mrf.mxu1 }
0x14d7   :  { %v9181_v51 = vadd.f32 %v9180_v27, %v9089_v0 }
0x14d8   :  { %v17322_v17 = vpop.f32.mrf.mxu0 }
0x14d9   :  { %v9270_v52 = vadd.f32 %v17322_v17, %v9187_v38  ;;  %v17353_v56 = vpop.f32.mrf.mxu1 }
0x14da   :  { %v9262_v53 = vpop.f32.mrf.mxu0 }
0x14db   :  { %v9263_v8 = vadd.f32 %v9262_v53, %v9181_v51  ;;  %v9353_v60 = vadd.f32 %v17329_v31, %v9270_v52  ;;  %v9684_v49 = vpop.f32.mrf.mxu1 }
0x14dd   :  { %v17336_v50 = vpop.f32.mrf.mxu0  ;;  %v9345_v34 = vadd.f32 %v9344_v32, %v9263_v8 }
0x14de   :  { %v9436_v11 = vadd.f32 %v17336_v50, %v9353_v60  ;;  %v17363_v1 = vpop.f32.mrf.mxu1 }
0x14df   :  { %v9429_v58 = vpop.f32.mrf.mxu0 }
0x14e0   :  { %v19187_v61 = vadd.f32 %v17343_v36, %v9436_v11  ;;  %v9430_v13 = vadd.f32 %v9429_v58, %v9345_v34  ;;  %v9845_v23 = vpop.f32.mrf.mxu1 }
0x14e1   :  { %v17348_v14 = vpop.f32.mrf.mxu0 }
0x14e2   :  { %v19189_v29 = vadd.f32 %v9508_v2, %v9430_v13  ;;  %v9691_v3 = vadd.f32 %v17353_v56, %v17348_v14  ;;  %v17373_v20 = vpop.f32.mrf.mxu1 }
0x14e3   :  { %v9598_v42 = vpop.f32.mrf.mxu0 }
0x14e4   :  { %v9685_v62 = vadd.f32 %v9684_v49, %v9598_v42  ;;  %v10005_v25 = vpop.f32.mrf.mxu1 }
0x14e5   :  { %v17358_v59 = vpop.f32.mrf.mxu0 }
0x14e6   :  { %v9772_v43 = vadd.f32 %v17358_v59, %v9691_v3 }
0x14e7   :  { %v9764_v10 = vpop.f32.mrf.mxu0 }
0x14e8   :  { %v9765_v15 = vadd.f32 %v9764_v10, %v9685_v62  ;;  %v9854_v16 = vadd.f32 %v17363_v1, %v9772_v43 }
0x14e9   :  { %v17368_v21 = vpop.f32.mrf.mxu0 }
0x14ea   :  { %v9934_v19 = vadd.f32 %v17368_v21, %v9854_v16  ;;  %v9846_v57 = vadd.f32 %v9845_v23, %v9765_v15 }
0x14eb   :  { %v9927_v55 = vpop.f32.mrf.mxu0 }
0x14ec   :  { %v10012_v4 = vadd.f32 %v17373_v20, %v9934_v19  ;;  %v9928_v22 = vadd.f32 %v9927_v55, %v9846_v57  ;;  %v8485_v20 = vld [vmem:[%s19783_s6] sm:$0xff] }
0x14ee   :  { %v10016_v41 = vmul.f32 0.35355338, %v10012_v4  ;;  %v10006_v47 = vadd.f32 %v10005_v25, %v9928_v22  ;;  %v19247_v22 = vand.u32 4294901760, %v8485_v20 }
0x14f0   :  { %v10015_v24 = vmul.f32 0.35355338, %v10006_v47  ;;  %v10018_v18 = vadd.f32 %v19194_v28, %v10016_v41 }
0x14f2   :  { %v10022_v30 = vsel %vm1759_vm3, %v10018_v18, -inf  ;;  %v10017_v54 = vadd.f32 %v19201_v40, %v10015_v24 }
0x14f3   :  { %10023 = vmax.xlane.f32.xlu0 %v10022_v30 }
0x14f4   :  { %v10019_v35 = vsel %vm1759_vm3, %v10017_v54, -inf }
0x14f5   :  { %10020 = vmax.xlane.f32.xlu1 %v10019_v35  ;;  %v19250_v35 = vsub.f32 %v8485_v20, %v19247_v22 }
0x157c   :  { %v10024_v26 = vpop.xlane.xlu0 %10023 }
0x157d   :  { %v10026_v27 = vsub.f32 %v10018_v18, %v10024_v26 }
0x157e   :  { %v10021_v31 = vpop.xlane.xlu1 %10020 }
0x157f   :  { %v10029_v32 = vmul.f32 1.442695, %v10026_v27  ;;  %v10025_v33 = vsub.f32 %v10017_v54, %v10021_v31 }
0x1581   :  { %17919 = vpow2.f32 %v10029_v32  ;;  %v10027_v36 = vmul.f32 1.442695, %v10025_v33 }
0x1583   :  { %17921 = vpow2.f32 %v10027_v36 }
0x158e   :  { %v17920_v38 = vpop.eup %17919 }
0x158f   :  { %v10034_v0 = vsel %vm1759_vm3, %v17920_v38, 0.0 }
0x1590   :  { %v17922_v2 = vpop.eup %17921  ;;  %10035 = vadd.xlane.f32.xlu0 %v10034_v0 }
0x1591   :  { %v10031_v51 = vsel %vm1759_vm3, %v17922_v2, 0.0 }
0x1592   :  { %10032 = vadd.xlane.f32.xlu1 %v10031_v51 }
0x15a3   :  { %11539 = vrot.lane.b32.xlu1 %v19077_v63, %s17992_s12 }
0x15a6   :  { %11541 = vrot.lane.b32.xlu0 %v19072_v44, %s17992_s12 }
0x1619   :  { %v10036_v17 = vpop.xlane.xlu0 %10035 }
0x161a   :  { %17923 = vrcp.f32 %v10036_v17  ;;  %v36_v17 = vld [vmem:[%s19778_s1 + $0x8] sm:$0xff] }
0x161b   :  { %v10033_v52 = vpop.xlane.xlu1 %10032 }
0x161c   :  { %17925 = vrcp.f32 %v10033_v52 }
0x1627   :  { %v17924_v56 = vpop.eup %17923 }
0x1628   :  { %v10040_v53 = vmul.f32 %v17924_v56, %v17920_v38  ;;  %v19254_v38 = vand.u32 4294901760, %v19250_v35 }
0x1629   :  { %v17926_v8 = vpop.eup %17925 }
0x162a   :  { %v10039_v60 = vmul.f32 %v17926_v8, %v17922_v2  ;;  %v10045_v49 = vsel %vm1759_vm3, %v10040_v53, 0  ;;  %v11045_v2 = vsel %vm1261_vm2, %v19189_v29, 0  ;;  %v11048_v53 = vsel %vm1261_vm2, %v19187_v61, 0 }
0x162b   :  { %v10124_v50 = vand.u32 4294901760, %v10045_v49  ;;  %v11170_v8 = vsub.f32 %v19250_v35, %v19254_v38  ;;  %v19268_v29 = vand.u32 4294901760, %v36_v17 }
0x162c   :  { %v10042_v34 = vsel %vm1759_vm3, %v10039_v60, 0  ;;  %v19266_v60 = vand.u32 4294901760, %v11045_v2 }
0x162d   :  { %v10114_v11 = vand.u32 4294901760, %v10042_v34  ;;  %v10125_v58 = vsub.f32 %v10045_v49, %v10124_v50  ;;  %v11171_v61 = vand.u32 4294901760, %v11170_v8 }
0x162f   :  { %17385 = vmatprep.mubr.f32.mxu1 %v10114_v11  ;;  %v10115_v13 = vsub.f32 %v10042_v34, %v10114_v11  ;;  %v10126_v1 = vand.u32 4294901760, %v10125_v58 }
0x1630   :  { %17386 = vmatmul.mubr.f32.vlgmr.msra.gmra.mxu1 %v10124_v50 }
0x1631   :  { %17396 = vmatpush3.msra.mxu1 %v19101_v12  ;;  %v10116_v14 = vand.u32 4294901760, %v10115_v13  ;;  %v10127_v42 = vsub.f32 %v10125_v58, %v10126_v1 }
0x1632   :  { %17397 = vmatprep.subr.mxu1 %v19115_v48 }
0x1633   :  { %17398 = vmatpush3.msra.mxu1 %v19115_v48  ;;  %17399 = vmatprep.mubr.f32.mxu1 %v10116_v14  ;;  %v10117_v3 = vsub.f32 %v10115_v13, %v10116_v14  ;;  %v10128_v59 = vand.u32 4294901760, %v10127_v42  ;;  %v19276_v14 = vsub.f32 %v36_v17, %v19268_v29  ;;  %v11540_v42 = vpop.permute.xlu1 %11539 }
0x1634   :  { %17400 = vmatmul.mubr.f32.vlgmr.msra.gmra.mxu1 %v10126_v1  ;;  %17409 = vmatprep.subr.mxu1 %v19101_v12 }
0x1635   :  { %17410 = vmatpush3.msra.mxu1 %v19101_v12  ;;  %17413 = vmatprep.mubr.f32.mxu1 %v10114_v11  ;;  %v10118_v23 = vand.u32 4294901760, %v10117_v3  ;;  %v8486_v12 = vld [vmem:[%s19783_s6 + $0x8] sm:$0xff] }
0x1636   :  { %17411 = vmatprep.subr.mxu1 %v19115_v48 }
0x1637   :  { %17378 = vmatprep.mubr.f32.mxu0 %v10118_v23  ;;  %17412 = vmatpush3.msra.mxu1 %v19115_v48 }
0x1638   :  { %17379 = vmatmul.mubr.f32.vlgmr.msra.gmra.mxu0 %v10128_v59  ;;  %17414 = vmatmul.mubr.f32.vlgmr.msra.gmra.mxu1 %v10124_v50 }
0x1639   :  { %17389 = vmatpush3.msra.mxu0 %v19112_v46  ;;  %17392 = vmatprep.mubr.f32.mxu0 %v10115_v13  ;;  %v19230_v46 = vand.u32 4294901760, %v8486_v12  ;;  %v11117_v13 = vsub.f32 %v11045_v2, %v19266_v60 }
0x163a   :  { %17390 = vmatprep.subr.mxu0 %v19126_v5 }
0x163b   :  { %17391 = vmatpush3.msra.mxu0 %v19126_v5  ;;  %v19233_v48 = vsub.f32 %v8486_v12, %v19230_v46  ;;  %v11118_v12 = vand.u32 4294901760, %v11117_v13 }
0x163c   :  { %17393 = vmatmul.mubr.f32.vlgmr.msra.gmra.mxu0 %v10125_v58  ;;  %17402 = vmatprep.subr.mxu0 %v19122_v6 }
0x163d   :  { %17403 = vmatpush3.msra.mxu0 %v19122_v6  ;;  %17406 = vmatprep.mubr.f32.mxu0 %v10114_v11  ;;  %v19238_v6 = vand.u32 4294901760, %v19233_v48  ;;  %v19271_v11 = vand.u32 4294901760, %v11048_v53 }
0x163e   :  { %17404 = vmatprep.subr.mxu0 %v19133_v45 }
0x163f   :  { %17405 = vmatpush3.msra.mxu0 %v19133_v45  ;;  %v10675_v5 = vsub.f32 %v19233_v48, %v19238_v6  ;;  %v11127_v23 = vsub.f32 %v11048_v53, %v19271_v11 }
0x1640   :  { %17407 = vmatmul.mubr.f32.vlgmr.msra.gmra.mxu0 %v10124_v50  ;;  %17416 = vmatprep.subr.mxu0 %v19230_v46 }
0x1641   :  { %17417 = vmatpush3.msra.mxu0 %v19230_v46  ;;  %v10676_v45 = vand.u32 4294901760, %v10675_v5  ;;  %v19281_v5 = vand.u32 4294901760, %v19276_v14 }
0x1642   :  { %17426 = vmatprep.subr.mxu0 %v19233_v48 }
0x1643   :  { %17421 = vmatprep.subr.mxu1 %v10676_v45 }
0x1644   :  { %17422 = vmatpush3.msra.mxu1 %v10676_v45  ;;  %v11542_v45 = vpop.permute.xlu0 %11541 }
0x1645   :  { %17431 = vmatprep.subr.mxu1 %v19230_v46 }
0x16f0   :  { %v17387_v62 = vpop.f32.mrf.mxu1 }
0x16f2   :  { %v10211_v43 = vpop.f32.mrf.mxu1 }
0x16f4   :  { %v17401_v10 = vpop.f32.mrf.mxu1 }
0x16f6   :  { %v10375_v19 = vpop.f32.mrf.mxu1 }
0x16f8   :  { %v17380_v15 = vpop.f32.mrf.mxu0  ;;  %v17415_v24 = vpop.f32.mrf.mxu1 }
0x16f9   :  { %v10218_v21 = vadd.f32 %v17387_v62, %v17380_v15  ;;  %v11543_v62 = vsel %vm1261_vm2, %v11540_v42, 0  ;;  %v11119_v15 = vsub.f32 %v11117_v13, %v11118_v12 }
0x16fa   :  { %v10120_v16 = vpop.f32.mrf.mxu0  ;;  %v10539_v32 = vpop.f32.mrf.mxu1 }
0x16fb   :  { %v10212_v55 = vadd.f32 %v10211_v43, %v10120_v16  ;;  %v11128_v43 = vand.u32 4294901760, %v11127_v23  ;;  %v11667_v16 = vsub.f32 %v19276_v14, %v19281_v5 }
0x16fc   :  { %v17394_v57 = vpop.f32.mrf.mxu0 }
0x16fd   :  { %v10301_v4 = vadd.f32 %v17394_v57, %v10218_v21  ;;  %v11129_v20 = vsub.f32 %v11127_v23, %v11128_v43  ;;  %v19296_v57 = vand.u32 4294901760, %v11667_v16 }
0x16fe   :  { %v10293_v25 = vpop.f32.mrf.mxu0 }
0x16ff   :  { %v10294_v41 = vadd.f32 %v10293_v25, %v10212_v55  ;;  %v10384_v47 = vadd.f32 %v17401_v10, %v10301_v4  ;;  %v11613_v10 = vand.u32 4294901760, %v11543_v62  ;;  %v11130_v55 = vand.u32 4294901760, %v11129_v20 }
0x1700   :  { %v17408_v18 = vpop.f32.mrf.mxu0 }
0x1701   :  { %v10467_v30 = vadd.f32 %v17408_v18, %v10384_v47  ;;  %v10376_v54 = vadd.f32 %v10375_v19, %v10294_v41  ;;  %v11120_v19 = vand.u32 4294901760, %v11119_v15 }
0x1702   :  { %v10460_v26 = vpop.f32.mrf.mxu0 }
0x1703   :  { %v10546_v27 = vadd.f32 %v17415_v24, %v10467_v30  ;;  %v10461_v31 = vadd.f32 %v10460_v26, %v10376_v54 }
0x1705   :  { %v10553_v33 = vsel %vm1261_vm2, %v10546_v27, 0  ;;  %v10540_v36 = vadd.f32 %v10539_v32, %v10461_v31 }
0x1706   :  { %v10631_v0 = vand.u32 4294901760, %v10553_v33 }
0x1707   :  { %v10550_v51 = vsel %vm1261_vm2, %v10540_v36, 0 }
0x1708   :  { %v10632_v52 = vsub.f32 %v10553_v33, %v10631_v0  ;;  %v10621_v56 = vand.u32 4294901760, %v10550_v51 }
0x170a   :  { %v10633_v49 = vand.u32 4294901760, %v10632_v52  ;;  %v10622_v50 = vsub.f32 %v10550_v51, %v10621_v56  ;;  %17423 = vmatprep.mubr.f32.mxu1 %v10621_v56 }
0x170b   :  { %17424 = vmatmul.mubr.f32.vlgmr.msra.gmra.mxu1 %v10631_v0 }
0x170c   :  { %17432 = vmatpush3.msra.mxu1 %v19230_v46  ;;  %v10623_v34 = vand.u32 4294901760, %v10622_v50  ;;  %v10634_v58 = vsub.f32 %v10632_v52, %v10633_v49 }
0x170d   :  { %17441 = vmatprep.subr.mxu1 %v19230_v46 }
0x170e   :  { %17433 = vmatprep.mubr.f32.mxu1 %v10623_v34  ;;  %v10624_v1 = vsub.f32 %v10622_v50, %v10623_v34  ;;  %v10635_v59 = vand.u32 4294901760, %v10634_v58 }
0x170f   :  { %17434 = vmatmul.mubr.f32.vlgmr.msra.gmra.mxu1 %v10633_v49 }
0x1710   :  { %17443 = vmatprep.mubr.f32.mxu1 %v10621_v56  ;;  %v10625_v3 = vand.u32 4294901760, %v10624_v1  ;;  %17442 = vmatpush3.msra.mxu1 %v19230_v46  ;;  %v11545_v46 = vsel %vm1261_vm2, %v11542_v45, 0 }
0x1711   :  { %17451 = vmatprep.subr.mxu1 %v11171_v61  ;;  %v11623_v21 = vand.u32 4294901760, %v11545_v46 }
0x1712   :  { %17418 = vmatprep.mubr.f32.mxu0 %v10625_v3 }
0x1713   :  { %17419 = vmatmul.mubr.f32.vlgmr.msra.gmra.mxu0 %v10635_v59  ;;  %17444 = vmatmul.mubr.f32.vlgmr.msra.gmra.mxu1 %v10631_v0  ;;  %v11624_v4 = vsub.f32 %v11545_v46, %v11623_v21 }
0x1714   :  { %17428 = vmatprep.mubr.f32.mxu0 %v10622_v50  ;;  %17453 = vmatprep.mubr.f32.mxu1 %v19266_v60 }
0x1715   :  { %17427 = vmatpush3.msra.mxu0 %v19233_v48  ;;  %17452 = vmatpush3.msra.mxu1 %v11171_v61  ;;  %v11614_v48 = vsub.f32 %v11543_v62, %v11613_v10  ;;  %v11625_v25 = vand.u32 4294901760, %v11624_v4 }
0x1716   :  { %17436 = vmatprep.subr.mxu0 %v19238_v6  ;;  %17461 = vmatprep.subr.mxu1 %v19247_v22 }
0x1717   :  { %17429 = vmatmul.mubr.f32.vlgmr.msra.gmra.mxu0 %v10632_v52  ;;  %17454 = vmatmul.mubr.f32.vlgmr.msra.gmra.mxu1 %v19271_v11  ;;  %v11626_v41 = vsub.f32 %v11624_v4, %v11625_v25 }
0x1718   :  { %17438 = vmatprep.mubr.f32.mxu0 %v10621_v56  ;;  %17463 = vmatprep.mubr.f32.mxu1 %v11118_v12 }
0x1719   :  { %17437 = vmatpush3.msra.mxu0 %v19238_v6  ;;  %17462 = vmatpush3.msra.mxu1 %v19247_v22  ;;  %v11615_v6 = vand.u32 4294901760, %v11614_v48  ;;  %v11627_v24 = vand.u32 4294901760, %v11626_v41 }
0x171a   :  { %17446 = vmatprep.subr.mxu0 %v19247_v22  ;;  %17471 = vmatprep.subr.mxu1 %v19247_v22 }
0x171b   :  { %17439 = vmatmul.mubr.f32.vlgmr.msra.gmra.mxu0 %v10631_v0  ;;  %17464 = vmatmul.mubr.f32.vlgmr.msra.gmra.mxu1 %v11128_v43 }
0x171c   :  { %17448 = vmatprep.mubr.f32.mxu0 %v11120_v19  ;;  %17473 = vmatprep.mubr.f32.mxu1 %v19266_v60 }
0x171d   :  { %17447 = vmatpush3.msra.mxu0 %v19247_v22  ;;  %17472 = vmatpush3.msra.mxu1 %v19247_v22  ;;  %v11616_v22 = vsub.f32 %v11614_v48, %v11615_v6 }
0x171e   :  { %17456 = vmatprep.subr.mxu0 %v19250_v35  ;;  %17481 = vmatprep.subr.mxu1 %v19296_v57 }
0x171f   :  { %17449 = vmatmul.mubr.f32.vlgmr.msra.gmra.mxu0 %v11130_v55  ;;  %17474 = vmatmul.mubr.f32.vlgmr.msra.gmra.mxu1 %v19271_v11  ;;  %v11617_v47 = vand.u32 4294901760, %v11616_v22 }
0x1720   :  { %17458 = vmatprep.mubr.f32.mxu0 %v11117_v13  ;;  %17483 = vmatprep.mubr.f32.mxu1 %v11613_v10 }
0x1721   :  { %17457 = vmatpush3.msra.mxu0 %v19250_v35  ;;  %17482 = vmatpush3.msra.mxu1 %v19296_v57 }
0x1722   :  { %17466 = vmatprep.subr.mxu0 %v19254_v38  ;;  %17491 = vmatprep.subr.mxu1 %v19268_v29 }
0x1723   :  { %17459 = vmatmul.mubr.f32.vlgmr.msra.gmra.mxu0 %v11127_v23  ;;  %17484 = vmatmul.mubr.f32.vlgmr.msra.gmra.mxu1 %v11623_v21 }
0x1724   :  { %17468 = vmatprep.mubr.f32.mxu0 %v19266_v60  ;;  %17493 = vmatprep.mubr.f32.mxu1 %v11615_v6 }
0x1725   :  { %17467 = vmatpush3.msra.mxu0 %v19254_v38  ;;  %17492 = vmatpush3.msra.mxu1 %v19268_v29 }
0x1726   :  { %17476 = vmatprep.subr.mxu0 %v19268_v29  ;;  %17501 = vmatprep.subr.mxu1 %v19268_v29 }
0x1727   :  { %17469 = vmatmul.mubr.f32.vlgmr.msra.gmra.mxu0 %v19271_v11  ;;  %17494 = vmatmul.mubr.f32.vlgmr.msra.gmra.mxu1 %v11625_v25 }
0x1728   :  { %17478 = vmatprep.mubr.f32.mxu0 %v11617_v47  ;;  %17503 = vmatprep.mubr.f32.mxu1 %v11613_v10 }
0x1729   :  { %17477 = vmatpush3.msra.mxu0 %v19268_v29  ;;  %17502 = vmatpush3.msra.mxu1 %v19268_v29 }
0x172a   :  { %17486 = vmatprep.subr.mxu0 %v19276_v14 }
0x172b   :  { %17479 = vmatmul.mubr.f32.vlgmr.msra.gmra.mxu0 %v11627_v24  ;;  %17504 = vmatmul.mubr.f32.vlgmr.msra.gmra.mxu1 %v11623_v21 }
0x172c   :  { %17488 = vmatprep.mubr.f32.mxu0 %v11614_v48  ;;  %17487 = vmatpush3.msra.mxu0 %v19276_v14 }
0x172d   :  { %17496 = vmatprep.subr.mxu0 %v19281_v5 }
0x172f   :  { %17489 = vmatmul.mubr.f32.vlgmr.msra.gmra.mxu0 %v11624_v4 }
0x1730   :  { %17498 = vmatprep.mubr.f32.mxu0 %v11613_v10  ;;  %17497 = vmatpush3.msra.mxu0 %v19281_v5 }
0x1733   :  { %17499 = vmatmul.mubr.f32.vlgmr.msra.gmra.mxu0 %v11623_v21 }
0x17cb   :  { %v17425_v18 = vpop.f32.mrf.mxu1 }
0x17cd   :  { %v10713_v30 = vpop.f32.mrf.mxu1 }
0x17cf   :  { %v17435_v54 = vpop.f32.mrf.mxu1 }
0x17d1   :  { %v10874_v35 = vpop.f32.mrf.mxu1 }
0x17d3   :  { %v17420_v26 = vpop.f32.mrf.mxu0  ;;  %v17445_v27 = vpop.f32.mrf.mxu1 }
0x17d4   :  { %v10720_v31 = vadd.f32 %v17425_v18, %v17420_v26 }
0x17d5   :  { %v10627_v32 = vpop.f32.mrf.mxu0  ;;  %v11034_v33 = vpop.f32.mrf.mxu1 }
0x17d6   :  { %v10714_v36 = vadd.f32 %v10713_v30, %v10627_v32 }
0x17d7   :  { %v17430_v38 = vpop.f32.mrf.mxu0  ;;  %v17455_v0 = vpop.f32.mrf.mxu1 }
0x17d8   :  { %v10801_v2 = vadd.f32 %v17430_v38, %v10720_v31 }
0x17d9   :  { %v10793_v51 = vpop.f32.mrf.mxu0  ;;  %v11208_v17 = vpop.f32.mrf.mxu1 }
0x17da   :  { %v10794_v52 = vadd.f32 %v10793_v51, %v10714_v36  ;;  %v10883_v56 = vadd.f32 %v17435_v54, %v10801_v2 }
0x17db   :  { %v17440_v53 = vpop.f32.mrf.mxu0  ;;  %v17465_v8 = vpop.f32.mrf.mxu1 }
0x17dc   :  { %v10963_v60 = vadd.f32 %v17440_v53, %v10883_v56  ;;  %v10875_v49 = vadd.f32 %v10874_v35, %v10794_v52 }
0x17dd   :  { %v10956_v50 = vpop.f32.mrf.mxu0  ;;  %v11369_v34 = vpop.f32.mrf.mxu1 }
0x17de   :  { %v10957_v11 = vadd.f32 %v10956_v50, %v10875_v49  ;;  %v11041_v58 = vadd.f32 %v17445_v27, %v10963_v60 }
0x17df   :  { %v17450_v61 = vpop.f32.mrf.mxu0  ;;  %v17475_v13 = vpop.f32.mrf.mxu1 }
0x17e0   :  { %v11133_v1 = vadd.f32 %v17450_v61, %v11041_v58  ;;  %v11035_v42 = vadd.f32 %v11034_v33, %v10957_v11 }
0x17e1   :  { %v11122_v3 = vpop.f32.mrf.mxu0  ;;  %v11529_v23 = vpop.f32.mrf.mxu1 }
0x17e2   :  { %v11123_v59 = vadd.f32 %v11122_v3, %v11035_v42  ;;  %v11215_v12 = vadd.f32 %v17455_v0, %v11133_v1 }
0x17e3   :  { %v17460_v45 = vpop.f32.mrf.mxu0  ;;  %v17485_v62 = vpop.f32.mrf.mxu1 }
0x17e4   :  { %v11296_v43 = vadd.f32 %v17460_v45, %v11215_v12  ;;  %v11209_v46 = vadd.f32 %v11208_v17, %v11123_v59 }
0x17e5   :  { %v11288_v10 = vpop.f32.mrf.mxu0  ;;  %v11705_v20 = vpop.f32.mrf.mxu1 }
0x17e6   :  { %v11289_v15 = vadd.f32 %v11288_v10, %v11209_v46  ;;  %v11378_v16 = vadd.f32 %v17465_v8, %v11296_v43 }
0x17e7   :  { %v17470_v21 = vpop.f32.mrf.mxu0  ;;  %v17495_v25 = vpop.f32.mrf.mxu1 }
0x17e8   :  { %v11458_v48 = vadd.f32 %v17470_v21, %v11378_v16  ;;  %v11370_v19 = vadd.f32 %v11369_v34, %v11289_v15 }
0x17e9   :  { %v11451_v55 = vpop.f32.mrf.mxu0  ;;  %v11866_v18 = vpop.f32.mrf.mxu1 }
0x17ea   :  { %v19320_v4 = vadd.f32 %v17475_v13, %v11458_v48  ;;  %v11452_v6 = vadd.f32 %v11451_v55, %v11370_v19 }
0x17eb   :  { %v17480_v22 = vpop.f32.mrf.mxu0  ;;  %v17505_v32 = vpop.f32.mrf.mxu1 }
0x17ec   :  { %v19322_v41 = vadd.f32 %v11529_v23, %v11452_v6  ;;  %v11712_v24 = vadd.f32 %v17485_v62, %v17480_v22 }
0x17ed   :  { %v11619_v47 = vpop.f32.mrf.mxu0  ;;  %v12026_v17 = vpop.f32.mrf.mxu1 }
0x17ee   :  { %v11706_v54 = vadd.f32 %v11705_v20, %v11619_v47 }
0x17ef   :  { %v17490_v30 = vpop.f32.mrf.mxu0 }
0x17f0   :  { %v11793_v35 = vadd.f32 %v17490_v30, %v11712_v24 }
0x17f1   :  { %v11785_v26 = vpop.f32.mrf.mxu0 }
0x17f2   :  { %v11786_v27 = vadd.f32 %v11785_v26, %v11706_v54  ;;  %v11875_v31 = vadd.f32 %v17495_v25, %v11793_v35 }
0x17f3   :  { %v17500_v33 = vpop.f32.mrf.mxu0 }
0x17f4   :  { %v11955_v36 = vadd.f32 %v17500_v33, %v11875_v31  ;;  %v11867_v38 = vadd.f32 %v11866_v18, %v11786_v27  ;;  %v8487_v31 = vld [vmem:[%s19783_s6 + $0x10] sm:$0xff] }
0x17f5   :  { %v11948_v0 = vpop.f32.mrf.mxu0 }
0x17f6   :  { %v12033_v2 = vadd.f32 %v17505_v32, %v11955_v36  ;;  %v11949_v51 = vadd.f32 %v11948_v0, %v11867_v38  ;;  %v12615_v32 = vand.u32 4294901760, %v8487_v31 }
0x17f8   :  { %v12037_v52 = vmul.f32 0.35355338, %v12033_v2  ;;  %v12027_v56 = vadd.f32 %v12026_v17, %v11949_v51  ;;  %v19391_v33 = vsub.f32 %v8487_v31, %v12615_v32 }
0x17fa   :  { %v12036_v53 = vmul.f32 0.35355338, %v12027_v56  ;;  %v12039_v8 = vadd.f32 %v19194_v28, %v12037_v52  ;;  %v19394_v36 = vand.u32 4294901760, %v19391_v33 }
0x17fc   :  { %v12043_v60 = vsel %vm1759_vm3, %v12039_v8, -inf  ;;  %v12038_v49 = vadd.f32 %v19201_v40, %v12036_v53  ;;  %v12704_v38 = vsub.f32 %v19391_v33, %v19394_v36 }
0x17fd   :  { %12044 = vmax.xlane.f32.xlu0 %v12043_v60 }
0x17fe   :  { %v12040_v50 = vsel %vm1759_vm3, %v12038_v49, -inf  ;;  %v12705_v0 = vand.u32 4294901760, %v12704_v38 }
0x17ff   :  { %12041 = vmax.xlane.f32.xlu1 %v12040_v50 }
0x1886   :  { %v12045_v34 = vpop.xlane.xlu0 %12044 }
0x1887   :  { %v12047_v11 = vsub.f32 %v12039_v8, %v12045_v34 }
0x1888   :  { %v12042_v58 = vpop.xlane.xlu1 %12041 }
0x1889   :  { %v12050_v61 = vmul.f32 1.442695, %v12047_v11  ;;  %v12046_v13 = vsub.f32 %v12038_v49, %v12042_v58 }
0x188b   :  { %17927 = vpow2.f32 %v12050_v61  ;;  %v12048_v1 = vmul.f32 1.442695, %v12046_v13 }
0x188d   :  { %17929 = vpow2.f32 %v12048_v1 }
0x1898   :  { %v17928_v42 = vpop.eup %17927 }
0x1899   :  { %v12055_v3 = vsel %vm1759_vm3, %v17928_v42, 0.0 }
0x189a   :  { %v17930_v28 = vpop.eup %17929  ;;  %12056 = vadd.xlane.f32.xlu0 %v12055_v3 }
0x189b   :  { %v12052_v23 = vsel %vm1759_vm3, %v17930_v28, 0.0 }
0x189c   :  { %12053 = vadd.xlane.f32.xlu1 %v12052_v23 }
0x18ad   :  { %12066 = vrot.lane.b32.xlu1 %v19098_v37, %s17991_s11 }
0x18b0   :  { %12064 = vrot.lane.b32.xlu0 %v19108_v39, %s17991_s11 }
0x18b1   :  { %13075 = vrot.lane.b32.xlu1 %v19077_v63, %s17994_s18 }
0x18b5   :  { %13077 = vrot.lane.b32.xlu1 %v19072_v44, %s17994_s18 }
0x1923   :  { %v12057_v40 = vpop.xlane.xlu0 %12056 }
0x1924   :  { %17931 = vrcp.f32 %v12057_v40 }
0x1925   :  { %v12054_v59 = vpop.xlane.xlu1 %12053 }
0x1926   :  { %17933 = vrcp.f32 %v12054_v59 }
0x1927   :  { %v12065_v12 = vpop.permute.xlu0 %12064 }
0x1928   :  { %v19338_v45 = vand.u32 4294901760, %v12065_v12 }
0x1929   :  { %v12067_v62 = vpop.permute.xlu1 %12066 }
0x192a   :  { %v19340_v43 = vand.u32 4294901760, %v12067_v62  ;;  %v19343_v37 = vsub.f32 %v12065_v12, %v19338_v45 }
0x192c   :  { %v19346_v39 = vsub.f32 %v12067_v62, %v19340_v43  ;;  %v19349_v63 = vand.u32 4294901760, %v19343_v37  ;;  %17506 = vmatprep.subr.mxu0 %v19340_v43 }
0x192d   :  { %17507 = vmatpush3.msra.mxu0 %v19340_v43  ;;  %v13076_v1 = vpop.permute.xlu1 %13075 }
0x192e   :  { %v19354_v44 = vand.u32 4294901760, %v19346_v39  ;;  %v12202_v46 = vsub.f32 %v19343_v37, %v19349_v63  ;;  %17508 = vmatprep.subr.mxu0 %v19338_v45 }
0x192f   :  { %17509 = vmatpush3.msra.mxu0 %v19338_v45 }
0x1930   :  { %v12195_v10 = vsub.f32 %v19346_v39, %v19354_v44  ;;  %17520 = vmatprep.subr.mxu0 %v19346_v39  ;;  %v19365_v21 = vand.u32 4294901760, %v12202_v46 }
0x1931   :  { %v17932_v15 = vpop.eup %17931 }
0x1932   :  { %v12061_v16 = vmul.f32 %v17932_v15, %v17928_v42  ;;  %v19363_v20 = vand.u32 4294901760, %v12195_v10  ;;  %v13079_v10 = vsel %vm1261_vm2, %v13076_v1, 0  ;;  %v13078_v15 = vpop.permute.xlu1 %13077 }
0x1933   :  { %v17934_v48 = vpop.eup %17933 }
0x1934   :  { %17513 = vmatprep.subr.mxu1 %v19363_v20  ;;  %v12060_v19 = vmul.f32 %v17934_v48, %v17930_v28  ;;  %v12074_v55 = vsel %vm1759_vm3, %v12061_v16, 0 }
0x1935   :  { %17514 = vmatpush3.msra.mxu1 %v19363_v20  ;;  %v12153_v6 = vand.u32 4294901760, %v12074_v55 }
0x1936   :  { %17515 = vmatprep.subr.mxu1 %v19365_v21  ;;  %v12071_v25 = vsel %vm1759_vm3, %v12060_v19, 0 }
0x1937   :  { %17516 = vmatpush3.msra.mxu1 %v19365_v21  ;;  %v12143_v22 = vand.u32 4294901760, %v12071_v25  ;;  %v12154_v47 = vsub.f32 %v12074_v55, %v12153_v6  ;;  %v13149_v55 = vand.u32 4294901760, %v13079_v10 }
0x1938   :  { %17527 = vmatprep.subr.mxu1 %v19340_v43 }
0x1939   :  { %17517 = vmatprep.mubr.f32.mxu1 %v12143_v22  ;;  %v12144_v24 = vsub.f32 %v12071_v25, %v12143_v22  ;;  %v12155_v18 = vand.u32 4294901760, %v12154_v47 }
0x193a   :  { %17518 = vmatmul.mubr.f32.vlgmr.msra.gmra.mxu1 %v12153_v6 }
0x193b   :  { %17528 = vmatpush3.msra.mxu1 %v19340_v43  ;;  %v12145_v30 = vand.u32 4294901760, %v12144_v24  ;;  %v12156_v54 = vsub.f32 %v12154_v47, %v12155_v18 }
0x193c   :  { %17529 = vmatprep.subr.mxu1 %v19338_v45 }
0x193d   :  { %17530 = vmatpush3.msra.mxu1 %v19338_v45  ;;  %17531 = vmatprep.mubr.f32.mxu1 %v12145_v30  ;;  %v12146_v35 = vsub.f32 %v12144_v24, %v12145_v30  ;;  %v12157_v27 = vand.u32 4294901760, %v12156_v54  ;;  %v13150_v30 = vsub.f32 %v13079_v10, %v13149_v55 }
0x193e   :  { %17541 = vmatprep.subr.mxu1 %v19340_v43  ;;  %17532 = vmatmul.mubr.f32.vlgmr.msra.gmra.mxu1 %v12155_v18 }
0x193f   :  { %17542 = vmatpush3.msra.mxu1 %v19340_v43  ;;  %17545 = vmatprep.mubr.f32.mxu1 %v12143_v22  ;;  %v12147_v26 = vand.u32 4294901760, %v12146_v35  ;;  %v13151_v31 = vand.u32 4294901760, %v13150_v30 }
0x1940   :  { %17543 = vmatprep.subr.mxu1 %v19338_v45 }
0x1941   :  { %17544 = vmatpush3.msra.mxu1 %v19338_v45  ;;  %17510 = vmatprep.mubr.f32.mxu0 %v12147_v26 }
0x1942   :  { %17511 = vmatmul.mubr.f32.vlgmr.msra.gmra.mxu0 %v12157_v27  ;;  %17546 = vmatmul.mubr.f32.vlgmr.msra.gmra.mxu1 %v12153_v6 }
0x1943   :  { %17521 = vmatpush3.msra.mxu0 %v19346_v39  ;;  %17524 = vmatprep.mubr.f32.mxu0 %v12144_v24 }
0x1944   :  { %17522 = vmatprep.subr.mxu0 %v19343_v37  ;;  %17553 = vmatprep.subr.mxu1 %v12705_v0 }
0x1945   :  { %17523 = vmatpush3.msra.mxu0 %v19343_v37  ;;  %17554 = vmatpush3.msra.mxu1 %v12705_v0 }
0x1946   :  { %17534 = vmatprep.subr.mxu0 %v19354_v44  ;;  %17525 = vmatmul.mubr.f32.vlgmr.msra.gmra.mxu0 %v12154_v47 }
0x1947   :  { %17535 = vmatpush3.msra.mxu0 %v19354_v44  ;;  %17538 = vmatprep.mubr.f32.mxu0 %v12143_v22 }
0x1948   :  { %17536 = vmatprep.subr.mxu0 %v19349_v63  ;;  %17563 = vmatprep.subr.mxu1 %v12615_v32 }
0x1949   :  { %17537 = vmatpush3.msra.mxu0 %v19349_v63 }
0x194a   :  { %17539 = vmatmul.mubr.f32.vlgmr.msra.gmra.mxu0 %v12153_v6  ;;  %17548 = vmatprep.subr.mxu0 %v12615_v32  ;;  %v13081_v6 = vsel %vm1261_vm2, %v13078_v15, 0 }
0x194b   :  { %17549 = vmatpush3.msra.mxu0 %v12615_v32  ;;  %v13159_v24 = vand.u32 4294901760, %v13081_v6 }
0x194c   :  { %17558 = vmatprep.subr.mxu0 %v19391_v33 }
0x194d   :  { %v13160_v26 = vsub.f32 %v13081_v6, %v13159_v24 }
0x194f   :  { %v13161_v38 = vand.u32 4294901760, %v13160_v26 }
0x1951   :  { %v13162_v0 = vsub.f32 %v13160_v26, %v13161_v38 }
0x19fa   :  { %v17519_v2 = vpop.f32.mrf.mxu1 }
0x19fc   :  { %v12240_v51 = vpop.f32.mrf.mxu1 }
0x19fe   :  { %v17533_v17 = vpop.f32.mrf.mxu1 }
0x1a00   :  { %v12404_v8 = vpop.f32.mrf.mxu1 }
0x1a02   :  { %v17512_v52 = vpop.f32.mrf.mxu0  ;;  %v17547_v61 = vpop.f32.mrf.mxu1 }
0x1a03   :  { %v12247_v53 = vadd.f32 %v17519_v2, %v17512_v52 }
0x1a04   :  { %v12149_v56 = vpop.f32.mrf.mxu0  ;;  %v12568_v59 = vpop.f32.mrf.mxu1 }
0x1a05   :  { %v12241_v49 = vadd.f32 %v12240_v51, %v12149_v56 }
0x1a06   :  { %v17526_v60 = vpop.f32.mrf.mxu0 }
0x1a07   :  { %v12330_v50 = vadd.f32 %v17526_v60, %v12247_v53 }
0x1a08   :  { %v12322_v34 = vpop.f32.mrf.mxu0 }
0x1a09   :  { %v12323_v11 = vadd.f32 %v12322_v34, %v12241_v49  ;;  %v12413_v58 = vadd.f32 %v17533_v17, %v12330_v50 }
0x1a0a   :  { %v17540_v13 = vpop.f32.mrf.mxu0 }
0x1a0b   :  { %v12496_v42 = vadd.f32 %v17540_v13, %v12413_v58  ;;  %v12405_v3 = vadd.f32 %v12404_v8, %v12323_v11 }
0x1a0c   :  { %v12489_v28 = vpop.f32.mrf.mxu0 }
0x1a0d   :  { %v12575_v23 = vadd.f32 %v17547_v61, %v12496_v42  ;;  %v12490_v40 = vadd.f32 %v12489_v28, %v12405_v3 }
0x1a0f   :  { %v12582_v12 = vsel %vm1261_vm2, %v12575_v23, 0  ;;  %v12569_v62 = vadd.f32 %v12568_v59, %v12490_v40 }
0x1a10   :  { %v12660_v46 = vand.u32 4294901760, %v12582_v12 }
0x1a11   :  { %v12579_v16 = vsel %vm1261_vm2, %v12569_v62, 0 }
0x1a12   :  { %v12661_v48 = vsub.f32 %v12582_v12, %v12660_v46  ;;  %v12650_v19 = vand.u32 4294901760, %v12579_v16 }
0x1a14   :  { %v12662_v25 = vand.u32 4294901760, %v12661_v48  ;;  %v12651_v22 = vsub.f32 %v12579_v16, %v12650_v19  ;;  %17555 = vmatprep.mubr.f32.mxu1 %v12650_v19 }
0x1a15   :  { %17556 = vmatmul.mubr.f32.vlgmr.msra.gmra.mxu1 %v12660_v46 }
0x1a16   :  { %17564 = vmatpush3.msra.mxu1 %v12615_v32  ;;  %v12652_v47 = vand.u32 4294901760, %v12651_v22  ;;  %v12663_v18 = vsub.f32 %v12661_v48, %v12662_v25 }
0x1a17   :  { %17573 = vmatprep.subr.mxu1 %v12615_v32 }
0x1a18   :  { %17565 = vmatprep.mubr.f32.mxu1 %v12652_v47  ;;  %v12653_v54 = vsub.f32 %v12651_v22, %v12652_v47  ;;  %v12664_v27 = vand.u32 4294901760, %v12663_v18 }
0x1a19   :  { %17566 = vmatmul.mubr.f32.vlgmr.msra.gmra.mxu1 %v12662_v25 }
0x1a1a   :  { %17575 = vmatprep.mubr.f32.mxu1 %v12650_v19  ;;  %v12654_v35 = vand.u32 4294901760, %v12653_v54  ;;  %17574 = vmatpush3.msra.mxu1 %v12615_v32  ;;  %v13152_v32 = vsub.f32 %v13150_v30, %v13151_v31 }
0x1a1b   :  { %17583 = vmatprep.subr.mxu1 %v19296_v57 }
0x1a1c   :  { %17550 = vmatprep.mubr.f32.mxu0 %v12654_v35  ;;  %v13153_v2 = vand.u32 4294901760, %v13152_v32 }
0x1a1d   :  { %17551 = vmatmul.mubr.f32.vlgmr.msra.gmra.mxu0 %v12664_v27  ;;  %17576 = vmatmul.mubr.f32.vlgmr.msra.gmra.mxu1 %v12660_v46 }
0x1a1e   :  { %17560 = vmatprep.mubr.f32.mxu0 %v12651_v22  ;;  %17585 = vmatprep.mubr.f32.mxu1 %v13149_v55 }
0x1a1f   :  { %17559 = vmatpush3.msra.mxu0 %v19391_v33  ;;  %17584 = vmatpush3.msra.mxu1 %v19296_v57  ;;  %v13163_v57 = vand.u32 4294901760, %v13162_v0 }
0x1a20   :  { %17593 = vmatprep.subr.mxu1 %v19268_v29  ;;  %17568 = vmatprep.subr.mxu0 %v19394_v36 }
0x1a21   :  { %17561 = vmatmul.mubr.f32.vlgmr.msra.gmra.mxu0 %v12661_v48  ;;  %17586 = vmatmul.mubr.f32.vlgmr.msra.gmra.mxu1 %v13159_v24 }
0x1a22   :  { %17570 = vmatprep.mubr.f32.mxu0 %v12650_v19  ;;  %17595 = vmatprep.mubr.f32.mxu1 %v13151_v31 }
0x1a23   :  { %17594 = vmatpush3.msra.mxu1 %v19268_v29  ;;  %17569 = vmatpush3.msra.mxu0 %v19394_v36 }
0x1a24   :  { %17603 = vmatprep.subr.mxu1 %v19268_v29  ;;  %17578 = vmatprep.subr.mxu0 %v19268_v29 }
0x1a25   :  { %17571 = vmatmul.mubr.f32.vlgmr.msra.gmra.mxu0 %v12660_v46  ;;  %17596 = vmatmul.mubr.f32.vlgmr.msra.gmra.mxu1 %v13161_v38  ;;  %v17966_v38 = vld [vmem:[%s19778_s1 + $0x20] sm:$0xff] }
0x1a26   :  { %17604 = vmatpush3.msra.mxu1 %v19268_v29  ;;  %17580 = vmatprep.mubr.f32.mxu0 %v13153_v2 }
0x1a27   :  { %17605 = vmatprep.mubr.f32.mxu1 %v13149_v55  ;;  %17615 = vmatprep.subr.mxu1 %v19363_v20 }
0x1a28   :  { %17579 = vmatpush3.msra.mxu0 %v19268_v29 }
0x1a29   :  { %17581 = vmatmul.mubr.f32.vlgmr.msra.gmra.mxu0 %v13163_v57  ;;  %17606 = vmatmul.mubr.f32.vlgmr.msra.gmra.mxu1 %v13159_v24 }
0x1a2a   :  { %17616 = vmatpush3.msra.mxu1 %v19363_v20  ;;  %17588 = vmatprep.subr.mxu0 %v19276_v14 }
0x1a2b   :  { %17590 = vmatprep.mubr.f32.mxu0 %v13150_v30  ;;  %17617 = vmatprep.subr.mxu1 %v19365_v21 }
0x1a2c   :  { %17589 = vmatpush3.msra.mxu0 %v19276_v14  ;;  %17618 = vmatpush3.msra.mxu1 %v19365_v21 }
0x1a2d   :  { %17598 = vmatprep.subr.mxu0 %v19281_v5  ;;  %17629 = vmatprep.subr.mxu1 %v19340_v43 }
0x1a2e   :  { %17591 = vmatmul.mubr.f32.vlgmr.msra.gmra.mxu0 %v13160_v26  ;;  %v17965_v26 = vld [vmem:[%s19778_s1 + $0x28] sm:$0xff]  ;;  %s15792_s1 = sshll.u32 %s17996_s24, 4  ;;  %s15793_s1 = int_to_ptr.vmem [resolvable:$true] %s15792_s1 }
0x1a2f   :  { %17599 = vmatpush3.msra.mxu0 %v19281_v5  ;;  %17600 = vmatprep.mubr.f32.mxu0 %v13149_v55  ;;  %s17967_s25 = scalar_lea.vmem %s15793_s1, 256  ;;  %p17972_p1 = scmp.lt.s32.totalorder %s15793_s1, %s15793_s1 }
0x1a30   :  { %17608 = vmatprep.subr.mxu0 %v19340_v43  ;;  %p17968_p0 = scmp.ne.s32.totalorder %s15793_s1, %s17967_s25  ;;  %p17973_p2 = scmp.lt.s32.totalorder %s17967_s25, %s17967_s25 }
0x1a32   :  { %17601 = vmatmul.mubr.f32.vlgmr.msra.gmra.mxu0 %v13159_v24  ;;  %p17974_p3 = por %p17973_p2, %p17972_p1 }
0x1a33   :  { %17609 = vmatpush3.msra.mxu0 %v19340_v43 }
0x1a34   :  { %17610 = vmatprep.subr.mxu0 %v19338_v45  ;;  %p17975_p4 = pnand %p17974_p3, %p17968_p0 }
0x1a35   :  { %17611 = vmatpush3.msra.mxu0 %v19338_v45 }
0x1a36   :  { %17622 = vmatprep.subr.mxu0 %v19346_v39 }
0x1ad5   :  { %v17557_v29 = vpop.f32.mrf.mxu1 }
0x1ad7   :  { %v12742_v14 = vpop.f32.mrf.mxu1 }
0x1ad9   :  { %v17567_v20 = vpop.f32.mrf.mxu1 }
0x1adb   :  { %v12903_v21 = vpop.f32.mrf.mxu1 }
0x1add   :  { %v17552_v33 = vpop.f32.mrf.mxu0  ;;  %v17577_v36 = vpop.f32.mrf.mxu1 }
0x1ade   :  { %v12749_v51 = vadd.f32 %v17557_v29, %v17552_v33 }
0x1adf   :  { %v12656_v5 = vpop.f32.mrf.mxu0  ;;  %v13063_v17 = vpop.f32.mrf.mxu1 }
0x1ae0   :  { %v12743_v52 = vadd.f32 %v12742_v14, %v12656_v5 }
0x1ae1   :  { %v17562_v56 = vpop.f32.mrf.mxu0  ;;  %v17587_v8 = vpop.f32.mrf.mxu1 }
0x1ae2   :  { %v12830_v53 = vadd.f32 %v17562_v56, %v12749_v51 }
0x1ae3   :  { %v12822_v60 = vpop.f32.mrf.mxu0  ;;  %v13241_v11 = vpop.f32.mrf.mxu1 }
0x1ae4   :  { %v12823_v49 = vadd.f32 %v12822_v60, %v12743_v52  ;;  %v12912_v50 = vadd.f32 %v17567_v20, %v12830_v53 }
0x1ae5   :  { %v17572_v34 = vpop.f32.mrf.mxu0  ;;  %v17597_v23 = vpop.f32.mrf.mxu1 }
0x1ae6   :  { %v12992_v58 = vadd.f32 %v17572_v34, %v12912_v50  ;;  %v12904_v61 = vadd.f32 %v12903_v21, %v12823_v49 }
0x1ae7   :  { %v12985_v13 = vpop.f32.mrf.mxu0  ;;  %v13402_v46 = vpop.f32.mrf.mxu1 }
0x1ae8   :  { %v13070_v1 = vadd.f32 %v17577_v36, %v12992_v58  ;;  %v12986_v42 = vadd.f32 %v12985_v13, %v12904_v61 }
0x1ae9   :  { %v17582_v3 = vpop.f32.mrf.mxu0  ;;  %v17607_v6 = vpop.f32.mrf.mxu1 }
0x1aea   :  { %v19429_v28 = vadd.f32 %v13070_v1, %v19320_v4  ;;  %v13064_v40 = vadd.f32 %v13063_v17, %v12986_v42  ;;  %v13248_v62 = vadd.f32 %v17587_v8, %v17582_v3 }
0x1aeb   :  { %v13155_v59 = vpop.f32.mrf.mxu0  ;;  %v13562_v30 = vpop.f32.mrf.mxu1 }
0x1aec   :  { %v19432_v12 = vadd.f32 %v13064_v40, %v19322_v41  ;;  %v13242_v15 = vadd.f32 %v13241_v11, %v13155_v59 }
0x1aee   :  { %v17592_v10 = vpop.f32.mrf.mxu0 }
0x1aef   :  { %v13329_v16 = vadd.f32 %v17592_v10, %v13248_v62 }
0x1af0   :  { %v13321_v48 = vpop.f32.mrf.mxu0 }
0x1af1   :  { %v13322_v19 = vadd.f32 %v13321_v48, %v13242_v15  ;;  %v13411_v55 = vadd.f32 %v17597_v23, %v13329_v16 }
0x1af2   :  { %v17602_v25 = vpop.f32.mrf.mxu0 }
0x1af3   :  { %v13491_v22 = vadd.f32 %v17602_v25, %v13411_v55  ;;  %v13403_v47 = vadd.f32 %v13402_v46, %v13322_v19 }
0x1af4   :  { %v13484_v4 = vpop.f32.mrf.mxu0 }
0x1af5   :  { %v13569_v24 = vadd.f32 %v17607_v6, %v13491_v22  ;;  %v13485_v18 = vadd.f32 %v13484_v4, %v13403_v47 }
0x1af7   :  { %v13573_v54 = vmul.f32 0.35355338, %v13569_v24  ;;  %v13563_v35 = vadd.f32 %v13562_v30, %v13485_v18 }
0x1af9   :  { %v13572_v41 = vmul.f32 0.35355338, %v13563_v35  ;;  %v13575_v27 = vadd.f32 %v17965_v26, %v13573_v54 }
0x1afb   :  { %v13579_v31 = vsel %vm1759_vm3, %v13575_v27, -inf  ;;  %v13574_v32 = vadd.f32 %v17966_v38, %v13572_v41 }
0x1afc   :  { %13580 = vmax.xlane.f32.xlu0 %v13579_v31 }
0x1afd   :  { %v13576_v0 = vsel %vm1759_vm3, %v13574_v32, -inf }
0x1afe   :  { %13577 = vmax.xlane.f32.xlu1 %v13576_v0 }
0x1b85   :  { %v13581_v2 = vpop.xlane.xlu0 %13580 }
0x1b86   :  { %v13583_v57 = vsub.f32 %v13575_v27, %v13581_v2 }
0x1b87   :  { %v13578_v29 = vpop.xlane.xlu1 %13577 }
0x1b88   :  { %v13582_v14 = vsub.f32 %v13574_v32, %v13578_v29  ;;  %v13586_v20 = vmul.f32 1.442695, %v13583_v57 }
0x1b8a   :  { %v13584_v21 = vmul.f32 1.442695, %v13582_v14 }
0x1b8c   :  { %17935 = vpow2.f32 %v13584_v21 }
0x1b8d   :  { %17937 = vpow2.f32 %v13586_v20 }
0x1b99   :  { %v17936_v33 = vpop.eup %17935 }
0x1b9a   :  { %v13588_v36 = vsel %vm1759_vm3, %v17936_v33, 0.0  ;;  %v17938_v51 = vpop.eup %17937 }
0x1b9b   :  { %13589 = vadd.xlane.f32.xlu0 %v13588_v36  ;;  %v13591_v5 = vsel %vm1759_vm3, %v17938_v51, 0.0 }
0x1b9f   :  { %13592 = vadd.xlane.f32.xlu0 %v13591_v5 }
0x1c24   :  { %v13590_v17 = vpop.xlane.xlu0 %13589 }
0x1c25   :  { %17939 = vrcp.f32 %v13590_v17 }
0x1c28   :  { %v13593_v52 = vpop.xlane.xlu0 %13592 }
0x1c29   :  { %17941 = vrcp.f32 %v13593_v52 }
0x1c32   :  { %v17940_v56 = vpop.eup %17939 }
0x1c33   :  { %v13596_v53 = vmul.f32 %v17940_v56, %v17936_v33 }
0x1c35   :  { %v13599_v8 = vsel %vm1759_vm3, %v13596_v53, 0 }
0x1c36   :  { %v17942_v60 = vpop.eup %17941  ;;  %v13671_v49 = vand.u32 4294901760, %v13599_v8 }
0x1c37   :  { %v13597_v50 = vmul.f32 %v17942_v60, %v17938_v51 }
0x1c38   :  { %17619 = vmatprep.mubr.f32.mxu1 %v13671_v49  ;;  %v13672_v34 = vsub.f32 %v13599_v8, %v13671_v49 }
0x1c39   :  { %v13602_v11 = vsel %vm1759_vm3, %v13597_v50, 0 }
0x1c3a   :  { %v13681_v58 = vand.u32 4294901760, %v13602_v11  ;;  %v13673_v61 = vand.u32 4294901760, %v13672_v34 }
0x1c3c   :  { %v13682_v13 = vsub.f32 %v13602_v11, %v13681_v58  ;;  %17620 = vmatmul.mubr.f32.vlgmr.msra.gmra.mxu1 %v13681_v58  ;;  %v13674_v1 = vsub.f32 %v13672_v34, %v13673_v61 }
0x1c3d   :  { %17630 = vmatpush3.msra.mxu1 %v19340_v43  ;;  %17633 = vmatprep.mubr.f32.mxu1 %v13673_v61 }
0x1c3e   :  { %17631 = vmatprep.subr.mxu1 %v19338_v45  ;;  %v13675_v42 = vand.u32 4294901760, %v13674_v1  ;;  %v13683_v3 = vand.u32 4294901760, %v13682_v13 }
0x1c3f   :  { %17632 = vmatpush3.msra.mxu1 %v19338_v45 }
0x1c40   :  { %17643 = vmatprep.subr.mxu1 %v19340_v43  ;;  %17612 = vmatprep.mubr.f32.mxu0 %v13675_v42  ;;  %v13684_v23 = vsub.f32 %v13682_v13, %v13683_v3 }
0x1c41   :  { %17634 = vmatmul.mubr.f32.vlgmr.msra.gmra.mxu1 %v13683_v3 }
0x1c42   :  { %17644 = vmatpush3.msra.mxu1 %v19340_v43  ;;  %17647 = vmatprep.mubr.f32.mxu1 %v13671_v49  ;;  %v13685_v40 = vand.u32 4294901760, %v13684_v23 }
0x1c43   :  { %17645 = vmatprep.subr.mxu1 %v19338_v45 }
0x1c44   :  { %17646 = vmatpush3.msra.mxu1 %v19338_v45  ;;  %17613 = vmatmul.mubr.f32.vlgmr.msra.gmra.mxu0 %v13685_v40  ;;  %v8488_v45 = vld [vmem:[%s19783_s6 + $0x18] sm:$0xff] }
0x1c45   :  { %17623 = vmatpush3.msra.mxu0 %v19346_v39  ;;  %17648 = vmatmul.mubr.f32.vlgmr.msra.gmra.mxu1 %v13681_v58  ;;  %v14143_v43 = vand.u32 4294901760, %v8488_v45 }
0x1c46   :  { %17624 = vmatprep.subr.mxu0 %v19343_v37  ;;  %17626 = vmatprep.mubr.f32.mxu0 %v13672_v34 }
0x1c47   :  { %17625 = vmatpush3.msra.mxu0 %v19343_v37  ;;  %v14230_v39 = vsub.f32 %v8488_v45, %v14143_v43 }
0x1c48   :  { %17636 = vmatprep.subr.mxu0 %v19354_v44  ;;  %17627 = vmatmul.mubr.f32.vlgmr.msra.gmra.mxu0 %v13682_v13 }
0x1c49   :  { %17637 = vmatpush3.msra.mxu0 %v19354_v44  ;;  %17640 = vmatprep.mubr.f32.mxu0 %v13671_v49  ;;  %v14231_v37 = vand.u32 4294901760, %v14230_v39 }
0x1c4a   :  { %17638 = vmatprep.subr.mxu0 %v19349_v63 }
0x1c4b   :  { %17639 = vmatpush3.msra.mxu0 %v19349_v63  ;;  %v14232_v59 = vsub.f32 %v14230_v39, %v14231_v37 }
0x1c4c   :  { %17641 = vmatmul.mubr.f32.vlgmr.msra.gmra.mxu0 %v13681_v58  ;;  %17650 = vmatprep.subr.mxu0 %v14143_v43 }
0x1c4d   :  { %17651 = vmatpush3.msra.mxu0 %v14143_v43  ;;  %v14233_v62 = vand.u32 4294901760, %v14232_v59 }
0x1c4e   :  { %17660 = vmatprep.subr.mxu0 %v14230_v39 }
0x1c4f   :  { %17655 = vmatprep.subr.mxu1 %v14233_v62 }
0x1c50   :  { %17656 = vmatpush3.msra.mxu1 %v14233_v62 }
0x1c51   :  { %17665 = vmatprep.subr.mxu1 %v14143_v43 }
0x1cfc   :  { %v17621_v44 = vpop.f32.mrf.mxu1 }
0x1cfe   :  { %v13768_v46 = vpop.f32.mrf.mxu1 }
0x1d01   :  { %v17635_v10 = vpop.f32.mrf.mxu1 }
0x1d03   :  { %v13932_v48 = vpop.f32.mrf.mxu1 }
0x1d04   :  { %v17614_v63 = vpop.f32.mrf.mxu0 }
0x1d05   :  { %v13775_v16 = vadd.f32 %v17621_v44, %v17614_v63  ;;  %v17649_v4 = vpop.f32.mrf.mxu1 }
0x1d06   :  { %v13677_v15 = vpop.f32.mrf.mxu0 }
0x1d07   :  { %v13769_v55 = vadd.f32 %v13768_v46, %v13677_v15  ;;  %v14096_v26 = vpop.f32.mrf.mxu1 }
0x1d08   :  { %v17628_v19 = vpop.f32.mrf.mxu0 }
0x1d09   :  { %v13858_v6 = vadd.f32 %v17628_v19, %v13775_v16 }
0x1d0a   :  { %v13850_v25 = vpop.f32.mrf.mxu0 }
0x1d0b   :  { %v13851_v22 = vadd.f32 %v13850_v25, %v13769_v55  ;;  %v13941_v47 = vadd.f32 %v17635_v10, %v13858_v6 }
0x1d0c   :  { %v17642_v24 = vpop.f32.mrf.mxu0 }
0x1d0d   :  { %v14024_v18 = vadd.f32 %v17642_v24, %v13941_v47  ;;  %v13933_v30 = vadd.f32 %v13932_v48, %v13851_v22  ;;  %v14627_v48 = vld [vmem:[%s19784_s7] sm:$0xff] }
0x1d0e   :  { %v14017_v54 = vpop.f32.mrf.mxu0  ;;  %v19497_v19 = vand.u32 4294901760, %v14627_v48 }
0x1d0f   :  { %v14103_v35 = vadd.f32 %v17649_v4, %v14024_v18  ;;  %v14018_v41 = vadd.f32 %v14017_v54, %v13933_v30 }
0x1d10   :  { %v19510_v22 = vsub.f32 %v14627_v48, %v19497_v19 }
0x1d11   :  { %v14110_v27 = vsel %vm1261_vm2, %v14103_v35, 0  ;;  %v14097_v31 = vadd.f32 %v14096_v26, %v14018_v41 }
0x1d12   :  { %v14188_v38 = vand.u32 4294901760, %v14110_v27  ;;  %v19524_v18 = vand.u32 4294901760, %v19510_v22 }
0x1d13   :  { %v14107_v32 = vsel %vm1261_vm2, %v14097_v31, 0 }
0x1d14   :  { %v14189_v0 = vsub.f32 %v14110_v27, %v14188_v38  ;;  %v14178_v2 = vand.u32 4294901760, %v14107_v32  ;;  %v14775_v27 = vsub.f32 %v19510_v22, %v19524_v18 }
0x1d16   :  { %v14190_v57 = vand.u32 4294901760, %v14189_v0  ;;  %v14179_v29 = vsub.f32 %v14107_v32, %v14178_v2  ;;  %17657 = vmatprep.mubr.f32.mxu1 %v14178_v2 }
0x1d17   :  { %17658 = vmatmul.mubr.f32.vlgmr.msra.gmra.mxu1 %v14188_v38 }
0x1d18   :  { %17666 = vmatpush3.msra.mxu1 %v14143_v43  ;;  %v14180_v14 = vand.u32 4294901760, %v14179_v29  ;;  %v14191_v20 = vsub.f32 %v14189_v0, %v14190_v57 }
0x1d19   :  { %17675 = vmatprep.subr.mxu1 %v14143_v43 }
0x1d1a   :  { %17667 = vmatprep.mubr.f32.mxu1 %v14180_v14  ;;  %v14181_v21 = vsub.f32 %v14179_v29, %v14180_v14  ;;  %v14192_v36 = vand.u32 4294901760, %v14191_v20 }
0x1d1b   :  { %17668 = vmatmul.mubr.f32.vlgmr.msra.gmra.mxu1 %v14190_v57 }
0x1d1c   :  { %17677 = vmatprep.mubr.f32.mxu1 %v14178_v2  ;;  %v14182_v33 = vand.u32 4294901760, %v14181_v21  ;;  %17676 = vmatpush3.msra.mxu1 %v14143_v43  ;;  %v15807_v21 = vld [vmem:[%s19779_s2 + $0x10] ss:$0 sm:$0xff] }
0x1d1e   :  { %17652 = vmatprep.mubr.f32.mxu0 %v14182_v33 }
0x1d1f   :  { %17653 = vmatmul.mubr.f32.vlgmr.msra.gmra.mxu0 %v14192_v36  ;;  %17678 = vmatmul.mubr.f32.vlgmr.msra.gmra.mxu1 %v14188_v38 }
0x1d20   :  { %17662 = vmatprep.mubr.f32.mxu0 %v14179_v29  ;;  %17661 = vmatpush3.msra.mxu0 %v14230_v39 }
0x1d21   :  { %17670 = vmatprep.subr.mxu0 %v14231_v37 }
0x1d23   :  { %17663 = vmatmul.mubr.f32.vlgmr.msra.gmra.mxu0 %v14189_v0 }
0x1d24   :  { %17672 = vmatprep.mubr.f32.mxu0 %v14178_v2  ;;  %17671 = vmatpush3.msra.mxu0 %v14231_v37 }
0x1d27   :  { %17673 = vmatmul.mubr.f32.vlgmr.msra.gmra.mxu0 %v14188_v38  ;;  %v14776_v38 = vand.u32 4294901760, %v14775_v27 }
0x1dd7   :  { %v17659_v51 = vpop.f32.mrf.mxu1 }
0x1dd9   :  { %v14270_v5 = vpop.f32.mrf.mxu1 }
0x1ddb   :  { %v17669_v17 = vpop.f32.mrf.mxu1 }
0x1ddd   :  { %v14431_v8 = vpop.f32.mrf.mxu1 }
0x1ddf   :  { %v17654_v52 = vpop.f32.mrf.mxu0  ;;  %v17679_v61 = vpop.f32.mrf.mxu1 }
0x1de0   :  { %v14277_v53 = vadd.f32 %v17659_v51, %v17654_v52 }
0x1de1   :  { %v14184_v56 = vpop.f32.mrf.mxu0  ;;  %v14591_v45 = vpop.f32.mrf.mxu1 }
0x1de2   :  { %v14271_v49 = vadd.f32 %v14270_v5, %v14184_v56 }
0x1de3   :  { %v17664_v60 = vpop.f32.mrf.mxu0 }
0x1de4   :  { %v14358_v50 = vadd.f32 %v17664_v60, %v14277_v53 }
0x1de5   :  { %v14350_v34 = vpop.f32.mrf.mxu0 }
0x1de6   :  { %v14351_v11 = vadd.f32 %v14350_v34, %v14271_v49  ;;  %v14440_v58 = vadd.f32 %v17669_v17, %v14358_v50 }
0x1de7   :  { %v17674_v13 = vpop.f32.mrf.mxu0 }
0x1de8   :  { %v14520_v1 = vadd.f32 %v17674_v13, %v14440_v58  ;;  %v14432_v42 = vadd.f32 %v14431_v8, %v14351_v11 }
0x1de9   :  { %v14513_v3 = vpop.f32.mrf.mxu0 }
0x1dea   :  { %v14598_v23 = vadd.f32 %v17679_v61, %v14520_v1  ;;  %v14514_v40 = vadd.f32 %v14513_v3, %v14432_v42  ;;  %v15196_v1 = vld [vmem:[%s19785_s8 + $0x38] sm:$0xff]  ;;  %v15195_v42 = vld [vmem:[%s19785_s8 + $0x30] sm:$0xff]  ;;  %v15194_v3 = vld [vmem:[%s19785_s8 + $0x28] sm:$0xff] }
0x1dec   :  { %v14602_v43 = vadd.f32 %v14598_v23, %v19429_v28  ;;  %v14592_v39 = vadd.f32 %v14591_v45, %v14514_v40  ;;  %v19587_v23 = vand.u32 4294901760, %v15196_v1  ;;  %v19589_v40 = vand.u32 4294901760, %v15195_v42 }
0x1ded   :  { %v19591_v45 = vand.u32 4294901760, %v15194_v3 }
0x1dee   :  { %v19467_v37 = vadd.f32 %v14602_v43, %v18869_v7  ;;  %v14601_v59 = vadd.f32 %v14592_v39, %v19432_v12  ;;  %v14630_v7 = vld [vmem:[%s19784_s7 + $0x18] sm:$0xff]  ;;  %v14628_v12 = vld [vmem:[%s19784_s7 + $0x8] sm:$0xff]  ;;  %v15193_v43 = vld [vmem:[%s19785_s8 + $0x20] sm:$0xff] }
0x1def   :  { %v19488_v63 = vand.u32 4294901760, %v14630_v7  ;;  %v19492_v16 = vand.u32 4294901760, %v14628_v12  ;;  %v15192_v39 = vld [vmem:[%s19785_s8 + $0x18] sm:$0xff] }
0x1df0   :  { %v19471_v62 = vadd.f32 %v14601_v59, %v18874_v9  ;;  %v14606_v44 = vmul.f32 %v19467_v37, %v19467_v37  ;;  %v14629_v9 = vld [vmem:[%s19784_s7 + $0x10] sm:$0xff]  ;;  %v19599_v59 = vand.u32 4294901760, %v15193_v43 }
0x1df1   :  { %v19490_v15 = vand.u32 4294901760, %v14629_v9  ;;  %v19500_v55 = vsub.f32 %v14630_v7, %v19488_v63  ;;  %v19506_v25 = vsub.f32 %v14628_v12, %v19492_v16  ;;  %17680 = vmatprep.subr.mxu0 %v19488_v63 }
0x1df2   :  { %v14610_v46 = vsel %vm60_vm0, %v14606_v44, 0.0  ;;  %v14605_v10 = vmul.f32 %v19471_v62, %v19471_v62  ;;  %17681 = vmatpush3.msra.mxu0 %v19488_v63  ;;  %v19601_v44 = vand.u32 4294901760, %v15192_v39  ;;  %v19614_v7 = vsub.f32 %v15193_v43, %v19599_v59 }
0x1df3   :  { %14611 = vadd.xlane.f32.xlu0 %v14610_v46  ;;  %v19503_v6 = vsub.f32 %v14629_v9, %v19490_v15  ;;  %v19514_v47 = vand.u32 4294901760, %v19500_v55  ;;  %v19520_v24 = vand.u32 4294901760, %v19506_v25  ;;  %17682 = vmatprep.subr.mxu0 %v19490_v15  ;;  %v19604_v46 = vsub.f32 %v15196_v1, %v19587_v23 }
0x1df4   :  { %v14607_v28 = vsel %vm60_vm0, %v14605_v10, 0.0  ;;  %17683 = vmatpush3.msra.mxu0 %v19490_v15  ;;  %v19607_v10 = vsub.f32 %v15195_v42, %v19589_v40  ;;  %v19617_v9 = vsub.f32 %v15192_v39, %v19601_v44 }
0x1df5   :  { %14608 = vadd.xlane.f32.xlu1 %v14607_v28  ;;  %v19517_v4 = vand.u32 4294901760, %v19503_v6  ;;  %v14754_v30 = vsub.f32 %v19500_v55, %v19514_v47  ;;  %v14768_v35 = vsub.f32 %v19506_v25, %v19520_v24  ;;  %17684 = vmatprep.subr.mxu0 %v19492_v16  ;;  %v19610_v28 = vsub.f32 %v15194_v3, %v19591_v45 }
0x1df6   :  { %17685 = vmatpush3.msra.mxu0 %v19492_v16  ;;  %v19621_v12 = vand.u32 4294901760, %v19604_v46 }
0x1df7   :  { %v14761_v54 = vsub.f32 %v19503_v6, %v19517_v4  ;;  %v14755_v41 = vand.u32 4294901760, %v14754_v30  ;;  %17686 = vmatprep.subr.mxu0 %v19497_v19  ;;  %v14769_v31 = vand.u32 4294901760, %v14768_v35 }
0x1df8   :  { %17687 = vmatpush3.msra.mxu0 %v19497_v19  ;;  %v15316_v48 = vsub.f32 %v19604_v46, %v19621_v12 }
0x1df9   :  { %v14762_v26 = vand.u32 4294901760, %v14761_v54  ;;  %17691 = vmatprep.subr.mxu1 %v14755_v41  ;;  %17702 = vmatprep.subr.mxu0 %v19500_v55  ;;  %v15191_v54 = vld [vmem:[%s19785_s8 + $0x10] sm:$0xff] }
0x1dfa   :  { %17692 = vmatpush3.msra.mxu1 %v14755_v41  ;;  %v19656_v35 = vand.u32 4294901760, %v15191_v54  ;;  %v15190_v41 = vld [vmem:[%s19785_s8 + $0x8] sm:$0xff] }
0x1dfb   :  { %17693 = vmatprep.subr.mxu1 %v14762_v26 }
0x1dfc   :  { %17694 = vmatpush3.msra.mxu1 %v14762_v26  ;;  %v19662_v27 = vsub.f32 %v15191_v54, %v19656_v35 }
0x1dfd   :  { %17695 = vmatprep.subr.mxu1 %v14769_v31 }
0x1dfe   :  { %17696 = vmatpush3.msra.mxu1 %v14769_v31  ;;  %v19664_v31 = vand.u32 4294901760, %v15190_v41 }
0x1dff   :  { %17697 = vmatprep.subr.mxu1 %v14776_v38 }
0x1e00   :  { %17698 = vmatpush3.msra.mxu1 %v14776_v38  ;;  %v15189_v38 = vld [vmem:[%s19785_s8] sm:$0xff]  ;;  %s17995_s8 = smov 64  }
0x1e01   :  { %17713 = vmatprep.subr.mxu1 %v19488_v63 }
0x1e7c   :  { %v14612_v32 = vpop.xlane.xlu0 %14611 }
0x1e7d   :  { %v14614_v0 = vmul.f32 0.03125, %v14612_v32  ;;  %v19672_v32 = vand.u32 4294901760, %v19662_v27 }
0x1e7e   :  { %v14609_v2 = vpop.xlane.xlu1 %14608 }
0x1e7f   :  { %v14616_v57 = vadd.f32 1e-06, %v14614_v0  ;;  %v14613_v29 = vmul.f32 0.03125, %v14609_v2  ;;  %v19675_v0 = vsub.f32 %v15190_v41, %v19664_v31  ;;  %v19677_v2 = vand.u32 4294901760, %v15189_v38 }
0x1e81   :  { %17943 = vrsqrt.f32 %v14616_v57  ;;  %v14615_v14 = vadd.f32 1e-06, %v14613_v29 }
0x1e83   :  { %17945 = vrsqrt.f32 %v14615_v14  ;;  %v15351_v14 = vsub.f32 %v19662_v27, %v19672_v32 }
0x1e8e   :  { %v17944_v20 = vpop.eup %17943 }
0x1e8f   :  { %v14620_v33 = vmul.f32 %v17944_v20, %v19467_v37  ;;  %v19684_v20 = vand.u32 4294901760, %v19675_v0 }
0x1e90   :  { %v17946_v36 = vpop.eup %17945 }
0x1e91   :  { %v14619_v51 = vmul.f32 %v17946_v36, %v19471_v62  ;;  %v14626_v5 = vmul.f32 %v15807_v21, %v14620_v33  ;;  %v15352_v36 = vand.u32 4294901760, %v15351_v14 }
0x1e93   :  { %v14625_v17 = vmul.f32 %v15807_v21, %v14619_v51  ;;  %v14635_v52 = vsel %vm60_vm0, %v14626_v5, 0  ;;  %v19687_v21 = vsub.f32 %v15189_v38, %v19677_v2  ;;  %v15358_v51 = vsub.f32 %v19675_v0, %v19684_v20 }
0x1e94   :  { %v14716_v56 = vand.u32 4294901760, %v14635_v52 }
0x1e95   :  { %v14632_v53 = vsel %vm60_vm0, %v14625_v17, 0  ;;  %v19694_v5 = vand.u32 4294901760, %v19687_v21 }
0x1e96   :  { %v14706_v8 = vand.u32 4294901760, %v14632_v53  ;;  %v14717_v60 = vsub.f32 %v14635_v52, %v14716_v56 }
0x1e98   :  { %17699 = vmatprep.mubr.f32.mxu1 %v14706_v8  ;;  %v14707_v49 = vsub.f32 %v14632_v53, %v14706_v8  ;;  %v14718_v50 = vand.u32 4294901760, %v14717_v60  ;;  %v15365_v53 = vsub.f32 %v19687_v21, %v19694_v5 }
0x1e99   :  { %17700 = vmatmul.mubr.f32.vlgmr.msra.gmra.mxu1 %v14716_v56 }
0x1e9a   :  { %17714 = vmatpush3.msra.mxu1 %v19488_v63  ;;  %v14708_v34 = vand.u32 4294901760, %v14707_v49  ;;  %v14719_v58 = vsub.f32 %v14717_v60, %v14718_v50 }
0x1e9b   :  { %17715 = vmatprep.subr.mxu1 %v19490_v15 }
0x1e9c   :  { %17716 = vmatpush3.msra.mxu1 %v19490_v15  ;;  %17721 = vmatprep.mubr.f32.mxu1 %v14708_v34  ;;  %v14709_v11 = vsub.f32 %v14707_v49, %v14708_v34  ;;  %v14720_v13 = vand.u32 4294901760, %v14719_v58  ;;  %v15366_v34 = vand.u32 4294901760, %v15365_v53 }
0x1e9d   :  { %17717 = vmatprep.subr.mxu1 %v19492_v16 }
0x1e9e   :  { %17718 = vmatpush3.msra.mxu1 %v19492_v16  ;;  %v14710_v61 = vand.u32 4294901760, %v14709_v11 }
0x1e9f   :  { %17719 = vmatprep.subr.mxu1 %v19497_v19 }
0x1ea0   :  { %17720 = vmatpush3.msra.mxu1 %v19497_v19  ;;  %17688 = vmatprep.mubr.f32.mxu0 %v14710_v61 }
0x1ea1   :  { %17722 = vmatmul.mubr.f32.vlgmr.msra.gmra.mxu1 %v14718_v50  ;;  %17735 = vmatprep.subr.mxu1 %v19488_v63 }
0x1ea2   :  { %17689 = vmatmul.mubr.f32.vlgmr.msra.gmra.mxu0 %v14720_v13  ;;  %17736 = vmatpush3.msra.mxu1 %v19488_v63  ;;  %v19624_v63 = vand.u32 4294901760, %v19607_v10 }
0x1ea3   :  { %17703 = vmatpush3.msra.mxu0 %v19500_v55  ;;  %17743 = vmatprep.mubr.f32.mxu1 %v14706_v8 }
0x1ea4   :  { %17704 = vmatprep.subr.mxu0 %v19503_v6  ;;  %17710 = vmatprep.mubr.f32.mxu0 %v14707_v49 }
0x1ea5   :  { %17737 = vmatprep.subr.mxu1 %v19490_v15  ;;  %17705 = vmatpush3.msra.mxu0 %v19503_v6  ;;  %v19641_v6 = vand.u32 4294901760, %v19617_v9 }
0x1ea6   :  { %17738 = vmatpush3.msra.mxu1 %v19490_v15  ;;  %17706 = vmatprep.subr.mxu0 %v19506_v25  ;;  %v19627_v15 = vand.u32 4294901760, %v19610_v28 }
0x1ea7   :  { %17739 = vmatprep.subr.mxu1 %v19492_v16  ;;  %17707 = vmatpush3.msra.mxu0 %v19506_v25  ;;  %v15317_v25 = vand.u32 4294901760, %v15316_v48 }
0x1ea8   :  { %17740 = vmatpush3.msra.mxu1 %v19492_v16  ;;  %17708 = vmatprep.subr.mxu0 %v19510_v22  ;;  %v19631_v16 = vand.u32 4294901760, %v19614_v7  ;;  %v15330_v55 = vsub.f32 %v19610_v28, %v19627_v15 }
0x1ea9   :  { %17741 = vmatprep.subr.mxu1 %v19497_v19  ;;  %17709 = vmatpush3.msra.mxu0 %v19510_v22 }
0x1eaa   :  { %17742 = vmatpush3.msra.mxu1 %v19497_v19  ;;  %17711 = vmatmul.mubr.f32.vlgmr.msra.gmra.mxu0 %v14717_v60  ;;  %v15323_v19 = vsub.f32 %v19607_v10, %v19624_v63 }
0x1eab   :  { %17724 = vmatprep.subr.mxu0 %v19514_v47  ;;  %17744 = vmatmul.mubr.f32.vlgmr.msra.gmra.mxu1 %v14716_v56 }
0x1eac   :  { %17725 = vmatpush3.msra.mxu0 %v19514_v47  ;;  %17732 = vmatprep.mubr.f32.mxu0 %v14706_v8  ;;  %v15324_v22 = vand.u32 4294901760, %v15323_v19  ;;  %v15337_v47 = vsub.f32 %v19614_v7, %v19631_v16 }
0x1ead   :  { %17726 = vmatprep.subr.mxu0 %v19517_v4  ;;  %17765 = vmatprep.subr.mxu1 %v15317_v25 }
0x1eae   :  { %17727 = vmatpush3.msra.mxu0 %v19517_v4  ;;  %v15331_v4 = vand.u32 4294901760, %v15330_v55  ;;  %17766 = vmatpush3.msra.mxu1 %v15317_v25 }
0x1eaf   :  { %17728 = vmatprep.subr.mxu0 %v19520_v24  ;;  %17767 = vmatprep.subr.mxu1 %v15324_v22 }
0x1eb0   :  { %17729 = vmatpush3.msra.mxu0 %v19520_v24  ;;  %v15344_v24 = vsub.f32 %v19617_v9, %v19641_v6  ;;  %17768 = vmatpush3.msra.mxu1 %v15324_v22 }
0x1eb1   :  { %17730 = vmatprep.subr.mxu0 %v19524_v18  ;;  %17769 = vmatprep.subr.mxu1 %v15331_v4 }
0x1eb2   :  { %17731 = vmatpush3.msra.mxu0 %v19524_v18  ;;  %v15338_v18 = vand.u32 4294901760, %v15337_v47  ;;  %v15345_v30 = vand.u32 4294901760, %v15344_v24  ;;  %17770 = vmatpush3.msra.mxu1 %v15331_v4 }
0x1eb3   :  { %17733 = vmatmul.mubr.f32.vlgmr.msra.gmra.mxu0 %v14716_v56  ;;  %17746 = vmatprep.subr.mxu0 %v19587_v23  ;;  %v15359_v56 = vand.u32 4294901760, %v15358_v51 }
0x1eb4   :  { %17747 = vmatpush3.msra.mxu0 %v19587_v23  ;;  %17771 = vmatprep.subr.mxu1 %v15338_v18 }
0x1eb5   :  { %17748 = vmatprep.subr.mxu0 %v19589_v40  ;;  %17772 = vmatpush3.msra.mxu1 %v15338_v18 }
0x1eb6   :  { %17749 = vmatpush3.msra.mxu0 %v19589_v40  ;;  %17773 = vmatprep.subr.mxu1 %v15345_v30 }
0x1eb7   :  { %17750 = vmatprep.subr.mxu0 %v19591_v45  ;;  %17774 = vmatpush3.msra.mxu1 %v15345_v30 }
0x1eb8   :  { %17751 = vmatpush3.msra.mxu0 %v19591_v45  ;;  %17775 = vmatprep.subr.mxu1 %v15352_v36 }
0x1eb9   :  { %17752 = vmatprep.subr.mxu0 %v19599_v59  ;;  %17776 = vmatpush3.msra.mxu1 %v15352_v36 }
0x1eba   :  { %17753 = vmatpush3.msra.mxu0 %v19599_v59  ;;  %17777 = vmatprep.subr.mxu1 %v15359_v56 }
0x1ebb   :  { %17754 = vmatprep.subr.mxu0 %v19601_v44  ;;  %17778 = vmatpush3.msra.mxu1 %v15359_v56 }
0x1ebc   :  { %17755 = vmatpush3.msra.mxu0 %v19601_v44  ;;  %17779 = vmatprep.subr.mxu1 %v15366_v34 }
0x1ebd   :  { %17756 = vmatprep.subr.mxu0 %v19656_v35  ;;  %17780 = vmatpush3.msra.mxu1 %v15366_v34 }
0x1ebe   :  { %17757 = vmatpush3.msra.mxu0 %v19656_v35  ;;  %17803 = vmatprep.subr.mxu1 %v19587_v23 }
0x1ebf   :  { %17758 = vmatprep.subr.mxu0 %v19664_v31 }
0x1ec0   :  { %17759 = vmatpush3.msra.mxu0 %v19664_v31 }
0x1ec1   :  { %17760 = vmatprep.subr.mxu0 %v19677_v2 }
0x1ec2   :  { %17761 = vmatpush3.msra.mxu0 %v19677_v2 }
0x1ec3   :  { %17784 = vmatprep.subr.mxu0 %v19604_v46 }
0x1f59   :  { %v17701_v57 = vpop.f32.mrf.mxu1 }
0x1f5b   :  { %v14813_v17 = vpop.f32.mrf.mxu1 }
0x1f61   :  { %v17723_v8 = vpop.f32.mrf.mxu1 }
0x1f62   :  { %v17690_v26 = vpop.f32.mrf.mxu0 }
0x1f63   :  { %v14820_v52 = vadd.f32 %v17701_v57, %v17690_v26  ;;  %v14983_v58 = vpop.f32.mrf.mxu1 }
0x1f64   :  { %v14712_v29 = vpop.f32.mrf.mxu0 }
0x1f65   :  { %v14814_v49 = vadd.f32 %v14813_v17, %v14712_v29 }
0x1f6a   :  { %v17712_v33 = vpop.f32.mrf.mxu0 }
0x1f6b   :  { %v14907_v50 = vadd.f32 %v17712_v33, %v14820_v52  ;;  %v17745_v13 = vpop.f32.mrf.mxu1 }
0x1f6c   :  { %v14899_v60 = vpop.f32.mrf.mxu0 }
0x1f6d   :  { %v14900_v11 = vadd.f32 %v14899_v60, %v14814_v49  ;;  %v14992_v61 = vadd.f32 %v17723_v8, %v14907_v50  ;;  %v15155_v19 = vpop.f32.mrf.mxu1 }
0x1f6f   :  { %v14984_v3 = vadd.f32 %v14983_v58, %v14900_v11 }
0x1f73   :  { %v17734_v1 = vpop.f32.mrf.mxu0 }
0x1f74   :  { %v15081_v42 = vadd.f32 %v17734_v1, %v14992_v61 }
0x1f75   :  { %v15074_v43 = vpop.f32.mrf.mxu0 }
0x1f76   :  { %v15162_v39 = vadd.f32 %v17745_v13, %v15081_v42  ;;  %v15075_v48 = vadd.f32 %v15074_v43, %v14984_v3 }
0x1f78   :  { %v15156_v55 = vadd.f32 %v15155_v19, %v15075_v48  ;;  %15183 = vrot.lane.b32.xlu0 %v15162_v39, %s17995_s8  ;;  %v15166_v25 = vsub.f32 0.0, %v15162_v39 }
0x1f7a   :  { %15181 = vrot.lane.b32.xlu1 %v15156_v55, %s17995_s8  ;;  %v15165_v22 = vsub.f32 0.0, %v15156_v55  ;;  %v15169_v47 = vmul.f32 1.442695, %v15166_v25 }
0x1f7c   :  { %v15167_v4 = vmul.f32 1.442695, %v15165_v22  ;;  %17947 = vpow2.f32 %v15169_v47 }
0x1f7e   :  { %17949 = vpow2.f32 %v15167_v4 }
0x1f89   :  { %v17948_v24 = vpop.eup %17947 }
0x1f8a   :  { %v15172_v30 = vadd.f32 1.0, %v17948_v24 }
0x1f8b   :  { %v17950_v18 = vpop.eup %17949 }
0x1f8c   :  { %v15171_v54 = vadd.f32 1.0, %v17950_v18  ;;  %17951 = vrcp.f32 %v15172_v30 }
0x1f8e   :  { %17953 = vrcp.f32 %v15171_v54 }
0x1f99   :  { %v17952_v41 = vpop.eup %17951 }
0x1f9a   :  { %v15178_v38 = vmul.f32 %v17952_v41, %v15162_v39 }
0x1f9b   :  { %v17954_v26 = vpop.eup %17953 }
0x1f9c   :  { %v15177_v14 = vmul.f32 %v17954_v26, %v15156_v55 }
0x1fea   :  { %v15184_v57 = vpop.permute.xlu0 %15183 }
0x1feb   :  { %v15188_v29 = vmul.f32 %v15184_v57, %v15178_v38 }
0x1fec   :  { %v15182_v33 = vpop.permute.xlu1 %15181 }
0x1fed   :  { %v15201_v36 = vsel %vm626_vm1, %v15188_v29, 0  ;;  %v15187_v51 = vmul.f32 %v15182_v33, %v15177_v14 }
0x1fee   :  { %v19701_v17 = vand.u32 4294901760, %v15201_v36 }
0x1fef   :  { %v15198_v52 = vsel %vm626_vm1, %v15187_v51, 0 }
0x1ff0   :  { %v15287_v56 = vsub.f32 %v15201_v36, %v19701_v17  ;;  %v15276_v53 = vand.u32 4294901760, %v15198_v52 }
0x1ff2   :  { %v15288_v8 = vand.u32 4294901760, %v15287_v56  ;;  %v15277_v60 = vsub.f32 %v15198_v52, %v15276_v53  ;;  %17781 = vmatprep.mubr.f32.mxu1 %v15276_v53 }
0x1ff3   :  { %17782 = vmatmul.mubr.f32.vlgmr.msra.gmra.mxu1 %v19701_v17 }
0x1ff4   :  { %17804 = vmatpush3.msra.mxu1 %v19587_v23  ;;  %v15278_v49 = vand.u32 4294901760, %v15277_v60  ;;  %v15289_v50 = vsub.f32 %v15287_v56, %v15288_v8 }
0x1ff5   :  { %17805 = vmatprep.subr.mxu1 %v19589_v40 }
0x1ff6   :  { %17806 = vmatpush3.msra.mxu1 %v19589_v40  ;;  %17819 = vmatprep.mubr.f32.mxu1 %v15278_v49  ;;  %v15279_v34 = vsub.f32 %v15277_v60, %v15278_v49  ;;  %v15290_v58 = vand.u32 4294901760, %v15289_v50 }
0x1ff7   :  { %17807 = vmatprep.subr.mxu1 %v19591_v45 }
0x1ff8   :  { %17808 = vmatpush3.msra.mxu1 %v19591_v45  ;;  %v15280_v11 = vand.u32 4294901760, %v15279_v34 }
0x1ff9   :  { %17809 = vmatprep.subr.mxu1 %v19599_v59 }
0x1ffa   :  { %17810 = vmatpush3.msra.mxu1 %v19599_v59  ;;  %17762 = vmatprep.mubr.f32.mxu0 %v15280_v11 }
0x1ffb   :  { %17811 = vmatprep.subr.mxu1 %v19601_v44  ;;  %17763 = vmatmul.mubr.f32.vlgmr.msra.gmra.mxu0 %v15290_v58 }
0x1ffc   :  { %17785 = vmatpush3.msra.mxu0 %v19604_v46  ;;  %17812 = vmatpush3.msra.mxu1 %v19601_v44 }
0x1ffd   :  { %17786 = vmatprep.subr.mxu0 %v19607_v10  ;;  %17800 = vmatprep.mubr.f32.mxu0 %v15277_v60 }
0x1ffe   :  { %17813 = vmatprep.subr.mxu1 %v19656_v35  ;;  %17787 = vmatpush3.msra.mxu0 %v19607_v10 }
0x1fff   :  { %17814 = vmatpush3.msra.mxu1 %v19656_v35  ;;  %17788 = vmatprep.subr.mxu0 %v19610_v28 }
0x2000   :  { %17815 = vmatprep.subr.mxu1 %v19664_v31  ;;  %17789 = vmatpush3.msra.mxu0 %v19610_v28 }
0x2001   :  { %17816 = vmatpush3.msra.mxu1 %v19664_v31  ;;  %17790 = vmatprep.subr.mxu0 %v19614_v7 }
0x2002   :  { %17817 = vmatprep.subr.mxu1 %v19677_v2  ;;  %17791 = vmatpush3.msra.mxu0 %v19614_v7 }
0x2003   :  { %17818 = vmatpush3.msra.mxu1 %v19677_v2  ;;  %17792 = vmatprep.subr.mxu0 %v19617_v9 }
0x2004   :  { %17820 = vmatmul.mubr.f32.vlgmr.msra.gmra.mxu1 %v15288_v8  ;;  %17841 = vmatprep.subr.mxu1 %v19587_v23 }
0x2005   :  { %17793 = vmatpush3.msra.mxu0 %v19617_v9  ;;  %17842 = vmatpush3.msra.mxu1 %v19587_v23 }
0x2006   :  { %17857 = vmatprep.mubr.f32.mxu1 %v15276_v53  ;;  %17794 = vmatprep.subr.mxu0 %v19662_v27 }
0x2007   :  { %17843 = vmatprep.subr.mxu1 %v19589_v40  ;;  %17795 = vmatpush3.msra.mxu0 %v19662_v27 }
0x2008   :  { %17844 = vmatpush3.msra.mxu1 %v19589_v40  ;;  %17796 = vmatprep.subr.mxu0 %v19675_v0 }
0x2009   :  { %17845 = vmatprep.subr.mxu1 %v19591_v45  ;;  %17797 = vmatpush3.msra.mxu0 %v19675_v0 }
0x200a   :  { %17846 = vmatpush3.msra.mxu1 %v19591_v45  ;;  %17798 = vmatprep.subr.mxu0 %v19687_v21 }
0x200b   :  { %17847 = vmatprep.subr.mxu1 %v19599_v59  ;;  %17799 = vmatpush3.msra.mxu0 %v19687_v21 }
0x200c   :  { %17848 = vmatpush3.msra.mxu1 %v19599_v59  ;;  %17801 = vmatmul.mubr.f32.vlgmr.msra.gmra.mxu0 %v15287_v56 }
0x200d   :  { %17822 = vmatprep.subr.mxu0 %v19621_v12  ;;  %17849 = vmatprep.subr.mxu1 %v19601_v44 }
0x200e   :  { %17823 = vmatpush3.msra.mxu0 %v19621_v12  ;;  %17838 = vmatprep.mubr.f32.mxu0 %v15276_v53 }
0x200f   :  { %17850 = vmatpush3.msra.mxu1 %v19601_v44  ;;  %17824 = vmatprep.subr.mxu0 %v19624_v63 }
0x2010   :  { %17851 = vmatprep.subr.mxu1 %v19656_v35  ;;  %17825 = vmatpush3.msra.mxu0 %v19624_v63 }
0x2011   :  { %17852 = vmatpush3.msra.mxu1 %v19656_v35  ;;  %17826 = vmatprep.subr.mxu0 %v19627_v15 }
0x2012   :  { %17853 = vmatprep.subr.mxu1 %v19664_v31  ;;  %17827 = vmatpush3.msra.mxu0 %v19627_v15 }
0x2013   :  { %17854 = vmatpush3.msra.mxu1 %v19664_v31  ;;  %17828 = vmatprep.subr.mxu0 %v19631_v16 }
0x2014   :  { %17855 = vmatprep.subr.mxu1 %v19677_v2  ;;  %17829 = vmatpush3.msra.mxu0 %v19631_v16 }
0x2015   :  { %17856 = vmatpush3.msra.mxu1 %v19677_v2  ;;  %17830 = vmatprep.subr.mxu0 %v19641_v6 }
0x2016   :  { %17858 = vmatmul.mubr.f32.vlgmr.msra.gmra.mxu1 %v19701_v17  ;;  %17831 = vmatpush3.msra.mxu0 %v19641_v6 }
0x2017   :  { %17832 = vmatprep.subr.mxu0 %v19672_v32 }
0x2018   :  { %17833 = vmatpush3.msra.mxu0 %v19672_v32 }
0x2019   :  { %17834 = vmatprep.subr.mxu0 %v19684_v20 }
0x201a   :  { %17835 = vmatpush3.msra.mxu0 %v19684_v20 }
0x201b   :  { %17836 = vmatprep.subr.mxu0 %v19694_v5 }
0x201c   :  { %17837 = vmatpush3.msra.mxu0 %v19694_v5 }
0x201d   :  { %17839 = vmatmul.mubr.f32.vlgmr.msra.gmra.mxu0 %v19701_v17 }
0x20b3   :  { %v17783_v40 = vpop.f32.mrf.mxu1 }
0x20b5   :  { %v15403_v44 = vpop.f32.mrf.mxu1 }
0x20bb   :  { %v17764_v23 = vpop.f32.mrf.mxu0 }
0x20bc   :  { %v15410_v46 = vadd.f32 %v17783_v40, %v17764_v23 }
0x20bd   :  { %v15282_v45 = vpop.f32.mrf.mxu0 }
0x20be   :  { %v15404_v7 = vadd.f32 %v15403_v44, %v15282_v45 }
0x20c4   :  { %v17821_v10 = vpop.f32.mrf.mxu1 }
0x20c6   :  { %v15585_v63 = vpop.f32.mrf.mxu1 }
0x20cc   :  { %v17802_v59 = vpop.f32.mrf.mxu0 }
0x20cd   :  { %v15505_v9 = vadd.f32 %v17802_v59, %v15410_v46 }
0x20ce   :  { %v15497_v28 = vpop.f32.mrf.mxu0 }
0x20cf   :  { %v15498_v12 = vadd.f32 %v15497_v28, %v15404_v7  ;;  %v15594_v15 = vadd.f32 %v17821_v10, %v15505_v9 }
0x20d1   :  { %v15586_v27 = vadd.f32 %v15585_v63, %v15498_v12 }
0x20d6   :  { %v17859_v16 = vpop.f32.mrf.mxu1 }
0x20d8   :  { %v15773_v2 = vpop.f32.mrf.mxu1 }
0x20dd   :  { %v17840_v6 = vpop.f32.mrf.mxu0 }
0x20de   :  { %v15695_v35 = vadd.f32 %v17840_v6, %v15594_v15 }
0x20df   :  { %v15688_v31 = vpop.f32.mrf.mxu0 }
0x20e0   :  { %v15780_v32 = vadd.f32 %v17859_v16, %v15695_v35  ;;  %v15689_v0 = vadd.f32 %v15688_v31, %v15586_v27 }
0x20e2   :  { %v15784_v20 = vadd.f32 %v15780_v32, %v19467_v37  ;;  %v15774_v21 = vadd.f32 %v15773_v2, %v15689_v0 }
0x20e4   :  { %15786 = vst.msk [vmem:[#allocation2 + $0x8] sm:$0xff] %vm60_vm0, %v15784_v20  ;;  %v15783_v5 = vadd.f32 %v15774_v21, %v19471_v62 }
0x20e6   :  { %15785 = vst.msk [vmem:[#allocation2] sm:$0xff] %vm60_vm0, %v15783_v5 }
0x20e7   :  { %17978 = shalt.err (!%p17975_p4)
}
0x20e8   :  { %s17997_s6 = smov 128   ;;  %s17998_s4 = smov 8  }
0x20e9   :  { %15798 = dma.vmem_to_hbm [thread:$0]  %s15793_s1, 256, %s19786_s9, [#allocation3], %s17997_s6, %s17997_s6, %s17998_s4  }
0x20ea   :  { %17987 = dma.done.wait [#allocation3], 256  }
0x20eb   :  { %17988 = vsyncadd [#allocation3], 4294967040 }
0x20ec   :  { %15802 = vsyncpa [#allocation3], 1 }

</bundles_post_ra>
